<compile_context>
chip_gen: v5e
topology: v5e:2x2
jax: 0.10.0
libtpu: 0.0.40
codegen_flags: <defaults>
</compile_context>

<pallas_src>
import functools

import jax
import jax.numpy as jnp
from jax.experimental import pallas as pl
from jax.experimental.pallas import tpu as pltpu


LANE = 128                    # TPU lane width; layer outputs are padded to this
WIDTHS = [8, 16, 32, 64]      # reduced ResNet18 widths
NUM_CLASSES = 4
BLOCKS_PER_STAGE = 2

# Static block configuration (kept OUT of the jitted params pytree).
STAGE_STRIDES = [
    [2 if (si > 0 and bi == 0) else 1 for bi in range(BLOCKS_PER_STAGE)]
    for si in range(len(WIDTHS))
]


def _round_up(x, m):
    return (x + m - 1) // m * m


def _pick_tm(m_rows, tm_default=512):
    """Pick an M tile: <= tm_default, multiple of 8, and (when M allows)
    guaranteeing >= 2 grid steps so the 'parallel' axis can be sharded across
    v7x's two TensorCores."""
    mp0 = _round_up(m_rows, 8)
    tm = min(tm_default, mp0)
    if mp0 // tm < 2 and mp0 >= 16:
        tm = _round_up((mp0 + 1) // 2, 8)
    mp = _round_up(mp0, tm)
    return tm, mp


# ----------------------------------------------------------------------------
# Pallas kernels
# ----------------------------------------------------------------------------
def _mm_kernel(a_ref, b_ref, bias_ref, o_ref, *, relu):
    # o = act(a @ b + bias); BN scale is pre-folded into b, epilogue in f32.
    acc = jnp.dot(a_ref[...], b_ref[...], preferred_element_type=jnp.float32)
    acc = acc + bias_ref[...]
    if relu:
        acc = jnp.maximum(acc, 0.0)
    o_ref[...] = acc.astype(o_ref.dtype)


def _mm_res_kernel(a_ref, b_ref, bias_ref, res_ref, o_ref, *, relu):
    # Residual branch fused into the matmul epilogue (VPU work rides under MXU).
    acc = jnp.dot(a_ref[...], b_ref[...], preferred_element_type=jnp.float32)
    acc = acc + bias_ref[...] + res_ref[...].astype(jnp.float32)
    if relu:
        acc = jnp.maximum(acc, 0.0)
    o_ref[...] = acc.astype(o_ref.dtype)


def matmul_affine(a, wk, bias_p, *, relu, residual=None, tm_default=512):
    """act(a @ wk + bias [+ residual]) as a tiled Pallas matmul.

    a:       [M, K]   im2col patches (any float dtype; cast to bf16 here).
    wk:      [Kp, Np] pre-packed bf16 weight (BN scale folded), Kp/Np % 128 == 0.
    bias_p:  [1, Np]  f32 folded BN bias.
    residual:[M, Np]  optional bf16 tensor added before the ReLU.
    Returns  [M, Np]  bf16 (lane-dense output -> unmasked vst).

    M is tiled (tm <= tm_default, >=2 grid steps when possible, axis marked
    "parallel"); weights/bias are grid-resident.  At these widths the whole
    working set is ~1 MiB, far under every generation's scoped-VMEM default;
    at real ResNet18 widths revisit vmem_limit_bytes / B buffering (see header).
    """
    M, K = a.shape
    Kp, Np = wk.shape
    assert K <= Kp and Kp % LANE == 0 and Np % LANE == 0
    tm, Mp = _pick_tm(M, tm_default)

    a_p = a.astype(jnp.bfloat16)
    if (Mp - M) or (Kp - K):
        a_p = jnp.pad(a_p, ((0, Mp - M), (0, Kp - K)))   # zeros keep math exact

    in_specs = [
        pl.BlockSpec((tm, Kp), lambda i: (i, 0)),   # A tile, pipelined over M
        pl.BlockSpec((Kp, Np), lambda i: (0, 0)),   # pre-packed weight, resident
        pl.BlockSpec((1, Np), lambda i: (0, 0)),    # bias, resident
    ]
    args = [a_p, wk, bias_p]
    res_bytes = 0
    if residual is not None:
        res = residual.astype(jnp.bfloat16)
        cr = res.shape[1]
        if cr > Np:
            res = res[:, :Np]
        elif cr < Np:
            res = jnp.pad(res, ((0, 0), (0, Np - cr)))
        if Mp != M:
            res = jnp.pad(res, ((0, Mp - M), (0, 0)))
        in_specs.append(pl.BlockSpec((tm, Np), lambda i: (i, 0)))
        args.append(res)
        res_bytes = 2 * Mp * Np
        kernel = functools.partial(_mm_res_kernel, relu=relu)
    else:
        kernel = functools.partial(_mm_kernel, relu=relu)

    cost = pl.CostEstimate(
        flops=2 * Mp * Kp * Np,
        transcendentals=0,
        bytes_accessed=2 * Mp * Kp + 2 * Kp * Np + 4 * Np + 2 * Mp * Np + res_bytes,
    )
    out = pl.pallas_call(
        kernel,
        grid=(Mp // tm,),
        in_specs=in_specs,
        out_specs=pl.BlockSpec((tm, Np), lambda i: (i, 0)),
        out_shape=jax.ShapeDtypeStruct((Mp, Np), jnp.bfloat16),
        compiler_params=pltpu.CompilerParams(dimension_semantics=("parallel",)),
        cost_estimate=cost,
    )(*args)
    return out[:M]


def _max_tree_kernel(*refs):
    *in_refs, o_ref = refs
    m = in_refs[0][...]
    for r in in_refs[1:]:
        m = jnp.maximum(m, r[...])
    o_ref[...] = m


def maxpool_3x3_s2_p1(x):
    """MaxPool 3x3/s2/p1 on channels-last bf16 x:[N,H,W,128].

    Channels stay in lanes; the 9 shifted slabs are reduced with a pure-VPU
    elementwise maximum tree (no cross-lane XLU reduce, no masked stores).
    Runs exactly once per forward on a small tensor, so the slab materialization
    is not on the critical byte stream."""
    N, H, W, C = x.shape
    xp = jnp.pad(x, ((0, 0), (1, 1), (1, 1), (0, 0)), constant_values=-jnp.inf)
    Ho = (H + 2 - 3) // 2 + 1
    Wo = (W + 2 - 3) // 2 + 1
    M = N * Ho * Wo
    slabs = [
        xp[:, i:i + 2 * Ho:2, j:j + 2 * Wo:2, :].reshape(M, C)
        for i in range(3) for j in range(3)
    ]
    tm, Mp = _pick_tm(M)
    if Mp > M:
        slabs = [jnp.pad(s, ((0, Mp - M), (0, 0))) for s in slabs]
    out = pl.pallas_call(
        _max_tree_kernel,
        grid=(Mp // tm,),
        in_specs=[pl.BlockSpec((tm, C), lambda i: (i, 0)) for _ in slabs],
        out_specs=pl.BlockSpec((tm, C), lambda i: (i, 0)),
        out_shape=jax.ShapeDtypeStruct((Mp, C), x.dtype),
        compiler_params=pltpu.CompilerParams(dimension_semantics=("parallel",)),
    )(*slabs)
    return out[:M].reshape(N, Ho, Wo, C)


# ----------------------------------------------------------------------------
# Glue: im2col (channels-dense, channels-last), conv-as-matmul, residual block
# ----------------------------------------------------------------------------
def im2col_nhwc(x, kh, kw, stride, pad):
    """x: [N,H,W,cin] (REAL cin) -> patches [N*Ho*Wo, kh*kw*cin], rows (i, j, c)."""
    N, H, W, C = x.shape
    if pad > 0:
        x = jnp.pad(x, ((0, 0), (pad, pad), (pad, pad), (0, 0)))
    Ho = (H + 2 * pad - kh) // stride + 1
    Wo = (W + 2 * pad - kw) // stride + 1
    slabs = [
        x[:, i:i + stride * Ho:stride, j:j + stride * Wo:stride, :]
        for i in range(kh) for j in range(kw)
    ]
    cols = jnp.stack(slabs, axis=3)                  # [N, Ho, Wo, kh*kw, C]
    return cols.reshape(N * Ho * Wo, kh * kw * C), Ho, Wo


def conv_bn_act(x, wk, bias_p, *, kh, kw, stride, pad, relu, residual=None):
    """Conv2d + folded BN (+residual) (+ReLU).

    x: [N,H,W,cin] channels-DENSE bf16 (sliced to real cin by the caller);
    wk: [Kp,Np] pre-packed bf16 weight; bias_p: [1,Np] f32.
    Returns [N,Ho,Wo,Np(=128)] bf16 with channels >= cout zeroed.
    """
    N = x.shape[0]
    cols, Ho, Wo = im2col_nhwc(x, kh, kw, stride, pad)          # [M, kh*kw*cin]
    res2 = None
    if residual is not None:
        res2 = residual.reshape(N * Ho * Wo, residual.shape[-1])
    y = matmul_affine(cols, wk, bias_p, relu=relu, residual=res2)
    return y.reshape(N, Ho, Wo, y.shape[-1])


def basic_block(x, blk, stride, in_c, out_c):
    # Slice once to the real input channels; both conv1 and the downsample
    # (when present) consume the same dense tensor.
    xd = x[..., :in_c] if x.shape[-1] != in_c else x
    out1 = conv_bn_act(xd, blk["w1"], blk["b1"], kh=3, kw=3,
                       stride=stride, pad=1, relu=True)
    if "wd" in blk:
        identity = conv_bn_act(xd, blk["wd"], blk["bd"], kh=1, kw=1,
                               stride=stride, pad=0, relu=False)
    else:
        identity = x   # already lane-dense [.., 128] bf16 -> fed straight through
    # conv2: residual add + ReLU fused into the matmul epilogue.
    return conv_bn_act(out1[..., :out_c], blk["w2"], blk["b2"], kh=3, kw=3,
                       stride=1, pad=1, relu=True, residual=identity)


# ----------------------------------------------------------------------------
# Parameter init (deterministic, pre-packed arrays only) and forward pass
# ----------------------------------------------------------------------------
def _pack_conv_bn(key, cout, cin, kh, kw):
    """Conv weight + inference-mode BN, pre-folded into a single [Kp,Np] bf16
    matmul operand (rows ordered (i, j, c) to match im2col) and a [1,Np] f32 bias."""
    k1, k2, k3 = jax.random.split(key, 3)
    fan_in = cin * kh * kw
    w = jax.random.normal(k1, (cout, cin, kh, kw), jnp.float32) * (2.0 / fan_in) ** 0.5
    scale = jax.random.uniform(k2, (cout,), jnp.float32, 0.5, 1.5)  # gamma/sqrt(var+eps)
    bias = 0.1 * jax.random.normal(k3, (cout,), jnp.float32)        # beta - mean*scale
    wm = jnp.transpose(w, (2, 3, 1, 0)).reshape(kh * kw * cin, cout)
    wm = wm * scale[None, :]                                        # fold BN scale
    Kp = _round_up(kh * kw * cin, LANE)
    Np = _round_up(cout, LANE)
    wk = jnp.zeros((Kp, Np), jnp.bfloat16).at[:kh * kw * cin, :cout].set(
        wm.astype(jnp.bfloat16))
    bp = jnp.zeros((1, Np), jnp.float32).at[0, :cout].set(bias)
    return wk, bp


def init_params(key):
    # NOTE: params contains arrays only; strides / kernel sizes / channel counts
    # are static (WIDTHS, STAGE_STRIDES, literals) so jax.jit never traces them.
    params = {}
    key, k = jax.random.split(key)
    params["stem_w"], params["stem_b"] = _pack_conv_bn(k, WIDTHS[0], 3, 7, 7)

    stages = []
    in_c = WIDTHS[0]
    for si, out_c in enumerate(WIDTHS):
        blocks = []
        for bi in range(BLOCKS_PER_STAGE):
            stride = STAGE_STRIDES[si][bi]
            blk = {}
            key, k = jax.random.split(key)
            blk["w1"], blk["b1"] = _pack_conv_bn(k, out_c, in_c, 3, 3)
            key, k = jax.random.split(key)
            blk["w2"], blk["b2"] = _pack_conv_bn(k, out_c, out_c, 3, 3)
            if stride != 1 or in_c != out_c:
                key, k = jax.random.split(key)
                blk["wd"], blk["bd"] = _pack_conv_bn(k, out_c, in_c, 1, 1)
            blocks.append(blk)
            in_c = out_c
        stages.append(blocks)
    params["stages"] = stages

    key, k1 = jax.random.split(key)
    key, k2 = jax.random.split(key)
    params["fc_w"] = jax.random.normal(k1, (NUM_CLASSES, WIDTHS[-1]), jnp.float32) * 0.05
    params["fc_b"] = 0.01 * jax.random.normal(k2, (NUM_CLASSES,), jnp.float32)
    return params


def forward(params, x):
    # x: [N, 3, H, W] f32 (NCHW like PyTorch).  One NCHW->NHWC transpose and one
    # bf16 cast at the boundary; the whole backbone runs channels-last bf16.
    x = jnp.transpose(x, (0, 2, 3, 1)).astype(jnp.bfloat16)   # [N, H, W, 3]
    y = conv_bn_act(x, params["stem_w"], params["stem_b"], kh=7, kw=7,
                    stride=2, pad=3, relu=True)               # [N, H/2, W/2, 128]
    y = maxpool_3x3_s2_p1(y)
    in_c = WIDTHS[0]
    for si, out_c in enumerate(WIDTHS):
        for bi in range(BLOCKS_PER_STAGE):
            y = basic_block(y, params["stages"][si][bi],
                            STAGE_STRIDES[si][bi], in_c, out_c)
            in_c = out_c
    feat = jnp.mean(y.astype(jnp.float32), axis=(1, 2))[:, :WIDTHS[-1]]  # [N, 64]
    # Dropout(0.5): identity at inference.
    # TODO(synk): training-mode dropout not implemented (inference forward only).
    # fc (M=2, K=64, N=4): plain JAX — a dedicated Pallas call here is pure
    # launch/DMA overhead for ~2 KFLOP of work.
    logits = feat @ params["fc_w"].T + params["fc_b"]
    return logits                                             # [N, num_classes] f32


if __name__ == "__main__":
    key = jax.random.PRNGKey(0)
    pkey, xkey = jax.random.split(key)
    params = init_params(pkey)
    x = jax.random.normal(xkey, (2, 3, 32, 32), jnp.float32)   # small NCHW image batch

    logits = jax.jit(forward)(params, x)
    logits = jax.block_until_ready(logits)
    assert logits.shape == (2, NUM_CLASSES) and logits.dtype == jnp.float32
    assert bool(jnp.all(jnp.isfinite(logits)))
    print("KERNEL_OK")
</pallas_src>

<mosaic_0001>
module attributes {stable_mosaic.version = 11 : i64} {
  func.func @_max_tree_kernel(%arg0: i32, %arg1: memref<64x128xbf16, #tpu.memory_space<vmem>>, %arg2: memref<64x128xbf16, #tpu.memory_space<vmem>>, %arg3: memref<64x128xbf16, #tpu.memory_space<vmem>>, %arg4: memref<64x128xbf16, #tpu.memory_space<vmem>>, %arg5: memref<64x128xbf16, #tpu.memory_space<vmem>>, %arg6: memref<64x128xbf16, #tpu.memory_space<vmem>>, %arg7: memref<64x128xbf16, #tpu.memory_space<vmem>>, %arg8: memref<64x128xbf16, #tpu.memory_space<vmem>>, %arg9: memref<64x128xbf16, #tpu.memory_space<vmem>>, %arg10: memref<64x128xbf16, #tpu.memory_space<vmem>>) attributes {dimension_semantics = [#tpu.dimension_semantics<parallel>], iteration_bounds = array<i64: 2>, scalar_prefetch = 0 : i64, scratch_operands = 0 : i64, tpu.core_type = #tpu.core_type<tc>, window_params = [{transform_indices = @transform_0, window_bounds = array<i64: 64, 128>}, {transform_indices = @transform_1, window_bounds = array<i64: 64, 128>}, {transform_indices = @transform_2, window_bounds = array<i64: 64, 128>}, {transform_indices = @transform_3, window_bounds = array<i64: 64, 128>}, {transform_indices = @transform_4, window_bounds = array<i64: 64, 128>}, {transform_indices = @transform_5, window_bounds = array<i64: 64, 128>}, {transform_indices = @transform_6, window_bounds = array<i64: 64, 128>}, {transform_indices = @transform_7, window_bounds = array<i64: 64, 128>}, {transform_indices = @transform_8, window_bounds = array<i64: 64, 128>}, {transform_indices = @transform_9, window_bounds = array<i64: 64, 128>}]} {
    %c0 = arith.constant 0 : index
    %c0_0 = arith.constant 0 : index
    %0 = vector.load %arg1[%c0, %c0_0] : memref<64x128xbf16, #tpu.memory_space<vmem>>, vector<64x128xbf16>
    %c0_1 = arith.constant 0 : index
    %c0_2 = arith.constant 0 : index
    %1 = vector.load %arg2[%c0_1, %c0_2] : memref<64x128xbf16, #tpu.memory_space<vmem>>, vector<64x128xbf16>
    %2 = arith.maximumf %0, %1 : vector<64x128xbf16>
    %c0_3 = arith.constant 0 : index
    %c0_4 = arith.constant 0 : index
    %3 = vector.load %arg3[%c0_3, %c0_4] : memref<64x128xbf16, #tpu.memory_space<vmem>>, vector<64x128xbf16>
    %4 = arith.maximumf %2, %3 : vector<64x128xbf16>
    %c0_5 = arith.constant 0 : index
    %c0_6 = arith.constant 0 : index
    %5 = vector.load %arg4[%c0_5, %c0_6] : memref<64x128xbf16, #tpu.memory_space<vmem>>, vector<64x128xbf16>
    %6 = arith.maximumf %4, %5 : vector<64x128xbf16>
    %c0_7 = arith.constant 0 : index
    %c0_8 = arith.constant 0 : index
    %7 = vector.load %arg5[%c0_7, %c0_8] : memref<64x128xbf16, #tpu.memory_space<vmem>>, vector<64x128xbf16>
    %8 = arith.maximumf %6, %7 : vector<64x128xbf16>
    %c0_9 = arith.constant 0 : index
    %c0_10 = arith.constant 0 : index
    %9 = vector.load %arg6[%c0_9, %c0_10] : memref<64x128xbf16, #tpu.memory_space<vmem>>, vector<64x128xbf16>
    %10 = arith.maximumf %8, %9 : vector<64x128xbf16>
    %c0_11 = arith.constant 0 : index
    %c0_12 = arith.constant 0 : index
    %11 = vector.load %arg7[%c0_11, %c0_12] : memref<64x128xbf16, #tpu.memory_space<vmem>>, vector<64x128xbf16>
    %12 = arith.maximumf %10, %11 : vector<64x128xbf16>
    %c0_13 = arith.constant 0 : index
    %c0_14 = arith.constant 0 : index
    %13 = vector.load %arg8[%c0_13, %c0_14] : memref<64x128xbf16, #tpu.memory_space<vmem>>, vector<64x128xbf16>
    %14 = arith.maximumf %12, %13 : vector<64x128xbf16>
    %c0_15 = arith.constant 0 : index
    %c0_16 = arith.constant 0 : index
    %15 = vector.load %arg9[%c0_15, %c0_16] : memref<64x128xbf16, #tpu.memory_space<vmem>>, vector<64x128xbf16>
    %16 = arith.maximumf %14, %15 : vector<64x128xbf16>
    %c0_17 = arith.constant 0 : index
    %c0_18 = arith.constant 0 : index
    %17 = vector.load %arg10[%c0_17, %c0_18] : memref<64x128xbf16, #tpu.memory_space<vmem>>, vector<64x128xbf16>
    tpu.vector_store %arg10[%c0_17, %c0_18], %16 {strides = array<i32>} : memref<64x128xbf16, #tpu.memory_space<vmem>>, vector<64x128xbf16>,
    return
  }
  func.func @transform_0(%arg0: i32) -> (i32, i32) {
    %c0_i32 = arith.constant 0 : i32
    %c0_i32_0 = arith.constant 0 : i32
    return %arg0, %c0_i32 : i32, i32
  }
  func.func @transform_1(%arg0: i32) -> (i32, i32) {
    %c0_i32 = arith.constant 0 : i32
    %c0_i32_0 = arith.constant 0 : i32
    return %arg0, %c0_i32 : i32, i32
  }
  func.func @transform_2(%arg0: i32) -> (i32, i32) {
    %c0_i32 = arith.constant 0 : i32
    %c0_i32_0 = arith.constant 0 : i32
    return %arg0, %c0_i32 : i32, i32
  }
  func.func @transform_3(%arg0: i32) -> (i32, i32) {
    %c0_i32 = arith.constant 0 : i32
    %c0_i32_0 = arith.constant 0 : i32
    return %arg0, %c0_i32 : i32, i32
  }
  func.func @transform_4(%arg0: i32) -> (i32, i32) {
    %c0_i32 = arith.constant 0 : i32
    %c0_i32_0 = arith.constant 0 : i32
    return %arg0, %c0_i32 : i32, i32
  }
  func.func @transform_5(%arg0: i32) -> (i32, i32) {
    %c0_i32 = arith.constant 0 : i32
    %c0_i32_0 = arith.constant 0 : i32
    return %arg0, %c0_i32 : i32, i32
  }
  func.func @transform_6(%arg0: i32) -> (i32, i32) {
    %c0_i32 = arith.constant 0 : i32
    %c0_i32_0 = arith.constant 0 : i32
    return %arg0, %c0_i32 : i32, i32
  }
  func.func @transform_7(%arg0: i32) -> (i32, i32) {
    %c0_i32 = arith.constant 0 : i32
    %c0_i32_0 = arith.constant 0 : i32
    return %arg0, %c0_i32 : i32, i32
  }
  func.func @transform_8(%arg0: i32) -> (i32, i32) {
    %c0_i32 = arith.constant 0 : i32
    %c0_i32_0 = arith.constant 0 : i32
    return %arg0, %c0_i32 : i32, i32
  }
  func.func @transform_9(%arg0: i32) -> (i32, i32) {
    %c0_i32 = arith.constant 0 : i32
    %c0_i32_0 = arith.constant 0 : i32
    return %arg0, %c0_i32 : i32, i32
  }
}

module attributes {stable_mosaic.version = 11 : i64} {
  func.func @_mm_kernel(%arg0: i32, %arg1: memref<256x256xbf16, #tpu.memory_space<vmem>>, %arg2: memref<256x128xbf16, #tpu.memory_space<vmem>>, %arg3: memref<1x128xf32, #tpu.memory_space<vmem>>, %arg4: memref<256x128xbf16, #tpu.memory_space<vmem>>) attributes {dimension_semantics = [#tpu.dimension_semantics<parallel>], iteration_bounds = array<i64: 2>, scalar_prefetch = 0 : i64, scratch_operands = 0 : i64, tpu.core_type = #tpu.core_type<tc>, window_params = [{transform_indices = @transform_0, window_bounds = array<i64: 256, 256>}, {pipeline_mode = #tpu.pipeline_mode<synchronous>, transform_indices = @transform_1, window_bounds = array<i64: 256, 128>}, {pipeline_mode = #tpu.pipeline_mode<synchronous>, transform_indices = @transform_2, window_bounds = array<i64: 1, 128>}, {transform_indices = @transform_3, window_bounds = array<i64: 256, 128>}]} {
    %c0 = arith.constant 0 : index
    %c0_0 = arith.constant 0 : index
    %0 = vector.load %arg1[%c0, %c0_0] : memref<256x256xbf16, #tpu.memory_space<vmem>>, vector<256x256xbf16>
    %c0_1 = arith.constant 0 : index
    %c0_2 = arith.constant 0 : index
    %1 = vector.load %arg2[%c0_1, %c0_2] : memref<256x128xbf16, #tpu.memory_space<vmem>>, vector<256x128xbf16>
    %cst = arith.constant dense<0.000000e+00> : vector<256x128xf32>
    %2 = tpu.matmul %0, %1, %cst {dimension_numbers = #tpu.dot_dimension_numbers<[1], [0], [0], [1], [0, 0, 1, 1], [], []>} : vector<256x256xbf16>, vector<256x128xbf16>, vector<256x128xf32> -> vector<256x128xf32>
    %c0_3 = arith.constant 0 : index
    %c0_4 = arith.constant 0 : index
    %3 = vector.load %arg3[%c0_3, %c0_4] : memref<1x128xf32, #tpu.memory_space<vmem>>, vector<1x128xf32>
    %4 = vector.broadcast %3 : vector<1x128xf32> to vector<256x128xf32>
    %5 = arith.addf %2, %4 : vector<256x128xf32>
    %cst_5 = arith.constant 0.000000e+00 : f32
    %6 = vector.broadcast %cst_5 : f32 to vector<256x128xf32>
    %7 = arith.maximumf %5, %6 : vector<256x128xf32>
    %8 = arith.truncf %7 : vector<256x128xf32> to vector<256x128xbf16>
    %c0_6 = arith.constant 0 : index
    %c0_7 = arith.constant 0 : index
    %9 = vector.load %arg4[%c0_6, %c0_7] : memref<256x128xbf16, #tpu.memory_space<vmem>>, vector<256x128xbf16>
    tpu.vector_store %arg4[%c0_6, %c0_7], %8 {strides = array<i32>} : memref<256x128xbf16, #tpu.memory_space<vmem>>, vector<256x128xbf16>,
    return
  }
  func.func @transform_0(%arg0: i32) -> (i32, i32) {
    %c0_i32 = arith.constant 0 : i32
    %c0_i32_0 = arith.constant 0 : i32
    return %arg0, %c0_i32 : i32, i32
  }
  func.func @transform_1(%arg0: i32) -> (i32, i32) {
    %c0_i32 = arith.constant 0 : i32
    %c0_i32_0 = arith.constant 0 : i32
    %c0_i32_1 = arith.constant 0 : i32
    return %c0_i32, %c0_i32_0 : i32, i32
  }
  func.func @transform_2(%arg0: i32) -> (i32, i32) {
    %c0_i32 = arith.constant 0 : i32
    %c0_i32_0 = arith.constant 0 : i32
    %c0_i32_1 = arith.constant 0 : i32
    return %c0_i32, %c0_i32_0 : i32, i32
  }
  func.func @transform_3(%arg0: i32) -> (i32, i32) {
    %c0_i32 = arith.constant 0 : i32
    %c0_i32_0 = arith.constant 0 : i32
    return %arg0, %c0_i32 : i32, i32
  }
}

module attributes {stable_mosaic.version = 11 : i64} {
  func.func @_mm_kernel(%arg0: i32, %arg1: memref<64x128xbf16, #tpu.memory_space<vmem>>, %arg2: memref<128x128xbf16, #tpu.memory_space<vmem>>, %arg3: memref<1x128xf32, #tpu.memory_space<vmem>>, %arg4: memref<64x128xbf16, #tpu.memory_space<vmem>>) attributes {dimension_semantics = [#tpu.dimension_semantics<parallel>], iteration_bounds = array<i64: 2>, scalar_prefetch = 0 : i64, scratch_operands = 0 : i64, tpu.core_type = #tpu.core_type<tc>, window_params = [{transform_indices = @transform_0, window_bounds = array<i64: 64, 128>}, {pipeline_mode = #tpu.pipeline_mode<synchronous>, transform_indices = @transform_1, window_bounds = array<i64: 128, 128>}, {pipeline_mode = #tpu.pipeline_mode<synchronous>, transform_indices = @transform_2, window_bounds = array<i64: 1, 128>}, {transform_indices = @transform_3, window_bounds = array<i64: 64, 128>}]} {
    %c0 = arith.constant 0 : index
    %c0_0 = arith.constant 0 : index
    %0 = vector.load %arg1[%c0, %c0_0] : memref<64x128xbf16, #tpu.memory_space<vmem>>, vector<64x128xbf16>
    %c0_1 = arith.constant 0 : index
    %c0_2 = arith.constant 0 : index
    %1 = vector.load %arg2[%c0_1, %c0_2] : memref<128x128xbf16, #tpu.memory_space<vmem>>, vector<128x128xbf16>
    %cst = arith.constant dense<0.000000e+00> : vector<64x128xf32>
    %2 = tpu.matmul %0, %1, %cst {dimension_numbers = #tpu.dot_dimension_numbers<[1], [0], [0], [1], [0, 0, 1, 1], [], []>} : vector<64x128xbf16>, vector<128x128xbf16>, vector<64x128xf32> -> vector<64x128xf32>
    %c0_3 = arith.constant 0 : index
    %c0_4 = arith.constant 0 : index
    %3 = vector.load %arg3[%c0_3, %c0_4] : memref<1x128xf32, #tpu.memory_space<vmem>>, vector<1x128xf32>
    %4 = vector.broadcast %3 : vector<1x128xf32> to vector<64x128xf32>
    %5 = arith.addf %2, %4 : vector<64x128xf32>
    %cst_5 = arith.constant 0.000000e+00 : f32
    %6 = vector.broadcast %cst_5 : f32 to vector<64x128xf32>
    %7 = arith.maximumf %5, %6 : vector<64x128xf32>
    %8 = arith.truncf %7 : vector<64x128xf32> to vector<64x128xbf16>
    %c0_6 = arith.constant 0 : index
    %c0_7 = arith.constant 0 : index
    %9 = vector.load %arg4[%c0_6, %c0_7] : memref<64x128xbf16, #tpu.memory_space<vmem>>, vector<64x128xbf16>
    tpu.vector_store %arg4[%c0_6, %c0_7], %8 {strides = array<i32>} : memref<64x128xbf16, #tpu.memory_space<vmem>>, vector<64x128xbf16>,
    return
  }
  func.func @transform_0(%arg0: i32) -> (i32, i32) {
    %c0_i32 = arith.constant 0 : i32
    %c0_i32_0 = arith.constant 0 : i32
    return %arg0, %c0_i32 : i32, i32
  }
  func.func @transform_1(%arg0: i32) -> (i32, i32) {
    %c0_i32 = arith.constant 0 : i32
    %c0_i32_0 = arith.constant 0 : i32
    %c0_i32_1 = arith.constant 0 : i32
    return %c0_i32, %c0_i32_0 : i32, i32
  }
  func.func @transform_2(%arg0: i32) -> (i32, i32) {
    %c0_i32 = arith.constant 0 : i32
    %c0_i32_0 = arith.constant 0 : i32
    %c0_i32_1 = arith.constant 0 : i32
    return %c0_i32, %c0_i32_0 : i32, i32
  }
  func.func @transform_3(%arg0: i32) -> (i32, i32) {
    %c0_i32 = arith.constant 0 : i32
    %c0_i32_0 = arith.constant 0 : i32
    return %arg0, %c0_i32 : i32, i32
  }
}

module attributes {stable_mosaic.version = 11 : i64} {
  func.func @_mm_res_kernel(%arg0: i32, %arg1: memref<64x128xbf16, #tpu.memory_space<vmem>>, %arg2: memref<128x128xbf16, #tpu.memory_space<vmem>>, %arg3: memref<1x128xf32, #tpu.memory_space<vmem>>, %arg4: memref<64x128xbf16, #tpu.memory_space<vmem>>, %arg5: memref<64x128xbf16, #tpu.memory_space<vmem>>) attributes {dimension_semantics = [#tpu.dimension_semantics<parallel>], iteration_bounds = array<i64: 2>, scalar_prefetch = 0 : i64, scratch_operands = 0 : i64, tpu.core_type = #tpu.core_type<tc>, window_params = [{transform_indices = @transform_0, window_bounds = array<i64: 64, 128>}, {pipeline_mode = #tpu.pipeline_mode<synchronous>, transform_indices = @transform_1, window_bounds = array<i64: 128, 128>}, {pipeline_mode = #tpu.pipeline_mode<synchronous>, transform_indices = @transform_2, window_bounds = array<i64: 1, 128>}, {transform_indices = @transform_3, window_bounds = array<i64: 64, 128>}, {transform_indices = @transform_4, window_bounds = array<i64: 64, 128>}]} {
    %c0 = arith.constant 0 : index
    %c0_0 = arith.constant 0 : index
    %0 = vector.load %arg1[%c0, %c0_0] : memref<64x128xbf16, #tpu.memory_space<vmem>>, vector<64x128xbf16>
    %c0_1 = arith.constant 0 : index
    %c0_2 = arith.constant 0 : index
    %1 = vector.load %arg2[%c0_1, %c0_2] : memref<128x128xbf16, #tpu.memory_space<vmem>>, vector<128x128xbf16>
    %cst = arith.constant dense<0.000000e+00> : vector<64x128xf32>
    %2 = tpu.matmul %0, %1, %cst {dimension_numbers = #tpu.dot_dimension_numbers<[1], [0], [0], [1], [0, 0, 1, 1], [], []>} : vector<64x128xbf16>, vector<128x128xbf16>, vector<64x128xf32> -> vector<64x128xf32>
    %c0_3 = arith.constant 0 : index
    %c0_4 = arith.constant 0 : index
    %3 = vector.load %arg3[%c0_3, %c0_4] : memref<1x128xf32, #tpu.memory_space<vmem>>, vector<1x128xf32>
    %4 = vector.broadcast %3 : vector<1x128xf32> to vector<64x128xf32>
    %5 = arith.addf %2, %4 : vector<64x128xf32>
    %c0_5 = arith.constant 0 : index
    %c0_6 = arith.constant 0 : index
    %6 = vector.load %arg4[%c0_5, %c0_6] : memref<64x128xbf16, #tpu.memory_space<vmem>>, vector<64x128xbf16>
    %7 = arith.extf %6 : vector<64x128xbf16> to vector<64x128xf32>
    %8 = arith.addf %5, %7 : vector<64x128xf32>
    %cst_7 = arith.constant 0.000000e+00 : f32
    %9 = vector.broadcast %cst_7 : f32 to vector<64x128xf32>
    %10 = arith.maximumf %8, %9 : vector<64x128xf32>
    %11 = arith.truncf %10 : vector<64x128xf32> to vector<64x128xbf16>
    %c0_8 = arith.constant 0 : index
    %c0_9 = arith.constant 0 : index
    %12 = vector.load %arg5[%c0_8, %c0_9] : memref<64x128xbf16, #tpu.memory_space<vmem>>, vector<64x128xbf16>
    tpu.vector_store %arg5[%c0_8, %c0_9], %11 {strides = array<i32>} : memref<64x128xbf16, #tpu.memory_space<vmem>>, vector<64x128xbf16>,
    return
  }
  func.func @transform_0(%arg0: i32) -> (i32, i32) {
    %c0_i32 = arith.constant 0 : i32
    %c0_i32_0 = arith.constant 0 : i32
    return %arg0, %c0_i32 : i32, i32
  }
  func.func @transform_1(%arg0: i32) -> (i32, i32) {
    %c0_i32 = arith.constant 0 : i32
    %c0_i32_0 = arith.constant 0 : i32
    %c0_i32_1 = arith.constant 0 : i32
    return %c0_i32, %c0_i32_0 : i32, i32
  }
  func.func @transform_2(%arg0: i32) -> (i32, i32) {
    %c0_i32 = arith.constant 0 : i32
    %c0_i32_0 = arith.constant 0 : i32
    %c0_i32_1 = arith.constant 0 : i32
    return %c0_i32, %c0_i32_0 : i32, i32
  }
  func.func @transform_3(%arg0: i32) -> (i32, i32) {
    %c0_i32 = arith.constant 0 : i32
    %c0_i32_0 = arith.constant 0 : i32
    return %arg0, %c0_i32 : i32, i32
  }
  func.func @transform_4(%arg0: i32) -> (i32, i32) {
    %c0_i32 = arith.constant 0 : i32
    %c0_i32_0 = arith.constant 0 : i32
    return %arg0, %c0_i32 : i32, i32
  }
}

module attributes {stable_mosaic.version = 11 : i64} {
  func.func @_mm_kernel(%arg0: i32, %arg1: memref<16x128xbf16, #tpu.memory_space<vmem>>, %arg2: memref<128x128xbf16, #tpu.memory_space<vmem>>, %arg3: memref<1x128xf32, #tpu.memory_space<vmem>>, %arg4: memref<16x128xbf16, #tpu.memory_space<vmem>>) attributes {dimension_semantics = [#tpu.dimension_semantics<parallel>], iteration_bounds = array<i64: 2>, scalar_prefetch = 0 : i64, scratch_operands = 0 : i64, tpu.core_type = #tpu.core_type<tc>, window_params = [{transform_indices = @transform_0, window_bounds = array<i64: 16, 128>}, {pipeline_mode = #tpu.pipeline_mode<synchronous>, transform_indices = @transform_1, window_bounds = array<i64: 128, 128>}, {pipeline_mode = #tpu.pipeline_mode<synchronous>, transform_indices = @transform_2, window_bounds = array<i64: 1, 128>}, {transform_indices = @transform_3, window_bounds = array<i64: 16, 128>}]} {
    %c0 = arith.constant 0 : index
    %c0_0 = arith.constant 0 : index
    %0 = vector.load %arg1[%c0, %c0_0] : memref<16x128xbf16, #tpu.memory_space<vmem>>, vector<16x128xbf16>
    %c0_1 = arith.constant 0 : index
    %c0_2 = arith.constant 0 : index
    %1 = vector.load %arg2[%c0_1, %c0_2] : memref<128x128xbf16, #tpu.memory_space<vmem>>, vector<128x128xbf16>
    %cst = arith.constant dense<0.000000e+00> : vector<16x128xf32>
    %2 = tpu.matmul %0, %1, %cst {dimension_numbers = #tpu.dot_dimension_numbers<[1], [0], [0], [1], [0, 0, 1, 1], [], []>} : vector<16x128xbf16>, vector<128x128xbf16>, vector<16x128xf32> -> vector<16x128xf32>
    %c0_3 = arith.constant 0 : index
    %c0_4 = arith.constant 0 : index
    %3 = vector.load %arg3[%c0_3, %c0_4] : memref<1x128xf32, #tpu.memory_space<vmem>>, vector<1x128xf32>
    %4 = vector.broadcast %3 : vector<1x128xf32> to vector<16x128xf32>
    %5 = arith.addf %2, %4 : vector<16x128xf32>
    %cst_5 = arith.constant 0.000000e+00 : f32
    %6 = vector.broadcast %cst_5 : f32 to vector<16x128xf32>
    %7 = arith.maximumf %5, %6 : vector<16x128xf32>
    %8 = arith.truncf %7 : vector<16x128xf32> to vector<16x128xbf16>
    %c0_6 = arith.constant 0 : index
    %c0_7 = arith.constant 0 : index
    %9 = vector.load %arg4[%c0_6, %c0_7] : memref<16x128xbf16, #tpu.memory_space<vmem>>, vector<16x128xbf16>
    tpu.vector_store %arg4[%c0_6, %c0_7], %8 {strides = array<i32>} : memref<16x128xbf16, #tpu.memory_space<vmem>>, vector<16x128xbf16>,
    return
  }
  func.func @transform_0(%arg0: i32) -> (i32, i32) {
    %c0_i32 = arith.constant 0 : i32
    %c0_i32_0 = arith.constant 0 : i32
    return %arg0, %c0_i32 : i32, i32
  }
  func.func @transform_1(%arg0: i32) -> (i32, i32) {
    %c0_i32 = arith.constant 0 : i32
    %c0_i32_0 = arith.constant 0 : i32
    %c0_i32_1 = arith.constant 0 : i32
    return %c0_i32, %c0_i32_0 : i32, i32
  }
  func.func @transform_2(%arg0: i32) -> (i32, i32) {
    %c0_i32 = arith.constant 0 : i32
    %c0_i32_0 = arith.constant 0 : i32
    %c0_i32_1 = arith.constant 0 : i32
    return %c0_i32, %c0_i32_0 : i32, i32
  }
  func.func @transform_3(%arg0: i32) -> (i32, i32) {
    %c0_i32 = arith.constant 0 : i32
    %c0_i32_0 = arith.constant 0 : i32
    return %arg0, %c0_i32 : i32, i32
  }
}

module attributes {stable_mosaic.version = 11 : i64} {
  func.func @_mm_kernel(%arg0: i32, %arg1: memref<16x128xbf16, #tpu.memory_space<vmem>>, %arg2: memref<128x128xbf16, #tpu.memory_space<vmem>>, %arg3: memref<1x128xf32, #tpu.memory_space<vmem>>, %arg4: memref<16x128xbf16, #tpu.memory_space<vmem>>) attributes {dimension_semantics = [#tpu.dimension_semantics<parallel>], iteration_bounds = array<i64: 2>, scalar_prefetch = 0 : i64, scratch_operands = 0 : i64, tpu.core_type = #tpu.core_type<tc>, window_params = [{transform_indices = @transform_0, window_bounds = array<i64: 16, 128>}, {pipeline_mode = #tpu.pipeline_mode<synchronous>, transform_indices = @transform_1, window_bounds = array<i64: 128, 128>}, {pipeline_mode = #tpu.pipeline_mode<synchronous>, transform_indices = @transform_2, window_bounds = array<i64: 1, 128>}, {transform_indices = @transform_3, window_bounds = array<i64: 16, 128>}]} {
    %c0 = arith.constant 0 : index
    %c0_0 = arith.constant 0 : index
    %0 = vector.load %arg1[%c0, %c0_0] : memref<16x128xbf16, #tpu.memory_space<vmem>>, vector<16x128xbf16>
    %c0_1 = arith.constant 0 : index
    %c0_2 = arith.constant 0 : index
    %1 = vector.load %arg2[%c0_1, %c0_2] : memref<128x128xbf16, #tpu.memory_space<vmem>>, vector<128x128xbf16>
    %cst = arith.constant dense<0.000000e+00> : vector<16x128xf32>
    %2 = tpu.matmul %0, %1, %cst {dimension_numbers = #tpu.dot_dimension_numbers<[1], [0], [0], [1], [0, 0, 1, 1], [], []>} : vector<16x128xbf16>, vector<128x128xbf16>, vector<16x128xf32> -> vector<16x128xf32>
    %c0_3 = arith.constant 0 : index
    %c0_4 = arith.constant 0 : index
    %3 = vector.load %arg3[%c0_3, %c0_4] : memref<1x128xf32, #tpu.memory_space<vmem>>, vector<1x128xf32>
    %4 = vector.broadcast %3 : vector<1x128xf32> to vector<16x128xf32>
    %5 = arith.addf %2, %4 : vector<16x128xf32>
    %6 = arith.truncf %5 : vector<16x128xf32> to vector<16x128xbf16>
    %c0_5 = arith.constant 0 : index
    %c0_6 = arith.constant 0 : index
    %7 = vector.load %arg4[%c0_5, %c0_6] : memref<16x128xbf16, #tpu.memory_space<vmem>>, vector<16x128xbf16>
    tpu.vector_store %arg4[%c0_5, %c0_6], %6 {strides = array<i32>} : memref<16x128xbf16, #tpu.memory_space<vmem>>, vector<16x128xbf16>,
    return
  }
  func.func @transform_0(%arg0: i32) -> (i32, i32) {
    %c0_i32 = arith.constant 0 : i32
    %c0_i32_0 = arith.constant 0 : i32
    return %arg0, %c0_i32 : i32, i32
  }
  func.func @transform_1(%arg0: i32) -> (i32, i32) {
    %c0_i32 = arith.constant 0 : i32
    %c0_i32_0 = arith.constant 0 : i32
    %c0_i32_1 = arith.constant 0 : i32
    return %c0_i32, %c0_i32_0 : i32, i32
  }
  func.func @transform_2(%arg0: i32) -> (i32, i32) {
    %c0_i32 = arith.constant 0 : i32
    %c0_i32_0 = arith.constant 0 : i32
    %c0_i32_1 = arith.constant 0 : i32
    return %c0_i32, %c0_i32_0 : i32, i32
  }
  func.func @transform_3(%arg0: i32) -> (i32, i32) {
    %c0_i32 = arith.constant 0 : i32
    %c0_i32_0 = arith.constant 0 : i32
    return %arg0, %c0_i32 : i32, i32
  }
}

module attributes {stable_mosaic.version = 11 : i64} {
  func.func @_mm_kernel(%arg0: i32, %arg1: memref<16x256xbf16, #tpu.memory_space<vmem>>, %arg2: memref<256x128xbf16, #tpu.memory_space<vmem>>, %arg3: memref<1x128xf32, #tpu.memory_space<vmem>>, %arg4: memref<16x128xbf16, #tpu.memory_space<vmem>>) attributes {dimension_semantics = [#tpu.dimension_semantics<parallel>], iteration_bounds = array<i64: 2>, scalar_prefetch = 0 : i64, scratch_operands = 0 : i64, tpu.core_type = #tpu.core_type<tc>, window_params = [{transform_indices = @transform_0, window_bounds = array<i64: 16, 256>}, {pipeline_mode = #tpu.pipeline_mode<synchronous>, transform_indices = @transform_1, window_bounds = array<i64: 256, 128>}, {pipeline_mode = #tpu.pipeline_mode<synchronous>, transform_indices = @transform_2, window_bounds = array<i64: 1, 128>}, {transform_indices = @transform_3, window_bounds = array<i64: 16, 128>}]} {
    %c0 = arith.constant 0 : index
    %c0_0 = arith.constant 0 : index
    %0 = vector.load %arg1[%c0, %c0_0] : memref<16x256xbf16, #tpu.memory_space<vmem>>, vector<16x256xbf16>
    %c0_1 = arith.constant 0 : index
    %c0_2 = arith.constant 0 : index
    %1 = vector.load %arg2[%c0_1, %c0_2] : memref<256x128xbf16, #tpu.memory_space<vmem>>, vector<256x128xbf16>
    %cst = arith.constant dense<0.000000e+00> : vector<16x128xf32>
    %2 = tpu.matmul %0, %1, %cst {dimension_numbers = #tpu.dot_dimension_numbers<[1], [0], [0], [1], [0, 0, 1, 1], [], []>} : vector<16x256xbf16>, vector<256x128xbf16>, vector<16x128xf32> -> vector<16x128xf32>
    %c0_3 = arith.constant 0 : index
    %c0_4 = arith.constant 0 : index
    %3 = vector.load %arg3[%c0_3, %c0_4] : memref<1x128xf32, #tpu.memory_space<vmem>>, vector<1x128xf32>
    %4 = vector.broadcast %3 : vector<1x128xf32> to vector<16x128xf32>
    %5 = arith.addf %2, %4 : vector<16x128xf32>
    %cst_5 = arith.constant 0.000000e+00 : f32
    %6 = vector.broadcast %cst_5 : f32 to vector<16x128xf32>
    %7 = arith.maximumf %5, %6 : vector<16x128xf32>
    %8 = arith.truncf %7 : vector<16x128xf32> to vector<16x128xbf16>
    %c0_6 = arith.constant 0 : index
    %c0_7 = arith.constant 0 : index
    %9 = vector.load %arg4[%c0_6, %c0_7] : memref<16x128xbf16, #tpu.memory_space<vmem>>, vector<16x128xbf16>
    tpu.vector_store %arg4[%c0_6, %c0_7], %8 {strides = array<i32>} : memref<16x128xbf16, #tpu.memory_space<vmem>>, vector<16x128xbf16>,
    return
  }
  func.func @transform_0(%arg0: i32) -> (i32, i32) {
    %c0_i32 = arith.constant 0 : i32
    %c0_i32_0 = arith.constant 0 : i32
    return %arg0, %c0_i32 : i32, i32
  }
  func.func @transform_1(%arg0: i32) -> (i32, i32) {
    %c0_i32 = arith.constant 0 : i32
    %c0_i32_0 = arith.constant 0 : i32
    %c0_i32_1 = arith.constant 0 : i32
    return %c0_i32, %c0_i32_0 : i32, i32
  }
  func.func @transform_2(%arg0: i32) -> (i32, i32) {
    %c0_i32 = arith.constant 0 : i32
    %c0_i32_0 = arith.constant 0 : i32
    %c0_i32_1 = arith.constant 0 : i32
    return %c0_i32, %c0_i32_0 : i32, i32
  }
  func.func @transform_3(%arg0: i32) -> (i32, i32) {
    %c0_i32 = arith.constant 0 : i32
    %c0_i32_0 = arith.constant 0 : i32
    return %arg0, %c0_i32 : i32, i32
  }
}

module attributes {stable_mosaic.version = 11 : i64} {
  func.func @_mm_res_kernel(%arg0: i32, %arg1: memref<16x256xbf16, #tpu.memory_space<vmem>>, %arg2: memref<256x128xbf16, #tpu.memory_space<vmem>>, %arg3: memref<1x128xf32, #tpu.memory_space<vmem>>, %arg4: memref<16x128xbf16, #tpu.memory_space<vmem>>, %arg5: memref<16x128xbf16, #tpu.memory_space<vmem>>) attributes {dimension_semantics = [#tpu.dimension_semantics<parallel>], iteration_bounds = array<i64: 2>, scalar_prefetch = 0 : i64, scratch_operands = 0 : i64, tpu.core_type = #tpu.core_type<tc>, window_params = [{transform_indices = @transform_0, window_bounds = array<i64: 16, 256>}, {pipeline_mode = #tpu.pipeline_mode<synchronous>, transform_indices = @transform_1, window_bounds = array<i64: 256, 128>}, {pipeline_mode = #tpu.pipeline_mode<synchronous>, transform_indices = @transform_2, window_bounds = array<i64: 1, 128>}, {transform_indices = @transform_3, window_bounds = array<i64: 16, 128>}, {transform_indices = @transform_4, window_bounds = array<i64: 16, 128>}]} {
    %c0 = arith.constant 0 : index
    %c0_0 = arith.constant 0 : index
    %0 = vector.load %arg1[%c0, %c0_0] : memref<16x256xbf16, #tpu.memory_space<vmem>>, vector<16x256xbf16>
    %c0_1 = arith.constant 0 : index
    %c0_2 = arith.constant 0 : index
    %1 = vector.load %arg2[%c0_1, %c0_2] : memref<256x128xbf16, #tpu.memory_space<vmem>>, vector<256x128xbf16>
    %cst = arith.constant dense<0.000000e+00> : vector<16x128xf32>
    %2 = tpu.matmul %0, %1, %cst {dimension_numbers = #tpu.dot_dimension_numbers<[1], [0], [0], [1], [0, 0, 1, 1], [], []>} : vector<16x256xbf16>, vector<256x128xbf16>, vector<16x128xf32> -> vector<16x128xf32>
    %c0_3 = arith.constant 0 : index
    %c0_4 = arith.constant 0 : index
    %3 = vector.load %arg3[%c0_3, %c0_4] : memref<1x128xf32, #tpu.memory_space<vmem>>, vector<1x128xf32>
    %4 = vector.broadcast %3 : vector<1x128xf32> to vector<16x128xf32>
    %5 = arith.addf %2, %4 : vector<16x128xf32>
    %c0_5 = arith.constant 0 : index
    %c0_6 = arith.constant 0 : index
    %6 = vector.load %arg4[%c0_5, %c0_6] : memref<16x128xbf16, #tpu.memory_space<vmem>>, vector<16x128xbf16>
    %7 = arith.extf %6 : vector<16x128xbf16> to vector<16x128xf32>
    %8 = arith.addf %5, %7 : vector<16x128xf32>
    %cst_7 = arith.constant 0.000000e+00 : f32
    %9 = vector.broadcast %cst_7 : f32 to vector<16x128xf32>
    %10 = arith.maximumf %8, %9 : vector<16x128xf32>
    %11 = arith.truncf %10 : vector<16x128xf32> to vector<16x128xbf16>
    %c0_8 = arith.constant 0 : index
    %c0_9 = arith.constant 0 : index
    %12 = vector.load %arg5[%c0_8, %c0_9] : memref<16x128xbf16, #tpu.memory_space<vmem>>, vector<16x128xbf16>
    tpu.vector_store %arg5[%c0_8, %c0_9], %11 {strides = array<i32>} : memref<16x128xbf16, #tpu.memory_space<vmem>>, vector<16x128xbf16>,
    return
  }
  func.func @transform_0(%arg0: i32) -> (i32, i32) {
    %c0_i32 = arith.constant 0 : i32
    %c0_i32_0 = arith.constant 0 : i32
    return %arg0, %c0_i32 : i32, i32
  }
  func.func @transform_1(%arg0: i32) -> (i32, i32) {
    %c0_i32 = arith.constant 0 : i32
    %c0_i32_0 = arith.constant 0 : i32
    %c0_i32_1 = arith.constant 0 : i32
    return %c0_i32, %c0_i32_0 : i32, i32
  }
  func.func @transform_2(%arg0: i32) -> (i32, i32) {
    %c0_i32 = arith.constant 0 : i32
    %c0_i32_0 = arith.constant 0 : i32
    %c0_i32_1 = arith.constant 0 : i32
    return %c0_i32, %c0_i32_0 : i32, i32
  }
  func.func @transform_3(%arg0: i32) -> (i32, i32) {
    %c0_i32 = arith.constant 0 : i32
    %c0_i32_0 = arith.constant 0 : i32
    return %arg0, %c0_i32 : i32, i32
  }
  func.func @transform_4(%arg0: i32) -> (i32, i32) {
    %c0_i32 = arith.constant 0 : i32
    %c0_i32_0 = arith.constant 0 : i32
    return %arg0, %c0_i32 : i32, i32
  }
}

module attributes {stable_mosaic.version = 11 : i64} {
  func.func @_mm_kernel(%arg0: i32, %arg1: memref<8x256xbf16, #tpu.memory_space<vmem>>, %arg2: memref<256x128xbf16, #tpu.memory_space<vmem>>, %arg3: memref<1x128xf32, #tpu.memory_space<vmem>>, %arg4: memref<8x128xbf16, #tpu.memory_space<vmem>>) attributes {dimension_semantics = [#tpu.dimension_semantics<parallel>], iteration_bounds = array<i64: 1>, scalar_prefetch = 0 : i64, scratch_operands = 0 : i64, tpu.core_type = #tpu.core_type<tc>, window_params = [{transform_indices = @transform_0, window_bounds = array<i64: 8, 256>}, {pipeline_mode = #tpu.pipeline_mode<synchronous>, transform_indices = @transform_1, window_bounds = array<i64: 256, 128>}, {pipeline_mode = #tpu.pipeline_mode<synchronous>, transform_indices = @transform_2, window_bounds = array<i64: 1, 128>}, {transform_indices = @transform_3, window_bounds = array<i64: 8, 128>}]} {
    %c0 = arith.constant 0 : index
    %c0_0 = arith.constant 0 : index
    %0 = vector.load %arg1[%c0, %c0_0] : memref<8x256xbf16, #tpu.memory_space<vmem>>, vector<8x256xbf16>
    %c0_1 = arith.constant 0 : index
    %c0_2 = arith.constant 0 : index
    %1 = vector.load %arg2[%c0_1, %c0_2] : memref<256x128xbf16, #tpu.memory_space<vmem>>, vector<256x128xbf16>
    %cst = arith.constant dense<0.000000e+00> : vector<8x128xf32>
    %2 = tpu.matmul %0, %1, %cst {dimension_numbers = #tpu.dot_dimension_numbers<[1], [0], [0], [1], [0, 0, 1, 1], [], []>} : vector<8x256xbf16>, vector<256x128xbf16>, vector<8x128xf32> -> vector<8x128xf32>
    %c0_3 = arith.constant 0 : index
    %c0_4 = arith.constant 0 : index
    %3 = vector.load %arg3[%c0_3, %c0_4] : memref<1x128xf32, #tpu.memory_space<vmem>>, vector<1x128xf32>
    %4 = vector.broadcast %3 : vector<1x128xf32> to vector<8x128xf32>
    %5 = arith.addf %2, %4 : vector<8x128xf32>
    %cst_5 = arith.constant 0.000000e+00 : f32
    %6 = vector.broadcast %cst_5 : f32 to vector<8x128xf32>
    %7 = arith.maximumf %5, %6 : vector<8x128xf32>
    %8 = arith.truncf %7 : vector<8x128xf32> to vector<8x128xbf16>
    %c0_6 = arith.constant 0 : index
    %c0_7 = arith.constant 0 : index
    %9 = vector.load %arg4[%c0_6, %c0_7] : memref<8x128xbf16, #tpu.memory_space<vmem>>, vector<8x128xbf16>
    tpu.vector_store %arg4[%c0_6, %c0_7], %8 {strides = array<i32>} : memref<8x128xbf16, #tpu.memory_space<vmem>>, vector<8x128xbf16>,
    return
  }
  func.func @transform_0(%arg0: i32) -> (i32, i32) {
    %c0_i32 = arith.constant 0 : i32
    %c0_i32_0 = arith.constant 0 : i32
    return %arg0, %c0_i32 : i32, i32
  }
  func.func @transform_1(%arg0: i32) -> (i32, i32) {
    %c0_i32 = arith.constant 0 : i32
    %c0_i32_0 = arith.constant 0 : i32
    %c0_i32_1 = arith.constant 0 : i32
    return %c0_i32, %c0_i32_0 : i32, i32
  }
  func.func @transform_2(%arg0: i32) -> (i32, i32) {
    %c0_i32 = arith.constant 0 : i32
    %c0_i32_0 = arith.constant 0 : i32
    %c0_i32_1 = arith.constant 0 : i32
    return %c0_i32, %c0_i32_0 : i32, i32
  }
  func.func @transform_3(%arg0: i32) -> (i32, i32) {
    %c0_i32 = arith.constant 0 : i32
    %c0_i32_0 = arith.constant 0 : i32
    return %arg0, %c0_i32 : i32, i32
  }
}

module attributes {stable_mosaic.version = 11 : i64} {
  func.func @_mm_kernel(%arg0: i32, %arg1: memref<8x128xbf16, #tpu.memory_space<vmem>>, %arg2: memref<128x128xbf16, #tpu.memory_space<vmem>>, %arg3: memref<1x128xf32, #tpu.memory_space<vmem>>, %arg4: memref<8x128xbf16, #tpu.memory_space<vmem>>) attributes {dimension_semantics = [#tpu.dimension_semantics<parallel>], iteration_bounds = array<i64: 1>, scalar_prefetch = 0 : i64, scratch_operands = 0 : i64, tpu.core_type = #tpu.core_type<tc>, window_params = [{transform_indices = @transform_0, window_bounds = array<i64: 8, 128>}, {pipeline_mode = #tpu.pipeline_mode<synchronous>, transform_indices = @transform_1, window_bounds = array<i64: 128, 128>}, {pipeline_mode = #tpu.pipeline_mode<synchronous>, transform_indices = @transform_2, window_bounds = array<i64: 1, 128>}, {transform_indices = @transform_3, window_bounds = array<i64: 8, 128>}]} {
    %c0 = arith.constant 0 : index
    %c0_0 = arith.constant 0 : index
    %0 = vector.load %arg1[%c0, %c0_0] : memref<8x128xbf16, #tpu.memory_space<vmem>>, vector<8x128xbf16>
    %c0_1 = arith.constant 0 : index
    %c0_2 = arith.constant 0 : index
    %1 = vector.load %arg2[%c0_1, %c0_2] : memref<128x128xbf16, #tpu.memory_space<vmem>>, vector<128x128xbf16>
    %cst = arith.constant dense<0.000000e+00> : vector<8x128xf32>
    %2 = tpu.matmul %0, %1, %cst {dimension_numbers = #tpu.dot_dimension_numbers<[1], [0], [0], [1], [0, 0, 1, 1], [], []>} : vector<8x128xbf16>, vector<128x128xbf16>, vector<8x128xf32> -> vector<8x128xf32>
    %c0_3 = arith.constant 0 : index
    %c0_4 = arith.constant 0 : index
    %3 = vector.load %arg3[%c0_3, %c0_4] : memref<1x128xf32, #tpu.memory_space<vmem>>, vector<1x128xf32>
    %4 = vector.broadcast %3 : vector<1x128xf32> to vector<8x128xf32>
    %5 = arith.addf %2, %4 : vector<8x128xf32>
    %6 = arith.truncf %5 : vector<8x128xf32> to vector<8x128xbf16>
    %c0_5 = arith.constant 0 : index
    %c0_6 = arith.constant 0 : index
    %7 = vector.load %arg4[%c0_5, %c0_6] : memref<8x128xbf16, #tpu.memory_space<vmem>>, vector<8x128xbf16>
    tpu.vector_store %arg4[%c0_5, %c0_6], %6 {strides = array<i32>} : memref<8x128xbf16, #tpu.memory_space<vmem>>, vector<8x128xbf16>,
    return
  }
  func.func @transform_0(%arg0: i32) -> (i32, i32) {
    %c0_i32 = arith.constant 0 : i32
    %c0_i32_0 = arith.constant 0 : i32
    return %arg0, %c0_i32 : i32, i32
  }
  func.func @transform_1(%arg0: i32) -> (i32, i32) {
    %c0_i32 = arith.constant 0 : i32
    %c0_i32_0 = arith.constant 0 : i32
    %c0_i32_1 = arith.constant 0 : i32
    return %c0_i32, %c0_i32_0 : i32, i32
  }
  func.func @transform_2(%arg0: i32) -> (i32, i32) {
    %c0_i32 = arith.constant 0 : i32
    %c0_i32_0 = arith.constant 0 : i32
    %c0_i32_1 = arith.constant 0 : i32
    return %c0_i32, %c0_i32_0 : i32, i32
  }
  func.func @transform_3(%arg0: i32) -> (i32, i32) {
    %c0_i32 = arith.constant 0 : i32
    %c0_i32_0 = arith.constant 0 : i32
    return %arg0, %c0_i32 : i32, i32
  }
}

module attributes {stable_mosaic.version = 11 : i64} {
  func.func @_mm_res_kernel(%arg0: i32, %arg1: memref<8x384xbf16, #tpu.memory_space<vmem>>, %arg2: memref<384x128xbf16, #tpu.memory_space<vmem>>, %arg3: memref<1x128xf32, #tpu.memory_space<vmem>>, %arg4: memref<8x128xbf16, #tpu.memory_space<vmem>>, %arg5: memref<8x128xbf16, #tpu.memory_space<vmem>>) attributes {dimension_semantics = [#tpu.dimension_semantics<parallel>], iteration_bounds = array<i64: 1>, scalar_prefetch = 0 : i64, scratch_operands = 0 : i64, tpu.core_type = #tpu.core_type<tc>, window_params = [{transform_indices = @transform_0, window_bounds = array<i64: 8, 384>}, {pipeline_mode = #tpu.pipeline_mode<synchronous>, transform_indices = @transform_1, window_bounds = array<i64: 384, 128>}, {pipeline_mode = #tpu.pipeline_mode<synchronous>, transform_indices = @transform_2, window_bounds = array<i64: 1, 128>}, {transform_indices = @transform_3, window_bounds = array<i64: 8, 128>}, {transform_indices = @transform_4, window_bounds = array<i64: 8, 128>}]} {
    %c0 = arith.constant 0 : index
    %c0_0 = arith.constant 0 : index
    %0 = vector.load %arg1[%c0, %c0_0] : memref<8x384xbf16, #tpu.memory_space<vmem>>, vector<8x384xbf16>
    %c0_1 = arith.constant 0 : index
    %c0_2 = arith.constant 0 : index
    %1 = vector.load %arg2[%c0_1, %c0_2] : memref<384x128xbf16, #tpu.memory_space<vmem>>, vector<384x128xbf16>
    %cst = arith.constant dense<0.000000e+00> : vector<8x128xf32>
    %2 = tpu.matmul %0, %1, %cst {dimension_numbers = #tpu.dot_dimension_numbers<[1], [0], [0], [1], [0, 0, 1, 1], [], []>} : vector<8x384xbf16>, vector<384x128xbf16>, vector<8x128xf32> -> vector<8x128xf32>
    %c0_3 = arith.constant 0 : index
    %c0_4 = arith.constant 0 : index
    %3 = vector.load %arg3[%c0_3, %c0_4] : memref<1x128xf32, #tpu.memory_space<vmem>>, vector<1x128xf32>
    %4 = vector.broadcast %3 : vector<1x128xf32> to vector<8x128xf32>
    %5 = arith.addf %2, %4 : vector<8x128xf32>
    %c0_5 = arith.constant 0 : index
    %c0_6 = arith.constant 0 : index
    %6 = vector.load %arg4[%c0_5, %c0_6] : memref<8x128xbf16, #tpu.memory_space<vmem>>, vector<8x128xbf16>
    %7 = arith.extf %6 : vector<8x128xbf16> to vector<8x128xf32>
    %8 = arith.addf %5, %7 : vector<8x128xf32>
    %cst_7 = arith.constant 0.000000e+00 : f32
    %9 = vector.broadcast %cst_7 : f32 to vector<8x128xf32>
    %10 = arith.maximumf %8, %9 : vector<8x128xf32>
    %11 = arith.truncf %10 : vector<8x128xf32> to vector<8x128xbf16>
    %c0_8 = arith.constant 0 : index
    %c0_9 = arith.constant 0 : index
    %12 = vector.load %arg5[%c0_8, %c0_9] : memref<8x128xbf16, #tpu.memory_space<vmem>>, vector<8x128xbf16>
    tpu.vector_store %arg5[%c0_8, %c0_9], %11 {strides = array<i32>} : memref<8x128xbf16, #tpu.memory_space<vmem>>, vector<8x128xbf16>,
    return
  }
  func.func @transform_0(%arg0: i32) -> (i32, i32) {
    %c0_i32 = arith.constant 0 : i32
    %c0_i32_0 = arith.constant 0 : i32
    return %arg0, %c0_i32 : i32, i32
  }
  func.func @transform_1(%arg0: i32) -> (i32, i32) {
    %c0_i32 = arith.constant 0 : i32
    %c0_i32_0 = arith.constant 0 : i32
    %c0_i32_1 = arith.constant 0 : i32
    return %c0_i32, %c0_i32_0 : i32, i32
  }
  func.func @transform_2(%arg0: i32) -> (i32, i32) {
    %c0_i32 = arith.constant 0 : i32
    %c0_i32_0 = arith.constant 0 : i32
    %c0_i32_1 = arith.constant 0 : i32
    return %c0_i32, %c0_i32_0 : i32, i32
  }
  func.func @transform_3(%arg0: i32) -> (i32, i32) {
    %c0_i32 = arith.constant 0 : i32
    %c0_i32_0 = arith.constant 0 : i32
    return %arg0, %c0_i32 : i32, i32
  }
  func.func @transform_4(%arg0: i32) -> (i32, i32) {
    %c0_i32 = arith.constant 0 : i32
    %c0_i32_0 = arith.constant 0 : i32
    return %arg0, %c0_i32 : i32, i32
  }
}

module attributes {stable_mosaic.version = 11 : i64} {
  func.func @_mm_kernel(%arg0: i32, %arg1: memref<8x384xbf16, #tpu.memory_space<vmem>>, %arg2: memref<384x128xbf16, #tpu.memory_space<vmem>>, %arg3: memref<1x128xf32, #tpu.memory_space<vmem>>, %arg4: memref<8x128xbf16, #tpu.memory_space<vmem>>) attributes {dimension_semantics = [#tpu.dimension_semantics<parallel>], iteration_bounds = array<i64: 1>, scalar_prefetch = 0 : i64, scratch_operands = 0 : i64, tpu.core_type = #tpu.core_type<tc>, window_params = [{transform_indices = @transform_0, window_bounds = array<i64: 8, 384>}, {pipeline_mode = #tpu.pipeline_mode<synchronous>, transform_indices = @transform_1, window_bounds = array<i64: 384, 128>}, {pipeline_mode = #tpu.pipeline_mode<synchronous>, transform_indices = @transform_2, window_bounds = array<i64: 1, 128>}, {transform_indices = @transform_3, window_bounds = array<i64: 8, 128>}]} {
    %c0 = arith.constant 0 : index
    %c0_0 = arith.constant 0 : index
    %0 = vector.load %arg1[%c0, %c0_0] : memref<8x384xbf16, #tpu.memory_space<vmem>>, vector<8x384xbf16>
    %c0_1 = arith.constant 0 : index
    %c0_2 = arith.constant 0 : index
    %1 = vector.load %arg2[%c0_1, %c0_2] : memref<384x128xbf16, #tpu.memory_space<vmem>>, vector<384x128xbf16>
    %cst = arith.constant dense<0.000000e+00> : vector<8x128xf32>
    %2 = tpu.matmul %0, %1, %cst {dimension_numbers = #tpu.dot_dimension_numbers<[1], [0], [0], [1], [0, 0, 1, 1], [], []>} : vector<8x384xbf16>, vector<384x128xbf16>, vector<8x128xf32> -> vector<8x128xf32>
    %c0_3 = arith.constant 0 : index
    %c0_4 = arith.constant 0 : index
    %3 = vector.load %arg3[%c0_3, %c0_4] : memref<1x128xf32, #tpu.memory_space<vmem>>, vector<1x128xf32>
    %4 = vector.broadcast %3 : vector<1x128xf32> to vector<8x128xf32>
    %5 = arith.addf %2, %4 : vector<8x128xf32>
    %cst_5 = arith.constant 0.000000e+00 : f32
    %6 = vector.broadcast %cst_5 : f32 to vector<8x128xf32>
    %7 = arith.maximumf %5, %6 : vector<8x128xf32>
    %8 = arith.truncf %7 : vector<8x128xf32> to vector<8x128xbf16>
    %c0_6 = arith.constant 0 : index
    %c0_7 = arith.constant 0 : index
    %9 = vector.load %arg4[%c0_6, %c0_7] : memref<8x128xbf16, #tpu.memory_space<vmem>>, vector<8x128xbf16>
    tpu.vector_store %arg4[%c0_6, %c0_7], %8 {strides = array<i32>} : memref<8x128xbf16, #tpu.memory_space<vmem>>, vector<8x128xbf16>,
    return
  }
  func.func @transform_0(%arg0: i32) -> (i32, i32) {
    %c0_i32 = arith.constant 0 : i32
    %c0_i32_0 = arith.constant 0 : i32
    return %arg0, %c0_i32 : i32, i32
  }
  func.func @transform_1(%arg0: i32) -> (i32, i32) {
    %c0_i32 = arith.constant 0 : i32
    %c0_i32_0 = arith.constant 0 : i32
    %c0_i32_1 = arith.constant 0 : i32
    return %c0_i32, %c0_i32_0 : i32, i32
  }
  func.func @transform_2(%arg0: i32) -> (i32, i32) {
    %c0_i32 = arith.constant 0 : i32
    %c0_i32_0 = arith.constant 0 : i32
    %c0_i32_1 = arith.constant 0 : i32
    return %c0_i32, %c0_i32_0 : i32, i32
  }
  func.func @transform_3(%arg0: i32) -> (i32, i32) {
    %c0_i32 = arith.constant 0 : i32
    %c0_i32_0 = arith.constant 0 : i32
    return %arg0, %c0_i32 : i32, i32
  }
}

module attributes {stable_mosaic.version = 11 : i64} {
  func.func @_mm_kernel(%arg0: i32, %arg1: memref<8x640xbf16, #tpu.memory_space<vmem>>, %arg2: memref<640x128xbf16, #tpu.memory_space<vmem>>, %arg3: memref<1x128xf32, #tpu.memory_space<vmem>>, %arg4: memref<8x128xbf16, #tpu.memory_space<vmem>>) attributes {dimension_semantics = [#tpu.dimension_semantics<parallel>], iteration_bounds = array<i64: 1>, scalar_prefetch = 0 : i64, scratch_operands = 0 : i64, tpu.core_type = #tpu.core_type<tc>, window_params = [{transform_indices = @transform_0, window_bounds = array<i64: 8, 640>}, {pipeline_mode = #tpu.pipeline_mode<synchronous>, transform_indices = @transform_1, window_bounds = array<i64: 640, 128>}, {pipeline_mode = #tpu.pipeline_mode<synchronous>, transform_indices = @transform_2, window_bounds = array<i64: 1, 128>}, {transform_indices = @transform_3, window_bounds = array<i64: 8, 128>}]} {
    %c0 = arith.constant 0 : index
    %c0_0 = arith.constant 0 : index
    %0 = vector.load %arg1[%c0, %c0_0] : memref<8x640xbf16, #tpu.memory_space<vmem>>, vector<8x640xbf16>
    %c0_1 = arith.constant 0 : index
    %c0_2 = arith.constant 0 : index
    %1 = vector.load %arg2[%c0_1, %c0_2] : memref<640x128xbf16, #tpu.memory_space<vmem>>, vector<640x128xbf16>
    %cst = arith.constant dense<0.000000e+00> : vector<8x128xf32>
    %2 = tpu.matmul %0, %1, %cst {dimension_numbers = #tpu.dot_dimension_numbers<[1], [0], [0], [1], [0, 0, 1, 1], [], []>} : vector<8x640xbf16>, vector<640x128xbf16>, vector<8x128xf32> -> vector<8x128xf32>
    %c0_3 = arith.constant 0 : index
    %c0_4 = arith.constant 0 : index
    %3 = vector.load %arg3[%c0_3, %c0_4] : memref<1x128xf32, #tpu.memory_space<vmem>>, vector<1x128xf32>
    %4 = vector.broadcast %3 : vector<1x128xf32> to vector<8x128xf32>
    %5 = arith.addf %2, %4 : vector<8x128xf32>
    %cst_5 = arith.constant 0.000000e+00 : f32
    %6 = vector.broadcast %cst_5 : f32 to vector<8x128xf32>
    %7 = arith.maximumf %5, %6 : vector<8x128xf32>
    %8 = arith.truncf %7 : vector<8x128xf32> to vector<8x128xbf16>
    %c0_6 = arith.constant 0 : index
    %c0_7 = arith.constant 0 : index
    %9 = vector.load %arg4[%c0_6, %c0_7] : memref<8x128xbf16, #tpu.memory_space<vmem>>, vector<8x128xbf16>
    tpu.vector_store %arg4[%c0_6, %c0_7], %8 {strides = array<i32>} : memref<8x128xbf16, #tpu.memory_space<vmem>>, vector<8x128xbf16>,
    return
  }
  func.func @transform_0(%arg0: i32) -> (i32, i32) {
    %c0_i32 = arith.constant 0 : i32
    %c0_i32_0 = arith.constant 0 : i32
    return %arg0, %c0_i32 : i32, i32
  }
  func.func @transform_1(%arg0: i32) -> (i32, i32) {
    %c0_i32 = arith.constant 0 : i32
    %c0_i32_0 = arith.constant 0 : i32
    %c0_i32_1 = arith.constant 0 : i32
    return %c0_i32, %c0_i32_0 : i32, i32
  }
  func.func @transform_2(%arg0: i32) -> (i32, i32) {
    %c0_i32 = arith.constant 0 : i32
    %c0_i32_0 = arith.constant 0 : i32
    %c0_i32_1 = arith.constant 0 : i32
    return %c0_i32, %c0_i32_0 : i32, i32
  }
  func.func @transform_3(%arg0: i32) -> (i32, i32) {
    %c0_i32 = arith.constant 0 : i32
    %c0_i32_0 = arith.constant 0 : i32
    return %arg0, %c0_i32 : i32, i32
  }
}

module attributes {stable_mosaic.version = 11 : i64} {
  func.func @_mm_res_kernel(%arg0: i32, %arg1: memref<8x640xbf16, #tpu.memory_space<vmem>>, %arg2: memref<640x128xbf16, #tpu.memory_space<vmem>>, %arg3: memref<1x128xf32, #tpu.memory_space<vmem>>, %arg4: memref<8x128xbf16, #tpu.memory_space<vmem>>, %arg5: memref<8x128xbf16, #tpu.memory_space<vmem>>) attributes {dimension_semantics = [#tpu.dimension_semantics<parallel>], iteration_bounds = array<i64: 1>, scalar_prefetch = 0 : i64, scratch_operands = 0 : i64, tpu.core_type = #tpu.core_type<tc>, window_params = [{transform_indices = @transform_0, window_bounds = array<i64: 8, 640>}, {pipeline_mode = #tpu.pipeline_mode<synchronous>, transform_indices = @transform_1, window_bounds = array<i64: 640, 128>}, {pipeline_mode = #tpu.pipeline_mode<synchronous>, transform_indices = @transform_2, window_bounds = array<i64: 1, 128>}, {transform_indices = @transform_3, window_bounds = array<i64: 8, 128>}, {transform_indices = @transform_4, window_bounds = array<i64: 8, 128>}]} {
    %c0 = arith.constant 0 : index
    %c0_0 = arith.constant 0 : index
    %0 = vector.load %arg1[%c0, %c0_0] : memref<8x640xbf16, #tpu.memory_space<vmem>>, vector<8x640xbf16>
    %c0_1 = arith.constant 0 : index
    %c0_2 = arith.constant 0 : index
    %1 = vector.load %arg2[%c0_1, %c0_2] : memref<640x128xbf16, #tpu.memory_space<vmem>>, vector<640x128xbf16>
    %cst = arith.constant dense<0.000000e+00> : vector<8x128xf32>
    %2 = tpu.matmul %0, %1, %cst {dimension_numbers = #tpu.dot_dimension_numbers<[1], [0], [0], [1], [0, 0, 1, 1], [], []>} : vector<8x640xbf16>, vector<640x128xbf16>, vector<8x128xf32> -> vector<8x128xf32>
    %c0_3 = arith.constant 0 : index
    %c0_4 = arith.constant 0 : index
    %3 = vector.load %arg3[%c0_3, %c0_4] : memref<1x128xf32, #tpu.memory_space<vmem>>, vector<1x128xf32>
    %4 = vector.broadcast %3 : vector<1x128xf32> to vector<8x128xf32>
    %5 = arith.addf %2, %4 : vector<8x128xf32>
    %c0_5 = arith.constant 0 : index
    %c0_6 = arith.constant 0 : index
    %6 = vector.load %arg4[%c0_5, %c0_6] : memref<8x128xbf16, #tpu.memory_space<vmem>>, vector<8x128xbf16>
    %7 = arith.extf %6 : vector<8x128xbf16> to vector<8x128xf32>
    %8 = arith.addf %5, %7 : vector<8x128xf32>
    %cst_7 = arith.constant 0.000000e+00 : f32
    %9 = vector.broadcast %cst_7 : f32 to vector<8x128xf32>
    %10 = arith.maximumf %8, %9 : vector<8x128xf32>
    %11 = arith.truncf %10 : vector<8x128xf32> to vector<8x128xbf16>
    %c0_8 = arith.constant 0 : index
    %c0_9 = arith.constant 0 : index
    %12 = vector.load %arg5[%c0_8, %c0_9] : memref<8x128xbf16, #tpu.memory_space<vmem>>, vector<8x128xbf16>
    tpu.vector_store %arg5[%c0_8, %c0_9], %11 {strides = array<i32>} : memref<8x128xbf16, #tpu.memory_space<vmem>>, vector<8x128xbf16>,
    return
  }
  func.func @transform_0(%arg0: i32) -> (i32, i32) {
    %c0_i32 = arith.constant 0 : i32
    %c0_i32_0 = arith.constant 0 : i32
    return %arg0, %c0_i32 : i32, i32
  }
  func.func @transform_1(%arg0: i32) -> (i32, i32) {
    %c0_i32 = arith.constant 0 : i32
    %c0_i32_0 = arith.constant 0 : i32
    %c0_i32_1 = arith.constant 0 : i32
    return %c0_i32, %c0_i32_0 : i32, i32
  }
  func.func @transform_2(%arg0: i32) -> (i32, i32) {
    %c0_i32 = arith.constant 0 : i32
    %c0_i32_0 = arith.constant 0 : i32
    %c0_i32_1 = arith.constant 0 : i32
    return %c0_i32, %c0_i32_0 : i32, i32
  }
  func.func @transform_3(%arg0: i32) -> (i32, i32) {
    %c0_i32 = arith.constant 0 : i32
    %c0_i32_0 = arith.constant 0 : i32
    return %arg0, %c0_i32 : i32, i32
  }
  func.func @transform_4(%arg0: i32) -> (i32, i32) {
    %c0_i32 = arith.constant 0 : i32
    %c0_i32_0 = arith.constant 0 : i32
    return %arg0, %c0_i32 : i32, i32
  }
}

</mosaic_0001>

<bundles_post_ra>
// kernel: forward.22
= control target key start
LH: loop header
LB: loop body
LE: loop exit
PB: predicated region body
PF: predicated region fallthrough
CT: control target
= control target key end

     0   :  { %s1287_s30 = smov 0   ;;  %s1404_s0 = inlined_call_operand.vmem [shape: bf16[128,128], index: 0, kind: input, shape index: {}]   ;;  %s1405_s1 = inlined_call_operand.vmem [shape: bf16[128,128], index: 1, kind: input, shape index: {}]   ;;  %s1406_s2 = inlined_call_operand.vmem [shape: bf16[128,128], index: 2, kind: input, shape index: {}]   ;;  %s1407_s3 = inlined_call_operand.vmem [shape: bf16[128,128], index: 3, kind: input, shape index: {}]   ;;  %s1408_s4 = inlined_call_operand.vmem [shape: bf16[128,128], index: 4, kind: input, shape index: {}]   ;;  %s1409_s5 = inlined_call_operand.vmem [shape: bf16[128,128], index: 5, kind: input, shape index: {}]   ;;  %s1410_s6 = inlined_call_operand.vmem [shape: bf16[128,128], index: 6, kind: input, shape index: {}]   ;;  %s1411_s7 = inlined_call_operand.vmem [shape: bf16[128,128], index: 7, kind: input, shape index: {}]   ;;  %s1412_s8 = inlined_call_operand.vmem [shape: bf16[128,128], index: 8, kind: input, shape index: {}]   ;;  %s1413_s9 = inlined_call_operand.vmem [shape: bf16[128,128], index: 9, kind: output, shape index: {}]  }
   0x1 LB: > { %s1000_s10 = sadd.s32 4294967295, %s1235_s30   ;;  %p1004_p0 = scmp.ge.s32.totalorder %s1235_s30, 1  ;;  %s1235_s30 = sphi %s1287_s30, %s19_s30  }
   0x2   : > { %p376_p1 = scmp.lt.s32.totalorder %s1235_s30, 3 }
   0x4   : > { %p377_p2 = pnand %p1004_p0, %p376_p1 }
   0x5   : > { %s1005_s11 = sshll.u32 (!%p377_p2), %s1000_s10, 3 }
   0x6   : > { %380 = sbr.rel (%p377_p2) target bundleno = 60 (0x3c), region = 56  ;;  %p453_p3 = scmp.lt.s32.totalorder (!%p377_p2), %s1005_s11, 15 }
   0xb   : > { %s1415_s11 = smov (!%p453_p3, %s1005_s11), 15 }
   0xc   : > { %s1295_s12 = sshll.u32 %s1415_s11, 2 }
   0xd   : > { %s1301_s15 = scalar_lea.vmem %s1404_s0, %s1295_s12  ;;  %s1307_s18 = scalar_lea.vmem %s1405_s1, %s1295_s12 }
   0xe   : > { %s1313_s21 = scalar_lea.vmem %s1406_s2, %s1295_s12  ;;  %s1319_s24 = scalar_lea.vmem %s1407_s3, %s1295_s12  ;;  %v1028_v0 = vld [vmem:[%s1301_s15] sm:$0xff]   ;;  %v1191_v19 = vld [vmem:[%s1301_s15 + $0x8] sm:$0xff]   ;;  %v1192_v61 = vld [vmem:[%s1301_s15 + $0x10] sm:$0xff]  }
   0xf   : > { %v1044_v1 = vld [vmem:[%s1307_s18] sm:$0xff]   ;;  %s1327_s27 = scalar_lea.vmem %s1408_s4, %s1295_s12  ;;  %s1333_s10 = scalar_lea.vmem %s1409_s5, %s1295_s12  ;;  %v1029_v2 = vunpack.c.l.bf16 %v1028_v0  ;;  %v1030_v3 = vunpack.c.h.bf16 %v1028_v0  ;;  %v1194_v25 = vld [vmem:[%s1307_s18 + $0x8] sm:$0xff]   ;;  %v1033_v34 = vunpack.c.l.bf16 %v1191_v19  ;;  %v1034_v35 = vunpack.c.h.bf16 %v1191_v19 }
  0x10   : > { %v1045_v4 = vunpack.c.l.bf16 %v1044_v1  ;;  %v1046_v5 = vunpack.c.h.bf16 %v1044_v1  ;;  %v1060_v6 = vld [vmem:[%s1313_s21] sm:$0xff]   ;;  %s1341_s14 = scalar_lea.vmem %s1410_s6, %s1295_s12  ;;  %s1347_s19 = scalar_lea.vmem %s1411_s7, %s1295_s12  ;;  %v1197_v30 = vld [vmem:[%s1313_s21 + $0x8] sm:$0xff]   ;;  %v1049_v38 = vunpack.c.l.bf16 %v1194_v25  ;;  %v1050_v39 = vunpack.c.h.bf16 %v1194_v25  ;;  %v1204_v25 = vld [vmem:[%s1327_s27 + $0x10] sm:$0xff]  }
  0x11   : > { %v1076_v7 = vld [vmem:[%s1319_s24] sm:$0xff]   ;;  %v1061_v8 = vunpack.c.l.bf16 %v1060_v6  ;;  %v1062_v9 = vunpack.c.h.bf16 %v1060_v6  ;;  %s1355_s23 = scalar_lea.vmem %s1412_s8, %s1295_s12  ;;  %v1200_v31 = vld [vmem:[%s1319_s24 + $0x8] sm:$0xff]   ;;  %v1065_v42 = vunpack.c.l.bf16 %v1197_v30  ;;  %v1066_v43 = vunpack.c.h.bf16 %v1197_v30  ;;  %v1195_v6 = vld [vmem:[%s1307_s18 + $0x10] sm:$0xff]   ;;  %s1382_s28 = scalar_lea.vmem %s1413_s9, %s1295_s12 }
  0x12   : > { %v1077_v10 = vunpack.c.l.bf16 %v1076_v7  ;;  %v1092_v11 = vld [vmem:[%s1327_s27] sm:$0xff]   ;;  %v544_v13 = vmax.f32 %v1029_v2, %v1045_v4  ;;  %v545_v14 = vmax.f32 %v1030_v3, %v1046_v5  ;;  %v1078_v15 = vunpack.c.h.bf16 %v1076_v7  ;;  %v1203_v40 = vld [vmem:[%s1327_s27 + $0x8] sm:$0xff]   ;;  %v1198_v7 = vld [vmem:[%s1313_s21 + $0x10] sm:$0xff]  }
  0x13   : > { %v1108_v12 = vld [vmem:[%s1333_s10] sm:$0xff]   ;;  %v1093_v16 = vunpack.c.l.bf16 %v1092_v11  ;;  %v1094_v20 = vunpack.c.h.bf16 %v1092_v11  ;;  %v1206_v41 = vld [vmem:[%s1333_s10 + $0x8] sm:$0xff]   ;;  %v1081_v44 = vunpack.c.l.bf16 %v1200_v31  ;;  %v1082_v45 = vunpack.c.h.bf16 %v1200_v31  ;;  %v1207_v30 = vld [vmem:[%s1333_s10 + $0x10] sm:$0xff]  }
  0x14   : > { %v1124_v17 = vld [vmem:[%s1341_s14] sm:$0xff]   ;;  %v1109_v21 = vunpack.c.l.bf16 %v1108_v12  ;;  %v1110_v22 = vunpack.c.h.bf16 %v1108_v12  ;;  %v584_v26 = vmax.f32 %v544_v13, %v1061_v8  ;;  %v585_v27 = vmax.f32 %v545_v14, %v1062_v9  ;;  %v1209_v50 = vld [vmem:[%s1341_s14 + $0x8] sm:$0xff]  }
  0x15   : > { %v1140_v18 = vld [vmem:[%s1347_s19] sm:$0xff]   ;;  %v1125_v23 = vunpack.c.l.bf16 %v1124_v17  ;;  %v1126_v28 = vunpack.c.h.bf16 %v1124_v17  ;;  %v546_v48 = vmax.f32 %v1033_v34, %v1049_v38  ;;  %v547_v49 = vmax.f32 %v1034_v35, %v1050_v39  ;;  %v1212_v51 = vld [vmem:[%s1347_s19 + $0x8] sm:$0xff]   ;;  %v1210_v35 = vld [vmem:[%s1341_s14 + $0x10] sm:$0xff]  }
  0x16   : > { %v1361_v24 = vld [vmem:[%s1355_s23] sm:$0xff]   ;;  %v1141_v29 = vunpack.c.l.bf16 %v1140_v18  ;;  %v1142_v32 = vunpack.c.h.bf16 %v1140_v18  ;;  %v624_v36 = vmax.f32 %v584_v26, %v1077_v10  ;;  %v625_v37 = vmax.f32 %v585_v27, %v1078_v15  ;;  %v1215_v60 = vld [vmem:[%s1355_s23 + $0x8] sm:$0xff]  }
  0x17   : > { %v1157_v33 = vunpack.c.l.bf16 %v1361_v24  ;;  %v1158_v52 = vunpack.c.h.bf16 %v1361_v24  ;;  %v1097_v53 = vunpack.c.l.bf16 %v1203_v40  ;;  %v1098_v54 = vunpack.c.h.bf16 %v1203_v40  ;;  %v1213_v40 = vld [vmem:[%s1347_s19 + $0x10] sm:$0xff]  }
  0x18   : > { %v664_v46 = vmax.f32 %v624_v36, %v1093_v16  ;;  %v665_v47 = vmax.f32 %v625_v37, %v1094_v20  ;;  %v1113_v55 = vunpack.c.l.bf16 %v1206_v41  ;;  %v586_v58 = vmax.f32 %v546_v48, %v1065_v42  ;;  %v1201_v16 = vld [vmem:[%s1319_s24 + $0x10] sm:$0xff]  }
  0x19   : > { %v587_v59 = vmax.f32 %v547_v49, %v1066_v43  ;;  %v1114_v62 = vunpack.c.h.bf16 %v1206_v41  ;;  %v1129_v63 = vunpack.c.l.bf16 %v1209_v50  ;;  %v1130_v0 = vunpack.c.h.bf16 %v1209_v50  ;;  %v1196_v49 = vld [vmem:[%s1307_s18 + $0x18] sm:$0xff]  }
  0x1a   : > { %v704_v56 = vmax.f32 %v664_v46, %v1109_v21  ;;  %v705_v57 = vmax.f32 %v665_v47, %v1110_v22  ;;  %v1145_v1 = vunpack.c.l.bf16 %v1212_v51  ;;  %v626_v4 = vmax.f32 %v586_v58, %v1081_v44  ;;  %v1193_v44 = vld [vmem:[%s1301_s15 + $0x18] sm:$0xff]  }
  0x1b   : > { %v627_v5 = vmax.f32 %v587_v59, %v1082_v45  ;;  %v1146_v8 = vunpack.c.h.bf16 %v1212_v51  ;;  %v1161_v9 = vunpack.c.l.bf16 %v1215_v60  ;;  %v1037_v10 = vunpack.c.l.bf16 %v1192_v61  ;;  %v1202_v59 = vld [vmem:[%s1319_s24 + $0x18] sm:$0xff]  }
  0x1c   : > { %v744_v2 = vmax.f32 %v704_v56, %v1125_v23  ;;  %v745_v3 = vmax.f32 %v705_v57, %v1126_v28  ;;  %v1038_v11 = vunpack.c.h.bf16 %v1192_v61  ;;  %v666_v14 = vmax.f32 %v626_v4, %v1097_v53  ;;  %v1216_v61 = vld [vmem:[%s1355_s23 + $0x10] sm:$0xff]  }
  0x1d   : > { %v667_v15 = vmax.f32 %v627_v5, %v1098_v54  ;;  %v1053_v17 = vunpack.c.l.bf16 %v1195_v6  ;;  %v1054_v18 = vunpack.c.h.bf16 %v1195_v6  ;;  %v1069_v19 = vunpack.c.l.bf16 %v1198_v7  ;;  %v1199_v54 = vld [vmem:[%s1313_s21 + $0x18] sm:$0xff]  }
  0x1e   : > { %v784_v12 = vmax.f32 %v744_v2, %v1141_v29  ;;  %v785_v13 = vmax.f32 %v745_v3, %v1142_v32  ;;  %v1070_v20 = vunpack.c.h.bf16 %v1198_v7  ;;  %v706_v23 = vmax.f32 %v666_v14, %v1113_v55  ;;  %v1205_v5 = vld [vmem:[%s1327_s27 + $0x18] sm:$0xff]  }
  0x1f   : > { %v707_v24 = vmax.f32 %v667_v15, %v1114_v62  ;;  %v548_v26 = vmax.f32 %v1037_v10, %v1053_v17  ;;  %v549_v27 = vmax.f32 %v1038_v11, %v1054_v18  ;;  %v1085_v28 = vunpack.c.l.bf16 %v1201_v16  ;;  %v1208_v14 = vld [vmem:[%s1333_s10 + $0x18] sm:$0xff]  }
  0x20   : > { %v824_v21 = vmax.f32 %v784_v12, %v1157_v33  ;;  %v825_v22 = vmax.f32 %v785_v13, %v1158_v52  ;;  %v1086_v29 = vunpack.c.h.bf16 %v1201_v16  ;;  %v746_v32 = vmax.f32 %v706_v23, %v1129_v63 }
  0x21   : > { %v747_v33 = vmax.f32 %v707_v24, %v1130_v0  ;;  %v1162_v34 = vunpack.c.h.bf16 %v1215_v60  ;;  %v588_v36 = vmax.f32 %v548_v26, %v1069_v19  ;;  %v589_v37 = vmax.f32 %v549_v27, %v1070_v20 }
  0x22   : > { %v1174_v31 = vpack.c.bf16 %v825_v22, %v824_v21  ;;  %v1101_v38 = vunpack.c.l.bf16 %v1204_v25  ;;  %v1102_v39 = vunpack.c.h.bf16 %v1204_v25  ;;  %v786_v41 = vmax.f32 %v746_v32, %v1145_v1  ;;  %v1211_v21 = vld [vmem:[%s1341_s14 + $0x18] sm:$0xff]  }
  0x23   : > { %v787_v42 = vmax.f32 %v747_v33, %v1146_v8  ;;  %v1117_v43 = vunpack.c.l.bf16 %v1207_v30  ;;  %v628_v45 = vmax.f32 %v588_v36, %v1085_v28  ;;  %v629_v46 = vmax.f32 %v589_v37, %v1086_v29  ;;  %v1214_v28 = vld [vmem:[%s1347_s19 + $0x18] sm:$0xff]  }
  0x24   : > { %1175 = vst [vmem:[%s1382_s28] sm:$0xff] %v1174_v31   ;;  %v1118_v47 = vunpack.c.h.bf16 %v1207_v30  ;;  %v1133_v48 = vunpack.c.l.bf16 %v1210_v35  ;;  %v826_v50 = vmax.f32 %v786_v41, %v1161_v9  ;;  %v1134_v52 = vunpack.c.h.bf16 %v1210_v35 }
  0x25   : > { %v827_v51 = vmax.f32 %v787_v42, %v1162_v34  ;;  %v1149_v53 = vunpack.c.l.bf16 %v1213_v40  ;;  %v668_v55 = vmax.f32 %v628_v45, %v1101_v38  ;;  %v669_v56 = vmax.f32 %v629_v46, %v1102_v39  ;;  %v1217_v34 = vld [vmem:[%s1355_s23 + $0x18] sm:$0xff]  }
  0x26   : > { %v1150_v57 = vunpack.c.h.bf16 %v1213_v40  ;;  %v1041_v58 = vunpack.c.l.bf16 %v1193_v44  ;;  %v1042_v62 = vunpack.c.h.bf16 %v1193_v44  ;;  %v1057_v63 = vunpack.c.l.bf16 %v1196_v49 }
  0x27   : > { %v1179_v60 = vpack.c.bf16 %v827_v51, %v826_v50  ;;  %v1058_v0 = vunpack.c.h.bf16 %v1196_v49  ;;  %v708_v1 = vmax.f32 %v668_v55, %v1117_v43  ;;  %v709_v2 = vmax.f32 %v669_v56, %v1118_v47 }
  0x28   : > { %v1073_v3 = vunpack.c.l.bf16 %v1199_v54  ;;  %v1074_v4 = vunpack.c.h.bf16 %v1199_v54  ;;  %v550_v6 = vmax.f32 %v1041_v58, %v1057_v63  ;;  %v1089_v8 = vunpack.c.l.bf16 %v1202_v59 }
  0x29   : > { %1218 = vst [vmem:[%s1382_s28 + $0x8] sm:$0xff] %v1179_v60   ;;  %v551_v7 = vmax.f32 %v1042_v62, %v1058_v0  ;;  %v1090_v9 = vunpack.c.h.bf16 %v1202_v59  ;;  %v748_v10 = vmax.f32 %v708_v1, %v1133_v48  ;;  %v749_v11 = vmax.f32 %v709_v2, %v1134_v52 }
  0x2a   : > { %v1165_v12 = vunpack.c.l.bf16 %v1216_v61  ;;  %v1166_v13 = vunpack.c.h.bf16 %v1216_v61  ;;  %v590_v15 = vmax.f32 %v550_v6, %v1073_v3  ;;  %v1105_v17 = vunpack.c.l.bf16 %v1205_v5 }
  0x2b   : > { %v591_v16 = vmax.f32 %v551_v7, %v1074_v4  ;;  %v1106_v18 = vunpack.c.h.bf16 %v1205_v5  ;;  %v788_v19 = vmax.f32 %v748_v10, %v1149_v53  ;;  %v789_v20 = vmax.f32 %v749_v11, %v1150_v57 }
  0x2c   : > { %v630_v22 = vmax.f32 %v590_v15, %v1089_v8  ;;  %v1121_v24 = vunpack.c.l.bf16 %v1208_v14  ;;  %v1122_v25 = vunpack.c.h.bf16 %v1208_v14  ;;  %v1137_v31 = vunpack.c.l.bf16 %v1211_v21 }
  0x2d   : > { %v631_v23 = vmax.f32 %v591_v16, %v1090_v9  ;;  %v828_v26 = vmax.f32 %v788_v19, %v1165_v12  ;;  %v829_v27 = vmax.f32 %v789_v20, %v1166_v13  ;;  %v1138_v32 = vunpack.c.h.bf16 %v1211_v21 }
  0x2e   : > { %v670_v29 = vmax.f32 %v630_v22, %v1105_v17  ;;  %v1153_v37 = vunpack.c.l.bf16 %v1214_v28  ;;  %v1154_v38 = vunpack.c.h.bf16 %v1214_v28  ;;  %v1169_v41 = vunpack.c.l.bf16 %v1217_v34 }
  0x2f   : > { %v671_v30 = vmax.f32 %v631_v23, %v1106_v18  ;;  %v1184_v33 = vpack.c.bf16 %v829_v27, %v828_v26  ;;  %v1170_v42 = vunpack.c.h.bf16 %v1217_v34 }
  0x30   : > { %v710_v35 = vmax.f32 %v670_v29, %v1121_v24 }
  0x31   : > { %v711_v36 = vmax.f32 %v671_v30, %v1122_v25  ;;  %1219 = vst [vmem:[%s1382_s28 + $0x10] sm:$0xff] %v1184_v33  }
  0x32   : > { %v750_v39 = vmax.f32 %v710_v35, %v1137_v31 }
  0x33   : > { %v751_v40 = vmax.f32 %v711_v36, %v1138_v32 }
  0x34   : > { %v790_v43 = vmax.f32 %v750_v39, %v1153_v37 }
  0x35   : > { %v791_v44 = vmax.f32 %v751_v40, %v1154_v38 }
  0x36   : > { %v830_v45 = vmax.f32 %v790_v43, %v1169_v41 }
  0x37   : > { %v831_v46 = vmax.f32 %v791_v44, %v1170_v42 }
  0x39   : > { %v1189_v47 = vpack.c.bf16 %v831_v46, %v830_v45 }
  0x3b   : > { %1220 = vst [vmem:[%s1382_s28 + $0x18] sm:$0xff] %v1189_v47  }
  0x3c PF: > { %s19_s30 = sadd.s32 1, %s1235_s30  }
  0x3d   : > { %p16_p4 = scmp.ge.s32.totalorder %s19_s30, 4  }
  0x3f   :  { %18 = sbr.rel (!%p16_p4) target bundleno = 1 (0x1), region = 110 }

// kernel: forward.21
= control target key start
LH: loop header
LB: loop body
LE: loop exit
PB: predicated region body
PF: predicated region fallthrough
CT: control target
= control target key end

     0   :  { %s1232_s12 = smov 0   ;;  %s1422_s0 = inlined_call_operand.vmem [shape: bf16[512,256], index: 0, kind: input, shape index: {}]   ;;  %s1423_s1 = inlined_call_operand.vmem [shape: bf16[256,128], index: 1, kind: input, shape index: {}]   ;;  %s1424_s2 = inlined_call_operand.vmem [shape: f32[1,128], index: 2, kind: input, shape index: {}]   ;;  %s1425_s3 = inlined_call_operand.vmem [shape: bf16[512,128], index: 3, kind: output, shape index: {}]  }
   0x1 LB: > { %s831_s13 = sadd.s32 4294967295, %s1210_s12   ;;  %p835_p0 = scmp.ge.s32.totalorder %s1210_s12, 1  ;;  %s1210_s12 = sphi %s1232_s12, %s13_s12  }
   0x2   : > { %p139_p1 = scmp.lt.s32.totalorder %s1210_s12, 3 }
   0x4   : > { %p140_p2 = pnand %p835_p0, %p139_p1 }
   0x5   : > { %s836_s26 = sshll.u32 (!%p140_p2), %s831_s13, 5 }
   0x6   : > { %143 = sbr.rel (%p140_p2) target bundleno = 304 (0x130), region = 32  ;;  %p165_p3 = scmp.lt.s32.totalorder (!%p140_p2), %s836_s26, 63 }
   0xb   : > { %v1075_v0 = vld [vmem:[%s1423_s1 + $0x38] sm:$0xff]  ;;  %v1074_v2 = vld [vmem:[%s1423_s1 + $0x30] sm:$0xff]  ;;  %v1073_v4 = vld [vmem:[%s1423_s1 + $0x28] sm:$0xff]  ;;  %s1427_s26 = smov (!%p165_p3, %s836_s26), 63 }
   0xc   : > { %v1083_v1 = vld [vmem:[%s1423_s1 + $0x78] sm:$0xff]  ;;  %501 = vmatpush.bf16.msra.mxu0 %v1075_v0  ;;  %1179 = vmatpush.bf16.msra.mxu2 %v1075_v0  ;;  %v1082_v3 = vld [vmem:[%s1423_s1 + $0x70] sm:$0xff]  ;;  %v1081_v5 = vld [vmem:[%s1423_s1 + $0x68] sm:$0xff]  ;;  %s1035_s13 = sshll.u32 %s1427_s26, 3  ;;  %s840_s28 = sshll.u32 %s1427_s26, 2 }
   0xd   : > { %590 = vmatpush.bf16.msra.mxu1 %v1083_v1  ;;  %1187 = vmatpush.bf16.msra.mxu3 %v1083_v1  ;;  %v1072_v6 = vld [vmem:[%s1423_s1 + $0x20] sm:$0xff]  ;;  %v1071_v8 = vld [vmem:[%s1423_s1 + $0x18] sm:$0xff]  ;;  %v1070_v10 = vld [vmem:[%s1423_s1 + $0x10] sm:$0xff]  ;;  %s1285_s18 = scalar_lea.vmem %s1422_s0, %s1035_s13  ;;  %s1372_s4 = scalar_lea.vmem %s1425_s3, %s840_s28 }
   0xe   : > { %v1080_v7 = vld [vmem:[%s1423_s1 + $0x60] sm:$0xff]  ;;  %v1079_v9 = vld [vmem:[%s1423_s1 + $0x58] sm:$0xff]  ;;  %v1078_v11 = vld [vmem:[%s1423_s1 + $0x50] sm:$0xff] }
   0xf   : > { %v1069_v12 = vld [vmem:[%s1423_s1 + $0x8] sm:$0xff]  ;;  %v1068_v14 = vld [vmem:[%s1423_s1] sm:$0xff]  ;;  %v851_v28 = vld [vmem:[%s1285_s18 + $0x10] sm:$0xf] }
  0x10   : > { %502 = vmatpush.bf16.msra.mxu0 %v1074_v2  ;;  %1180 = vmatpush.bf16.msra.mxu2 %v1074_v2  ;;  %v1077_v13 = vld [vmem:[%s1423_s1 + $0x48] sm:$0xff]  ;;  %v1076_v15 = vld [vmem:[%s1423_s1 + $0x40] sm:$0xff]  ;;  %v1039_v29 = vld [vmem:[%s1285_s18 + $0x14] sm:$0xf0] }
  0x11   : > { %591 = vmatpush.bf16.msra.mxu1 %v1082_v3  ;;  %1188 = vmatpush.bf16.msra.mxu3 %v1082_v3  ;;  %v843_v16 = vld [vmem:[%s1285_s18] sm:$0xf]  ;;  %v1037_v17 = vld [vmem:[%s1285_s18 + $0x4] sm:$0xf0]  ;;  %v1036_v20 = vld [vmem:[%s1285_s18 + $0x4] sm:$0xf]  ;;  %v852_v36 = vor.u32 %v1039_v29, %v851_v28 }
  0x12   : > { %v907_v18 = vld [vmem:[%s1285_s18 + $0x80] sm:$0xf]  ;;  %v1053_v19 = vld [vmem:[%s1285_s18 + $0x84] sm:$0xf0]  ;;  %v845_v21 = vld [vmem:[%s1285_s18 + $0x8] sm:$0xf0]  ;;  %v844_v24 = vor.u32 %v1037_v17, %v843_v16 }
  0x13   : > { %v1052_v22 = vld [vmem:[%s1285_s18 + $0x84] sm:$0xf]  ;;  %v909_v23 = vld [vmem:[%s1285_s18 + $0x88] sm:$0xf0]  ;;  %v908_v25 = vor.u32 %v1053_v19, %v907_v18  ;;  %v848_v26 = vor.u32 %v1036_v20, %v845_v21  ;;  %v915_v30 = vld [vmem:[%s1285_s18 + $0x90] sm:$0xf] }
  0x14   : > { %503 = vmatpush.bf16.msra.mxu0 %v1073_v4  ;;  %1181 = vmatpush.bf16.msra.mxu2 %v1073_v4  ;;  %v912_v27 = vor.u32 %v1052_v22, %v909_v23  ;;  %v1055_v31 = vld [vmem:[%s1285_s18 + $0x94] sm:$0xf0]  ;;  %v1038_v32 = vld [vmem:[%s1285_s18 + $0x14] sm:$0xf]  ;;  %v853_v33 = vld [vmem:[%s1285_s18 + $0x18] sm:$0xf0] }
  0x15   : > { %592 = vmatpush.bf16.msra.mxu1 %v1081_v5  ;;  %1189 = vmatpush.bf16.msra.mxu3 %v1081_v5  ;;  %v1054_v34 = vld [vmem:[%s1285_s18 + $0x94] sm:$0xf]  ;;  %v917_v35 = vld [vmem:[%s1285_s18 + $0x98] sm:$0xf0]  ;;  %v916_v37 = vor.u32 %v1055_v31, %v915_v30  ;;  %v856_v38 = vor.u32 %v1038_v32, %v853_v33  ;;  %v859_v40 = vld [vmem:[%s1285_s18 + $0x20] sm:$0xf] }
  0x16   : > { %v920_v39 = vor.u32 %v1054_v34, %v917_v35  ;;  %v1041_v41 = vld [vmem:[%s1285_s18 + $0x24] sm:$0xf0]  ;;  %v923_v42 = vld [vmem:[%s1285_s18 + $0xa0] sm:$0xf]  ;;  %v1040_v44 = vld [vmem:[%s1285_s18 + $0x24] sm:$0xf] }
  0x17   : > { %v1057_v43 = vld [vmem:[%s1285_s18 + $0xa4] sm:$0xf0]  ;;  %v861_v45 = vld [vmem:[%s1285_s18 + $0x28] sm:$0xf0]  ;;  %v1056_v46 = vld [vmem:[%s1285_s18 + $0xa4] sm:$0xf]  ;;  %v860_v48 = vor.u32 %v1041_v41, %v859_v40 }
  0x18   : > { %504 = vmatpush.bf16.msra.mxu0 %v1072_v6  ;;  %1182 = vmatpush.bf16.msra.mxu2 %v1072_v6  ;;  %v925_v47 = vld [vmem:[%s1285_s18 + $0xa8] sm:$0xf0]  ;;  %v924_v49 = vor.u32 %v1057_v43, %v923_v42  ;;  %v864_v50 = vor.u32 %v1040_v44, %v861_v45  ;;  %v867_v52 = vld [vmem:[%s1285_s18 + $0x30] sm:$0xf]  ;;  %v1043_v53 = vld [vmem:[%s1285_s18 + $0x34] sm:$0xf0] }
  0x19   : > { %593 = vmatpush.bf16.msra.mxu1 %v1080_v7  ;;  %1190 = vmatpush.bf16.msra.mxu3 %v1080_v7  ;;  %v928_v51 = vor.u32 %v1056_v46, %v925_v47  ;;  %v931_v54 = vld [vmem:[%s1285_s18 + $0xb0] sm:$0xf]  ;;  %v1059_v55 = vld [vmem:[%s1285_s18 + $0xb4] sm:$0xf0]  ;;  %v1042_v56 = vld [vmem:[%s1285_s18 + $0x34] sm:$0xf]  ;;  %v868_v60 = vor.u32 %v1043_v53, %v867_v52 }
  0x1a   : > { %v869_v57 = vld [vmem:[%s1285_s18 + $0x38] sm:$0xf0]  ;;  %v1058_v58 = vld [vmem:[%s1285_s18 + $0xb4] sm:$0xf]  ;;  %v932_v61 = vor.u32 %v1059_v55, %v931_v54  ;;  %v875_v0 = vld [vmem:[%s1285_s18 + $0x40] sm:$0xf] }
  0x1b   : > { %v933_v59 = vld [vmem:[%s1285_s18 + $0xb8] sm:$0xf0]  ;;  %v872_v62 = vor.u32 %v1042_v56, %v869_v57  ;;  %v1045_v1 = vld [vmem:[%s1285_s18 + $0x44] sm:$0xf0]  ;;  %v939_v2 = vld [vmem:[%s1285_s18 + $0xc0] sm:$0xf] }
  0x1c   : > { %505 = vmatpush.bf16.msra.mxu0 %v1071_v8  ;;  %1183 = vmatpush.bf16.msra.mxu2 %v1071_v8  ;;  %v936_v63 = vor.u32 %v1058_v58, %v933_v59  ;;  %v1061_v3 = vld [vmem:[%s1285_s18 + $0xc4] sm:$0xf0]  ;;  %v1044_v4 = vld [vmem:[%s1285_s18 + $0x44] sm:$0xf]  ;;  %v877_v5 = vld [vmem:[%s1285_s18 + $0x48] sm:$0xf0]  ;;  %v876_v8 = vor.u32 %v1045_v1, %v875_v0 }
  0x1d   : > { %594 = vmatpush.bf16.msra.mxu1 %v1079_v9  ;;  %1191 = vmatpush.bf16.msra.mxu3 %v1079_v9  ;;  %v1060_v6 = vld [vmem:[%s1285_s18 + $0xc4] sm:$0xf]  ;;  %v941_v7 = vld [vmem:[%s1285_s18 + $0xc8] sm:$0xf0]  ;;  %v940_v9 = vor.u32 %v1061_v3, %v939_v2  ;;  %v1046_v16 = vld [vmem:[%s1285_s18 + $0x54] sm:$0xf] }
  0x1e   : > { %v885_v17 = vld [vmem:[%s1285_s18 + $0x58] sm:$0xf0]  ;;  %v1062_v18 = vld [vmem:[%s1285_s18 + $0xd4] sm:$0xf]  ;;  %v1048_v28 = vld [vmem:[%s1285_s18 + $0x64] sm:$0xf] }
  0x1f   : > { %v949_v19 = vld [vmem:[%s1285_s18 + $0xd8] sm:$0xf0]  ;;  %v888_v22 = vor.u32 %v1046_v16, %v885_v17  ;;  %v893_v29 = vld [vmem:[%s1285_s18 + $0x68] sm:$0xf0]  ;;  %v1064_v30 = vld [vmem:[%s1285_s18 + $0xe4] sm:$0xf] }
  0x20   : > { %506 = vmatpush.bf16.msra.mxu0 %v1070_v10  ;;  %1184 = vmatpush.bf16.msra.mxu2 %v1070_v10  ;;  %v880_v10 = vor.u32 %v1044_v4, %v877_v5  ;;  %v952_v23 = vor.u32 %v1062_v18, %v949_v19  ;;  %v957_v31 = vld [vmem:[%s1285_s18 + $0xe8] sm:$0xf0]  ;;  %v896_v34 = vor.u32 %v1048_v28, %v893_v29  ;;  %v1050_v40 = vld [vmem:[%s1285_s18 + $0x74] sm:$0xf]  ;;  %v901_v41 = vld [vmem:[%s1285_s18 + $0x78] sm:$0xf0] }
  0x21   : > { %595 = vmatpush.bf16.msra.mxu1 %v1078_v11  ;;  %1192 = vmatpush.bf16.msra.mxu3 %v1078_v11  ;;  %v944_v11 = vor.u32 %v1060_v6, %v941_v7  ;;  %v960_v35 = vor.u32 %v1064_v30, %v957_v31  ;;  %v1066_v42 = vld [vmem:[%s1285_s18 + $0xf4] sm:$0xf]  ;;  %v965_v43 = vld [vmem:[%s1285_s18 + $0xf8] sm:$0xf0]  ;;  %v904_v46 = vor.u32 %v1050_v40, %v901_v41 }
  0x22   : > { %v968_v47 = vor.u32 %v1066_v42, %v965_v43 }
  0x24   : > { %507 = vmatpush.bf16.msra.mxu0 %v1069_v12  ;;  %1185 = vmatpush.bf16.msra.mxu2 %v1069_v12  ;;  %v883_v12 = vld [vmem:[%s1285_s18 + $0x50] sm:$0xf] }
  0x25   : > { %596 = vmatpush.bf16.msra.mxu1 %v1077_v13  ;;  %1193 = vmatpush.bf16.msra.mxu3 %v1077_v13  ;;  %v1047_v13 = vld [vmem:[%s1285_s18 + $0x54] sm:$0xf0] }
  0x26   : > { %v884_v20 = vor.u32 %v1047_v13, %v883_v12 }
  0x28   : > { %508 = vmatpush.bf16.msra.mxu0 %v1068_v14  ;;  %1186 = vmatpush.bf16.msra.mxu2 %v1068_v14  ;;  %v947_v14 = vld [vmem:[%s1285_s18 + $0xd0] sm:$0xf] }
  0x29   : > { %597 = vmatpush.bf16.msra.mxu1 %v1076_v15  ;;  %1194 = vmatpush.bf16.msra.mxu3 %v1076_v15  ;;  %v1063_v15 = vld [vmem:[%s1285_s18 + $0xd4] sm:$0xf0] }
  0x2a   : > { %v948_v21 = vor.u32 %v1063_v15, %v947_v14 }
  0x2b   : > { %509 = vmatmul.bf16.vlgmr.msra.gmra.mxu0 %v844_v24  ;;  %549 = vmatmul.bf16.vlgmr.msra.gmra.mxu2 %v908_v25  ;;  %v891_v24 = vld [vmem:[%s1285_s18 + $0x60] sm:$0xf]  ;;  %v1049_v25 = vld [vmem:[%s1285_s18 + $0x64] sm:$0xf0] }
  0x2c   : > { %598 = vmatmul.bf16.vlgmr.msra.gmra.mxu1 %v848_v26  ;;  %638 = vmatmul.bf16.vlgmr.msra.gmra.mxu3 %v912_v27  ;;  %v955_v26 = vld [vmem:[%s1285_s18 + $0xe0] sm:$0xf]  ;;  %v1065_v27 = vld [vmem:[%s1285_s18 + $0xe4] sm:$0xf0]  ;;  %v892_v32 = vor.u32 %v1049_v25, %v891_v24 }
  0x2d   : > { %v956_v33 = vor.u32 %v1065_v27, %v955_v26 }
  0x3b   : > { %514 = vmatmul.bf16.gmra.mxu0 %v852_v36  ;;  %554 = vmatmul.bf16.gmra.mxu2 %v916_v37  ;;  %v899_v36 = vld [vmem:[%s1285_s18 + $0x70] sm:$0xf]  ;;  %v1051_v37 = vld [vmem:[%s1285_s18 + $0x74] sm:$0xf0] }
  0x3c   : > { %603 = vmatmul.bf16.gmra.mxu1 %v856_v38  ;;  %643 = vmatmul.bf16.gmra.mxu3 %v920_v39  ;;  %v963_v38 = vld [vmem:[%s1285_s18 + $0xf0] sm:$0xf]  ;;  %v1067_v39 = vld [vmem:[%s1285_s18 + $0xf4] sm:$0xf0]  ;;  %v900_v44 = vor.u32 %v1051_v37, %v899_v36 }
  0x3d   : > { %v964_v45 = vor.u32 %v1067_v39, %v963_v38 }
  0x4b   : > { %519 = vmatmul.bf16.gmra.mxu0 %v860_v48  ;;  %559 = vmatmul.bf16.gmra.mxu2 %v924_v49  ;;  %v1363_v49 = vld [vmem:[%s1424_s2] ss:$0 sm:$0xff] }
  0x4c   : > { %608 = vmatmul.bf16.gmra.mxu1 %v864_v50  ;;  %648 = vmatmul.bf16.gmra.mxu3 %v928_v51 }
  0x5b   : > { %524 = vmatmul.bf16.gmra.mxu0 %v868_v60  ;;  %564 = vmatmul.bf16.gmra.mxu2 %v932_v61 }
  0x5c   : > { %613 = vmatmul.bf16.gmra.mxu1 %v872_v62  ;;  %653 = vmatmul.bf16.gmra.mxu3 %v936_v63 }
  0x6b   : > { %529 = vmatmul.bf16.gmra.mxu0 %v876_v8  ;;  %569 = vmatmul.bf16.gmra.mxu2 %v940_v9 }
  0x6c   : > { %618 = vmatmul.bf16.gmra.mxu1 %v880_v10  ;;  %658 = vmatmul.bf16.gmra.mxu3 %v944_v11 }
  0x7b   : > { %534 = vmatmul.bf16.gmra.mxu0 %v884_v20  ;;  %574 = vmatmul.bf16.gmra.mxu2 %v948_v21 }
  0x7c   : > { %623 = vmatmul.bf16.gmra.mxu1 %v888_v22  ;;  %663 = vmatmul.bf16.gmra.mxu3 %v952_v23 }
  0x8b   : > { %539 = vmatmul.bf16.gmra.mxu0 %v892_v32  ;;  %579 = vmatmul.bf16.gmra.mxu2 %v956_v33 }
  0x8c   : > { %628 = vmatmul.bf16.gmra.mxu1 %v896_v34  ;;  %668 = vmatmul.bf16.gmra.mxu3 %v960_v35 }
  0x9b   : > { %544 = vmatmul.bf16.gmra.mxu0 %v900_v44  ;;  %584 = vmatmul.bf16.gmra.mxu2 %v964_v45 }
  0x9c   : > { %633 = vmatmul.bf16.gmra.mxu1 %v904_v46  ;;  %673 = vmatmul.bf16.gmra.mxu3 %v968_v47 }
  0xa8   : > { %v510_v48 = vpop.f32.mrf.mxu0 }
  0xa9   : > { %v599_v50 = vpop.f32.mrf.mxu1  ;;  %v511_v51 = vadd.f32 %v1363_v49, %v510_v48 }
  0xab   : > { %v600_v55 = vadd.f32 %v599_v50, %v511_v51 }
  0xad   : > { %v679_v60 = vmax.f32 %v600_v55, 0.0 }
  0xae   : > { %v550_v52 = vpop.f32.mrf.mxu2 }
  0xaf   : > { %v639_v53 = vpop.f32.mrf.mxu3  ;;  %v551_v58 = vadd.f32 %v1363_v49, %v550_v52 }
  0xb0   : > { %v512_v54 = vpop.f32.mrf.mxu0 }
  0xb1   : > { %v513_v56 = vadd.f32 %v1363_v49, %v512_v54  ;;  %v601_v57 = vpop.f32.mrf.mxu1  ;;  %v640_v63 = vadd.f32 %v639_v53, %v551_v58 }
  0xb3   : > { %v602_v59 = vadd.f32 %v601_v57, %v513_v56  ;;  %v695_v6 = vmax.f32 %v640_v63, 0.0 }
  0xb5   : > { %v680_v61 = vmax.f32 %v602_v59, 0.0 }
  0xb6   : > { %v552_v62 = vpop.f32.mrf.mxu2 }
  0xb7   : > { %v1087_v0 = vpack.c.bf16 %v680_v61, %v679_v60  ;;  %v553_v1 = vadd.f32 %v1363_v49, %v552_v62  ;;  %v641_v2 = vpop.f32.mrf.mxu3 }
  0xb8   : > { %v515_v3 = vpop.f32.mrf.mxu0 }
  0xb9   : > { %1088 = vst [vmem:[%s1372_s4] sm:$0xff] %v1087_v0   ;;  %v642_v4 = vadd.f32 %v641_v2, %v553_v1  ;;  %v604_v5 = vpop.f32.mrf.mxu1  ;;  %v516_v9 = vadd.f32 %v1363_v49, %v515_v3 }
  0xbb   : > { %v696_v7 = vmax.f32 %v642_v4, 0.0  ;;  %v605_v13 = vadd.f32 %v604_v5, %v516_v9 }
  0xbd   : > { %v1127_v8 = vpack.c.bf16 %v696_v7, %v695_v6  ;;  %v681_v18 = vmax.f32 %v605_v13, 0.0 }
  0xbe   : > { %v555_v10 = vpop.f32.mrf.mxu2 }
  0xbf   : > { %1171 = vst [vmem:[%s1372_s4 + $0x40] sm:$0xff] %v1127_v8   ;;  %v644_v11 = vpop.f32.mrf.mxu3  ;;  %v556_v16 = vadd.f32 %v1363_v49, %v555_v10 }
  0xc0   : > { %v517_v12 = vpop.f32.mrf.mxu0 }
  0xc1   : > { %v518_v14 = vadd.f32 %v1363_v49, %v517_v12  ;;  %v606_v15 = vpop.f32.mrf.mxu1  ;;  %v645_v21 = vadd.f32 %v644_v11, %v556_v16 }
  0xc3   : > { %v607_v17 = vadd.f32 %v606_v15, %v518_v14  ;;  %v697_v28 = vmax.f32 %v645_v21, 0.0 }
  0xc5   : > { %v682_v19 = vmax.f32 %v607_v17, 0.0 }
  0xc6   : > { %v557_v20 = vpop.f32.mrf.mxu2 }
  0xc7   : > { %v1092_v22 = vpack.c.bf16 %v682_v19, %v681_v18  ;;  %v558_v23 = vadd.f32 %v1363_v49, %v557_v20  ;;  %v646_v24 = vpop.f32.mrf.mxu3 }
  0xc8   : > { %v520_v25 = vpop.f32.mrf.mxu0 }
  0xc9   : > { %1164 = vst [vmem:[%s1372_s4 + $0x8] sm:$0xff] %v1092_v22   ;;  %v647_v26 = vadd.f32 %v646_v24, %v558_v23  ;;  %v609_v27 = vpop.f32.mrf.mxu1  ;;  %v521_v31 = vadd.f32 %v1363_v49, %v520_v25 }
  0xcb   : > { %v698_v29 = vmax.f32 %v647_v26, 0.0  ;;  %v610_v35 = vadd.f32 %v609_v27, %v521_v31 }
  0xcd   : > { %v1132_v30 = vpack.c.bf16 %v698_v29, %v697_v28  ;;  %v683_v40 = vmax.f32 %v610_v35, 0.0 }
  0xce   : > { %v560_v32 = vpop.f32.mrf.mxu2 }
  0xcf   : > { %1172 = vst [vmem:[%s1372_s4 + $0x48] sm:$0xff] %v1132_v30   ;;  %v649_v33 = vpop.f32.mrf.mxu3  ;;  %v561_v38 = vadd.f32 %v1363_v49, %v560_v32 }
  0xd0   : > { %v522_v34 = vpop.f32.mrf.mxu0 }
  0xd1   : > { %v523_v36 = vadd.f32 %v1363_v49, %v522_v34  ;;  %v611_v37 = vpop.f32.mrf.mxu1  ;;  %v650_v43 = vadd.f32 %v649_v33, %v561_v38 }
  0xd3   : > { %v612_v39 = vadd.f32 %v611_v37, %v523_v36  ;;  %v699_v51 = vmax.f32 %v650_v43, 0.0 }
  0xd5   : > { %v684_v41 = vmax.f32 %v612_v39, 0.0 }
  0xd6   : > { %v562_v42 = vpop.f32.mrf.mxu2 }
  0xd7   : > { %v1097_v44 = vpack.c.bf16 %v684_v41, %v683_v40  ;;  %v563_v45 = vadd.f32 %v1363_v49, %v562_v42  ;;  %v651_v46 = vpop.f32.mrf.mxu3 }
  0xd8   : > { %v525_v47 = vpop.f32.mrf.mxu0 }
  0xd9   : > { %1165 = vst [vmem:[%s1372_s4 + $0x10] sm:$0xff] %v1097_v44   ;;  %v652_v48 = vadd.f32 %v651_v46, %v563_v45  ;;  %v614_v50 = vpop.f32.mrf.mxu1  ;;  %v526_v54 = vadd.f32 %v1363_v49, %v525_v47 }
  0xdb   : > { %v700_v52 = vmax.f32 %v652_v48, 0.0  ;;  %v615_v58 = vadd.f32 %v614_v50, %v526_v54 }
  0xdd   : > { %v1137_v53 = vpack.c.bf16 %v700_v52, %v699_v51  ;;  %v685_v63 = vmax.f32 %v615_v58, 0.0 }
  0xde   : > { %v565_v55 = vpop.f32.mrf.mxu2 }
  0xdf   : > { %1173 = vst [vmem:[%s1372_s4 + $0x50] sm:$0xff] %v1137_v53   ;;  %v654_v56 = vpop.f32.mrf.mxu3  ;;  %v566_v61 = vadd.f32 %v1363_v49, %v565_v55 }
  0xe0   : > { %v527_v57 = vpop.f32.mrf.mxu0 }
  0xe1   : > { %v528_v59 = vadd.f32 %v1363_v49, %v527_v57  ;;  %v616_v60 = vpop.f32.mrf.mxu1  ;;  %v655_v2 = vadd.f32 %v654_v56, %v566_v61 }
  0xe3   : > { %v617_v62 = vadd.f32 %v616_v60, %v528_v59  ;;  %v701_v9 = vmax.f32 %v655_v2, 0.0 }
  0xe5   : > { %v686_v0 = vmax.f32 %v617_v62, 0.0 }
  0xe6   : > { %v567_v1 = vpop.f32.mrf.mxu2 }
  0xe7   : > { %v1102_v3 = vpack.c.bf16 %v686_v0, %v685_v63  ;;  %v568_v4 = vadd.f32 %v1363_v49, %v567_v1  ;;  %v656_v5 = vpop.f32.mrf.mxu3 }
  0xe8   : > { %v530_v6 = vpop.f32.mrf.mxu0 }
  0xe9   : > { %1166 = vst [vmem:[%s1372_s4 + $0x18] sm:$0xff] %v1102_v3   ;;  %v657_v7 = vadd.f32 %v656_v5, %v568_v4  ;;  %v619_v8 = vpop.f32.mrf.mxu1  ;;  %v531_v12 = vadd.f32 %v1363_v49, %v530_v6 }
  0xeb   : > { %v702_v10 = vmax.f32 %v657_v7, 0.0  ;;  %v620_v16 = vadd.f32 %v619_v8, %v531_v12 }
  0xed   : > { %v1142_v11 = vpack.c.bf16 %v702_v10, %v701_v9  ;;  %v687_v21 = vmax.f32 %v620_v16, 0.0 }
  0xee   : > { %v570_v13 = vpop.f32.mrf.mxu2 }
  0xef   : > { %1174 = vst [vmem:[%s1372_s4 + $0x58] sm:$0xff] %v1142_v11   ;;  %v659_v14 = vpop.f32.mrf.mxu3  ;;  %v571_v19 = vadd.f32 %v1363_v49, %v570_v13 }
  0xf0   : > { %v532_v15 = vpop.f32.mrf.mxu0 }
  0xf1   : > { %v533_v17 = vadd.f32 %v1363_v49, %v532_v15  ;;  %v621_v18 = vpop.f32.mrf.mxu1  ;;  %v660_v24 = vadd.f32 %v659_v14, %v571_v19 }
  0xf3   : > { %v622_v20 = vadd.f32 %v621_v18, %v533_v17  ;;  %v703_v31 = vmax.f32 %v660_v24, 0.0 }
  0xf5   : > { %v688_v22 = vmax.f32 %v622_v20, 0.0 }
  0xf6   : > { %v572_v23 = vpop.f32.mrf.mxu2 }
  0xf7   : > { %v1107_v25 = vpack.c.bf16 %v688_v22, %v687_v21  ;;  %v573_v26 = vadd.f32 %v1363_v49, %v572_v23  ;;  %v661_v27 = vpop.f32.mrf.mxu3 }
  0xf8   : > { %v535_v28 = vpop.f32.mrf.mxu0 }
  0xf9   : > { %1167 = vst [vmem:[%s1372_s4 + $0x20] sm:$0xff] %v1107_v25   ;;  %v662_v29 = vadd.f32 %v661_v27, %v573_v26  ;;  %v624_v30 = vpop.f32.mrf.mxu1  ;;  %v536_v34 = vadd.f32 %v1363_v49, %v535_v28 }
  0xfb   : > { %v704_v32 = vmax.f32 %v662_v29, 0.0  ;;  %v625_v38 = vadd.f32 %v624_v30, %v536_v34 }
  0xfd   : > { %v1147_v33 = vpack.c.bf16 %v704_v32, %v703_v31  ;;  %v689_v43 = vmax.f32 %v625_v38, 0.0 }
  0xfe   : > { %v575_v35 = vpop.f32.mrf.mxu2 }
  0xff   : > { %1175 = vst [vmem:[%s1372_s4 + $0x60] sm:$0xff] %v1147_v33   ;;  %v664_v36 = vpop.f32.mrf.mxu3  ;;  %v576_v41 = vadd.f32 %v1363_v49, %v575_v35 }
 0x100   : > { %v537_v37 = vpop.f32.mrf.mxu0 }
 0x101   : > { %v538_v39 = vadd.f32 %v1363_v49, %v537_v37  ;;  %v626_v40 = vpop.f32.mrf.mxu1  ;;  %v665_v46 = vadd.f32 %v664_v36, %v576_v41 }
 0x103   : > { %v627_v42 = vadd.f32 %v626_v40, %v538_v39  ;;  %v705_v54 = vmax.f32 %v665_v46, 0.0 }
 0x105   : > { %v690_v44 = vmax.f32 %v627_v42, 0.0 }
 0x106   : > { %v577_v45 = vpop.f32.mrf.mxu2 }
 0x107   : > { %v1112_v47 = vpack.c.bf16 %v690_v44, %v689_v43  ;;  %v578_v48 = vadd.f32 %v1363_v49, %v577_v45  ;;  %v666_v50 = vpop.f32.mrf.mxu3 }
 0x108   : > { %v540_v51 = vpop.f32.mrf.mxu0 }
 0x109   : > { %1168 = vst [vmem:[%s1372_s4 + $0x28] sm:$0xff] %v1112_v47   ;;  %v667_v52 = vadd.f32 %v666_v50, %v578_v48  ;;  %v629_v53 = vpop.f32.mrf.mxu1  ;;  %v541_v57 = vadd.f32 %v1363_v49, %v540_v51 }
 0x10b   : > { %v706_v55 = vmax.f32 %v667_v52, 0.0  ;;  %v630_v61 = vadd.f32 %v629_v53, %v541_v57 }
 0x10d   : > { %v1152_v56 = vpack.c.bf16 %v706_v55, %v705_v54  ;;  %v691_v2 = vmax.f32 %v630_v61, 0.0 }
 0x10e   : > { %v580_v58 = vpop.f32.mrf.mxu2 }
 0x10f   : > { %1176 = vst [vmem:[%s1372_s4 + $0x68] sm:$0xff] %v1152_v56   ;;  %v669_v59 = vpop.f32.mrf.mxu3  ;;  %v581_v0 = vadd.f32 %v1363_v49, %v580_v58 }
 0x110   : > { %v542_v60 = vpop.f32.mrf.mxu0 }
 0x111   : > { %v543_v62 = vadd.f32 %v1363_v49, %v542_v60  ;;  %v631_v63 = vpop.f32.mrf.mxu1  ;;  %v670_v5 = vadd.f32 %v669_v59, %v581_v0 }
 0x113   : > { %v632_v1 = vadd.f32 %v631_v63, %v543_v62  ;;  %v707_v12 = vmax.f32 %v670_v5, 0.0 }
 0x115   : > { %v692_v3 = vmax.f32 %v632_v1, 0.0 }
 0x116   : > { %v582_v4 = vpop.f32.mrf.mxu2 }
 0x117   : > { %v1117_v6 = vpack.c.bf16 %v692_v3, %v691_v2  ;;  %v583_v7 = vadd.f32 %v1363_v49, %v582_v4  ;;  %v671_v8 = vpop.f32.mrf.mxu3 }
 0x118   : > { %v545_v9 = vpop.f32.mrf.mxu0 }
 0x119   : > { %1169 = vst [vmem:[%s1372_s4 + $0x30] sm:$0xff] %v1117_v6   ;;  %v672_v10 = vadd.f32 %v671_v8, %v583_v7  ;;  %v634_v11 = vpop.f32.mrf.mxu1  ;;  %v546_v15 = vadd.f32 %v1363_v49, %v545_v9 }
 0x11b   : > { %v708_v13 = vmax.f32 %v672_v10, 0.0  ;;  %v635_v19 = vadd.f32 %v634_v11, %v546_v15 }
 0x11d   : > { %v1157_v14 = vpack.c.bf16 %v708_v13, %v707_v12  ;;  %v693_v24 = vmax.f32 %v635_v19, 0.0 }
 0x11e   : > { %v585_v16 = vpop.f32.mrf.mxu2 }
 0x11f   : > { %1177 = vst [vmem:[%s1372_s4 + $0x70] sm:$0xff] %v1157_v14   ;;  %v674_v17 = vpop.f32.mrf.mxu3  ;;  %v586_v22 = vadd.f32 %v1363_v49, %v585_v16 }
 0x120   : > { %v547_v18 = vpop.f32.mrf.mxu0 }
 0x121   : > { %v548_v20 = vadd.f32 %v1363_v49, %v547_v18  ;;  %v636_v21 = vpop.f32.mrf.mxu1  ;;  %v675_v27 = vadd.f32 %v674_v17, %v586_v22 }
 0x123   : > { %v637_v23 = vadd.f32 %v636_v21, %v548_v20  ;;  %v709_v32 = vmax.f32 %v675_v27, 0.0 }
 0x125   : > { %v694_v25 = vmax.f32 %v637_v23, 0.0 }
 0x126   : > { %v587_v26 = vpop.f32.mrf.mxu2 }
 0x127   : > { %v1122_v28 = vpack.c.bf16 %v694_v25, %v693_v24  ;;  %v588_v29 = vadd.f32 %v1363_v49, %v587_v26  ;;  %v676_v30 = vpop.f32.mrf.mxu3 }
 0x129   : > { %1170 = vst [vmem:[%s1372_s4 + $0x38] sm:$0xff] %v1122_v28   ;;  %v677_v31 = vadd.f32 %v676_v30, %v588_v29 }
 0x12b   : > { %v710_v33 = vmax.f32 %v677_v31, 0.0 }
 0x12d   : > { %v1162_v34 = vpack.c.bf16 %v710_v33, %v709_v32 }
 0x12f   : > { %1178 = vst [vmem:[%s1372_s4 + $0x78] sm:$0xff] %v1162_v34  }
 0x130 PF: > { %s13_s12 = sadd.s32 1, %s1210_s12  }
 0x131   : > { %p10_p4 = scmp.ge.s32.totalorder %s13_s12, 4  }
 0x133   :  { %12 = sbr.rel (!%p10_p4) target bundleno = 1 (0x1), region = 62 }

// kernel: forward.23
= control target key start
LH: loop header
LB: loop body
LE: loop exit
PB: predicated region body
PF: predicated region fallthrough
CT: control target
= control target key end

     0   :  { %s538_s12 = smov 0   ;;  %s589_s0 = inlined_call_operand.vmem [shape: bf16[128,128], index: 0, kind: input, shape index: {}]   ;;  %s590_s1 = inlined_call_operand.vmem [shape: bf16[128,128], index: 1, kind: input, shape index: {}]   ;;  %s591_s2 = inlined_call_operand.vmem [shape: f32[1,128], index: 2, kind: input, shape index: {}]   ;;  %s592_s3 = inlined_call_operand.vmem [shape: bf16[128,128], index: 3, kind: output, shape index: {}]  }
   0x1 LB: > { %s383_s13 = sadd.s32 4294967295, %s516_s12   ;;  %p387_p0 = scmp.ge.s32.totalorder %s516_s12, 1  ;;  %s516_s12 = sphi %s538_s12, %s13_s12  }
   0x2   : > { %p138_p1 = scmp.lt.s32.totalorder %s516_s12, 3 }
   0x4   : > { %p139_p2 = pnand %p387_p0, %p138_p1 }
   0x5   : > { %s388_s22 = sshll.u32 (!%p139_p2), %s383_s13, 3 }
   0x6   : > { %142 = sbr.rel (%p139_p2) target bundleno = 192 (0xc0), region = 32  ;;  %p163_p3 = scmp.lt.s32.totalorder (!%p139_p2), %s388_s22, 15 }
   0xb   : > { %v453_v0 = vld [vmem:[%s590_s1 + $0x38] sm:$0xff]  ;;  %v452_v1 = vld [vmem:[%s590_s1 + $0x30] sm:$0xff]  ;;  %v451_v2 = vld [vmem:[%s590_s1 + $0x28] sm:$0xff]  ;;  %s594_s22 = smov (!%p163_p3, %s388_s22), 15 }
   0xc   : > { %274 = vmatpush.bf16.msra.mxu0 %v453_v0  ;;  %477 = vmatpush.bf16.msra.mxu1 %v453_v0  ;;  %v450_v3 = vld [vmem:[%s590_s1 + $0x20] sm:$0xff]  ;;  %v449_v4 = vld [vmem:[%s590_s1 + $0x18] sm:$0xff]  ;;  %v448_v5 = vld [vmem:[%s590_s1 + $0x10] sm:$0xff]  ;;  %s389_s29 = sshll.u32 %s594_s22, 2 }
   0xd   : > { %478 = vmatpush.bf16.msra.mxu2 %v453_v0  ;;  %479 = vmatpush.bf16.msra.mxu3 %v453_v0  ;;  %v447_v6 = vld [vmem:[%s590_s1 + $0x8] sm:$0xff]  ;;  %v446_v7 = vld [vmem:[%s590_s1] sm:$0xff]  ;;  %s166_s7 = scalar_lea.vmem %s589_s0, %s389_s29  ;;  %s172_s13 = scalar_lea.vmem %s592_s3, %s389_s29 }
   0xe   : > { %v442_v8 = vld [vmem:[%s166_s7] sm:$0xff]  ;;  %v443_v9 = vld [vmem:[%s166_s7 + $0x8] sm:$0xff]  ;;  %v444_v10 = vld [vmem:[%s166_s7 + $0x10] sm:$0xff] }
   0xf   : > { %v445_v11 = vld [vmem:[%s166_s7 + $0x18] sm:$0xff]  ;;  %v509_v14 = vld [vmem:[%s591_s2] ss:$0 sm:$0xff] }
  0x10   : > { %275 = vmatpush.bf16.msra.mxu0 %v452_v1  ;;  %480 = vmatpush.bf16.msra.mxu1 %v452_v1 }
  0x11   : > { %481 = vmatpush.bf16.msra.mxu2 %v452_v1  ;;  %482 = vmatpush.bf16.msra.mxu3 %v452_v1 }
  0x14   : > { %276 = vmatpush.bf16.msra.mxu0 %v451_v2  ;;  %483 = vmatpush.bf16.msra.mxu1 %v451_v2 }
  0x15   : > { %484 = vmatpush.bf16.msra.mxu2 %v451_v2  ;;  %485 = vmatpush.bf16.msra.mxu3 %v451_v2 }
  0x18   : > { %277 = vmatpush.bf16.msra.mxu0 %v450_v3  ;;  %486 = vmatpush.bf16.msra.mxu1 %v450_v3 }
  0x19   : > { %487 = vmatpush.bf16.msra.mxu2 %v450_v3  ;;  %488 = vmatpush.bf16.msra.mxu3 %v450_v3 }
  0x1c   : > { %278 = vmatpush.bf16.msra.mxu0 %v449_v4  ;;  %489 = vmatpush.bf16.msra.mxu1 %v449_v4 }
  0x1d   : > { %490 = vmatpush.bf16.msra.mxu2 %v449_v4  ;;  %491 = vmatpush.bf16.msra.mxu3 %v449_v4 }
  0x20   : > { %279 = vmatpush.bf16.msra.mxu0 %v448_v5  ;;  %492 = vmatpush.bf16.msra.mxu1 %v448_v5 }
  0x21   : > { %493 = vmatpush.bf16.msra.mxu2 %v448_v5  ;;  %494 = vmatpush.bf16.msra.mxu3 %v448_v5 }
  0x24   : > { %280 = vmatpush.bf16.msra.mxu0 %v447_v6  ;;  %495 = vmatpush.bf16.msra.mxu1 %v447_v6 }
  0x25   : > { %496 = vmatpush.bf16.msra.mxu2 %v447_v6  ;;  %497 = vmatpush.bf16.msra.mxu3 %v447_v6 }
  0x28   : > { %281 = vmatpush.bf16.msra.mxu0 %v446_v7  ;;  %498 = vmatpush.bf16.msra.mxu1 %v446_v7 }
  0x29   : > { %499 = vmatpush.bf16.msra.mxu2 %v446_v7  ;;  %500 = vmatpush.bf16.msra.mxu3 %v446_v7 }
  0x2b   : > { %282 = vmatmul.bf16.vlgmr.msra.gmra.mxu0 %v442_v8  ;;  %287 = vmatmul.bf16.vlgmr.msra.gmra.mxu1 %v443_v9 }
  0x2c   : > { %292 = vmatmul.bf16.vlgmr.msra.gmra.mxu2 %v444_v10  ;;  %297 = vmatmul.bf16.vlgmr.msra.gmra.mxu3 %v445_v11 }
  0xa8   : > { %v283_v12 = vpop.f32.mrf.mxu0  ;;  %v288_v13 = vpop.f32.mrf.mxu1 }
  0xa9   : > { %v284_v15 = vadd.f32 %v509_v14, %v283_v12  ;;  %v289_v16 = vadd.f32 %v509_v14, %v288_v13 }
  0xab   : > { %v303_v23 = vmax.f32 %v284_v15, 0.0  ;;  %v305_v24 = vmax.f32 %v289_v16, 0.0 }
  0xaf   : > { %v293_v17 = vpop.f32.mrf.mxu2  ;;  %v298_v18 = vpop.f32.mrf.mxu3 }
  0xb0   : > { %v285_v19 = vpop.f32.mrf.mxu0  ;;  %v290_v20 = vpop.f32.mrf.mxu1  ;;  %v294_v29 = vadd.f32 %v509_v14, %v293_v17  ;;  %v299_v30 = vadd.f32 %v509_v14, %v298_v18 }
  0xb1   : > { %v286_v21 = vadd.f32 %v509_v14, %v285_v19  ;;  %v291_v22 = vadd.f32 %v509_v14, %v290_v20 }
  0xb2   : > { %v307_v35 = vmax.f32 %v294_v29, 0.0  ;;  %v309_v36 = vmax.f32 %v299_v30, 0.0 }
  0xb3   : > { %v304_v25 = vmax.f32 %v286_v21, 0.0  ;;  %v306_v26 = vmax.f32 %v291_v22, 0.0 }
  0xb5   : > { %v457_v27 = vpack.c.bf16 %v304_v25, %v303_v23  ;;  %v462_v28 = vpack.c.bf16 %v306_v26, %v305_v24 }
  0xb7   : > { %458 = vst [vmem:[%s172_s13] sm:$0xff] %v457_v27   ;;  %v295_v31 = vpop.f32.mrf.mxu2  ;;  %v300_v32 = vpop.f32.mrf.mxu3 }
  0xb8   : > { %474 = vst [vmem:[%s172_s13 + $0x8] sm:$0xff] %v462_v28   ;;  %v296_v33 = vadd.f32 %v509_v14, %v295_v31  ;;  %v301_v34 = vadd.f32 %v509_v14, %v300_v32 }
  0xba   : > { %v308_v37 = vmax.f32 %v296_v33, 0.0  ;;  %v310_v38 = vmax.f32 %v301_v34, 0.0 }
  0xbc   : > { %v467_v39 = vpack.c.bf16 %v308_v37, %v307_v35  ;;  %v472_v40 = vpack.c.bf16 %v310_v38, %v309_v36 }
  0xbe   : > { %475 = vst [vmem:[%s172_s13 + $0x10] sm:$0xff] %v467_v39  }
  0xbf   : > { %476 = vst [vmem:[%s172_s13 + $0x18] sm:$0xff] %v472_v40  }
  0xc0 PF: > { %s13_s12 = sadd.s32 1, %s516_s12  }
  0xc1   : > { %p10_p4 = scmp.ge.s32.totalorder %s13_s12, 4  }
  0xc3   :  { %12 = sbr.rel (!%p10_p4) target bundleno = 1 (0x1), region = 62 }

// kernel: forward.24
= control target key start
LH: loop header
LB: loop body
LE: loop exit
PB: predicated region body
PF: predicated region fallthrough
CT: control target
= control target key end

     0   :  { %s649_s15 = smov 0   ;;  %s701_s0 = inlined_call_operand.vmem [shape: bf16[128,128], index: 0, kind: input, shape index: {}]   ;;  %s702_s1 = inlined_call_operand.vmem [shape: bf16[128,128], index: 1, kind: input, shape index: {}]   ;;  %s703_s2 = inlined_call_operand.vmem [shape: f32[1,128], index: 2, kind: input, shape index: {}]   ;;  %s704_s3 = inlined_call_operand.vmem [shape: bf16[128,128], index: 3, kind: input, shape index: {}]   ;;  %s705_s4 = inlined_call_operand.vmem [shape: bf16[128,128], index: 4, kind: output, shape index: {}]  }
   0x1 LB: > { %s468_s16 = sadd.s32 4294967295, %s622_s15   ;;  %p472_p0 = scmp.ge.s32.totalorder %s622_s15, 1  ;;  %s622_s15 = sphi %s649_s15, %s14_s15  }
   0x2   : > { %p174_p1 = scmp.lt.s32.totalorder %s622_s15, 3 }
   0x4   : > { %p175_p2 = pnand %p472_p0, %p174_p1 }
   0x5   : > { %s473_s25 = sshll.u32 (!%p175_p2), %s468_s16, 3 }
   0x6   : > { %178 = sbr.rel (%p175_p2) target bundleno = 194 (0xc2), region = 36  ;;  %p206_p3 = scmp.lt.s32.totalorder (!%p175_p2), %s473_s25, 15 }
   0xb   : > { %v540_v0 = vld [vmem:[%s702_s1 + $0x38] sm:$0xff]  ;;  %v539_v1 = vld [vmem:[%s702_s1 + $0x30] sm:$0xff]  ;;  %v538_v2 = vld [vmem:[%s702_s1 + $0x28] sm:$0xff]  ;;  %s707_s25 = smov (!%p206_p3, %s473_s25), 15 }
   0xc   : > { %323 = vmatpush.bf16.msra.mxu0 %v540_v0  ;;  %583 = vmatpush.bf16.msra.mxu1 %v540_v0  ;;  %v537_v3 = vld [vmem:[%s702_s1 + $0x20] sm:$0xff]  ;;  %v536_v4 = vld [vmem:[%s702_s1 + $0x18] sm:$0xff]  ;;  %v535_v5 = vld [vmem:[%s702_s1 + $0x10] sm:$0xff]  ;;  %s678_s6 = sshll.u32 %s707_s25, 2 }
   0xd   : > { %584 = vmatpush.bf16.msra.mxu2 %v540_v0  ;;  %585 = vmatpush.bf16.msra.mxu3 %v540_v0  ;;  %v534_v6 = vld [vmem:[%s702_s1 + $0x8] sm:$0xff]  ;;  %v533_v7 = vld [vmem:[%s702_s1] sm:$0xff]  ;;  %s209_s11 = scalar_lea.vmem %s701_s0, %s678_s6  ;;  %s215_s14 = scalar_lea.vmem %s704_s3, %s678_s6 }
   0xe   : > { %v529_v8 = vld [vmem:[%s209_s11] sm:$0xff]  ;;  %v530_v9 = vld [vmem:[%s209_s11 + $0x8] sm:$0xff]  ;;  %v531_v10 = vld [vmem:[%s209_s11 + $0x10] sm:$0xff]  ;;  %s221_s20 = scalar_lea.vmem %s705_s4, %s678_s6 }
   0xf   : > { %v532_v11 = vld [vmem:[%s209_s11 + $0x18] sm:$0xff]  ;;  %v615_v14 = vld [vmem:[%s703_s2] ss:$0 sm:$0xff]  ;;  %v577_v16 = vld [vmem:[%s215_s14 + $0x8] sm:$0xff]  }
  0x10   : > { %324 = vmatpush.bf16.msra.mxu0 %v539_v1  ;;  %586 = vmatpush.bf16.msra.mxu1 %v539_v1  ;;  %v542_v15 = vld [vmem:[%s215_s14] sm:$0xff]   ;;  %v547_v20 = vunpack.c.l.bf16 %v577_v16  ;;  %v548_v24 = vunpack.c.h.bf16 %v577_v16  ;;  %v578_v29 = vld [vmem:[%s215_s14 + $0x10] sm:$0xff]   ;;  %v579_v30 = vld [vmem:[%s215_s14 + $0x18] sm:$0xff]  }
  0x11   : > { %587 = vmatpush.bf16.msra.mxu2 %v539_v1  ;;  %588 = vmatpush.bf16.msra.mxu3 %v539_v1  ;;  %v543_v18 = vunpack.c.l.bf16 %v542_v15  ;;  %v544_v23 = vunpack.c.h.bf16 %v542_v15  ;;  %v551_v36 = vunpack.c.l.bf16 %v578_v29  ;;  %v555_v38 = vunpack.c.l.bf16 %v579_v30 }
  0x12   : > { %v552_v43 = vunpack.c.h.bf16 %v578_v29  ;;  %v556_v44 = vunpack.c.h.bf16 %v579_v30 }
  0x14   : > { %325 = vmatpush.bf16.msra.mxu0 %v538_v2  ;;  %589 = vmatpush.bf16.msra.mxu1 %v538_v2 }
  0x15   : > { %590 = vmatpush.bf16.msra.mxu2 %v538_v2  ;;  %591 = vmatpush.bf16.msra.mxu3 %v538_v2 }
  0x18   : > { %326 = vmatpush.bf16.msra.mxu0 %v537_v3  ;;  %592 = vmatpush.bf16.msra.mxu1 %v537_v3 }
  0x19   : > { %593 = vmatpush.bf16.msra.mxu2 %v537_v3  ;;  %594 = vmatpush.bf16.msra.mxu3 %v537_v3 }
  0x1c   : > { %327 = vmatpush.bf16.msra.mxu0 %v536_v4  ;;  %595 = vmatpush.bf16.msra.mxu1 %v536_v4 }
  0x1d   : > { %596 = vmatpush.bf16.msra.mxu2 %v536_v4  ;;  %597 = vmatpush.bf16.msra.mxu3 %v536_v4 }
  0x20   : > { %328 = vmatpush.bf16.msra.mxu0 %v535_v5  ;;  %598 = vmatpush.bf16.msra.mxu1 %v535_v5 }
  0x21   : > { %599 = vmatpush.bf16.msra.mxu2 %v535_v5  ;;  %600 = vmatpush.bf16.msra.mxu3 %v535_v5 }
  0x24   : > { %329 = vmatpush.bf16.msra.mxu0 %v534_v6  ;;  %601 = vmatpush.bf16.msra.mxu1 %v534_v6 }
  0x25   : > { %602 = vmatpush.bf16.msra.mxu2 %v534_v6  ;;  %603 = vmatpush.bf16.msra.mxu3 %v534_v6 }
  0x28   : > { %330 = vmatpush.bf16.msra.mxu0 %v533_v7  ;;  %604 = vmatpush.bf16.msra.mxu1 %v533_v7 }
  0x29   : > { %605 = vmatpush.bf16.msra.mxu2 %v533_v7  ;;  %606 = vmatpush.bf16.msra.mxu3 %v533_v7 }
  0x2b   : > { %331 = vmatmul.bf16.vlgmr.msra.gmra.mxu0 %v529_v8  ;;  %336 = vmatmul.bf16.vlgmr.msra.gmra.mxu1 %v530_v9 }
  0x2c   : > { %341 = vmatmul.bf16.vlgmr.msra.gmra.mxu2 %v531_v10  ;;  %346 = vmatmul.bf16.vlgmr.msra.gmra.mxu3 %v532_v11 }
  0xa8   : > { %v332_v12 = vpop.f32.mrf.mxu0  ;;  %v337_v13 = vpop.f32.mrf.mxu1 }
  0xa9   : > { %v333_v17 = vadd.f32 %v615_v14, %v332_v12  ;;  %v338_v19 = vadd.f32 %v615_v14, %v337_v13 }
  0xab   : > { %v368_v27 = vadd.f32 %v543_v18, %v333_v17  ;;  %v370_v28 = vadd.f32 %v547_v20, %v338_v19 }
  0xad   : > { %v376_v39 = vmax.f32 %v368_v27, 0.0  ;;  %v378_v40 = vmax.f32 %v370_v28, 0.0 }
  0xaf   : > { %v342_v21 = vpop.f32.mrf.mxu2  ;;  %v347_v22 = vpop.f32.mrf.mxu3 }
  0xb0   : > { %v334_v25 = vpop.f32.mrf.mxu0  ;;  %v339_v26 = vpop.f32.mrf.mxu1  ;;  %v343_v35 = vadd.f32 %v615_v14, %v342_v21  ;;  %v348_v37 = vadd.f32 %v615_v14, %v347_v22 }
  0xb1   : > { %v335_v31 = vadd.f32 %v615_v14, %v334_v25  ;;  %v340_v32 = vadd.f32 %v615_v14, %v339_v26 }
  0xb2   : > { %v372_v49 = vadd.f32 %v551_v36, %v343_v35  ;;  %v374_v50 = vadd.f32 %v555_v38, %v348_v37 }
  0xb3   : > { %v369_v33 = vadd.f32 %v544_v23, %v335_v31  ;;  %v371_v34 = vadd.f32 %v548_v24, %v340_v32 }
  0xb4   : > { %v380_v55 = vmax.f32 %v372_v49, 0.0  ;;  %v382_v56 = vmax.f32 %v374_v50, 0.0 }
  0xb5   : > { %v377_v41 = vmax.f32 %v369_v33, 0.0  ;;  %v379_v42 = vmax.f32 %v371_v34, 0.0 }
  0xb7   : > { %v560_v45 = vpack.c.bf16 %v377_v41, %v376_v39  ;;  %v565_v46 = vpack.c.bf16 %v379_v42, %v378_v40  ;;  %v344_v47 = vpop.f32.mrf.mxu2  ;;  %v349_v48 = vpop.f32.mrf.mxu3 }
  0xb8   : > { %v345_v51 = vadd.f32 %v615_v14, %v344_v47  ;;  %v350_v52 = vadd.f32 %v615_v14, %v349_v48 }
  0xb9   : > { %561 = vst [vmem:[%s221_s20] sm:$0xff] %v560_v45  }
  0xba   : > { %580 = vst [vmem:[%s221_s20 + $0x8] sm:$0xff] %v565_v46   ;;  %v373_v53 = vadd.f32 %v552_v43, %v345_v51  ;;  %v375_v54 = vadd.f32 %v556_v44, %v350_v52 }
  0xbc   : > { %v381_v57 = vmax.f32 %v373_v53, 0.0  ;;  %v383_v58 = vmax.f32 %v375_v54, 0.0 }
  0xbe   : > { %v570_v59 = vpack.c.bf16 %v381_v57, %v380_v55  ;;  %v575_v60 = vpack.c.bf16 %v383_v58, %v382_v56 }
  0xc0   : > { %581 = vst [vmem:[%s221_s20 + $0x10] sm:$0xff] %v570_v59  }
  0xc1   : > { %582 = vst [vmem:[%s221_s20 + $0x18] sm:$0xff] %v575_v60  }
  0xc2 PF: > { %s14_s15 = sadd.s32 1, %s622_s15  }
  0xc3   : > { %p11_p4 = scmp.ge.s32.totalorder %s14_s15, 4  }
  0xc5   :  { %13 = sbr.rel (!%p11_p4) target bundleno = 1 (0x1), region = 69 }

// kernel: forward.27
= control target key start
LH: loop header
LB: loop body
LE: loop exit
PB: predicated region body
PF: predicated region fallthrough
CT: control target
= control target key end

     0   :  { %s424_s12 = smov 0   ;;  %s468_s0 = inlined_call_operand.vmem [shape: bf16[32,128], index: 0, kind: input, shape index: {}]   ;;  %s469_s1 = inlined_call_operand.vmem [shape: bf16[128,128], index: 1, kind: input, shape index: {}]   ;;  %s470_s2 = inlined_call_operand.vmem [shape: f32[1,128], index: 2, kind: input, shape index: {}]   ;;  %s471_s3 = inlined_call_operand.vmem [shape: bf16[32,128], index: 3, kind: output, shape index: {}]  }
   0x1 LB: > { %s326_s13 = sadd.s32 4294967295, %s402_s12   ;;  %p330_p0 = scmp.ge.s32.totalorder %s402_s12, 1  ;;  %s402_s12 = sphi %s424_s12, %s13_s12  }
   0x2   : > { %p138_p1 = scmp.lt.s32.totalorder %s402_s12, 3 }
   0x4   : > { %p139_p2 = pnand %p330_p0, %p138_p1 }
   0x5   : > { %s331_s22 = sshll.u32 (!%p139_p2), %s326_s13, 1 }
   0x6   : > { %142 = sbr.rel (%p139_p2) target bundleno = 184 (0xb8), region = 32  ;;  %p163_p3 = scmp.lt.s32.totalorder (!%p139_p2), %s331_s22, 3 }
   0xb   : > { %v381_v0 = vld [vmem:[%s469_s1 + $0x38] sm:$0xff]  ;;  %v380_v1 = vld [vmem:[%s469_s1 + $0x30] sm:$0xff]  ;;  %v379_v2 = vld [vmem:[%s469_s1 + $0x28] sm:$0xff]  ;;  %s473_s22 = smov (!%p163_p3, %s331_s22), 3 }
   0xc   : > { %250 = vmatpush.bf16.msra.mxu0 %v381_v0  ;;  %v378_v3 = vld [vmem:[%s469_s1 + $0x20] sm:$0xff]  ;;  %v377_v4 = vld [vmem:[%s469_s1 + $0x18] sm:$0xff]  ;;  %v376_v5 = vld [vmem:[%s469_s1 + $0x10] sm:$0xff]  ;;  %s332_s29 = sshll.u32 %s473_s22, 2 }
   0xd   : > { %v375_v6 = vld [vmem:[%s469_s1 + $0x8] sm:$0xff]  ;;  %v374_v7 = vld [vmem:[%s469_s1] sm:$0xff]  ;;  %s166_s7 = scalar_lea.vmem %s468_s0, %s332_s29  ;;  %s172_s13 = scalar_lea.vmem %s471_s3, %s332_s29 }
   0xe   : > { %v373_v8 = vld [vmem:[%s166_s7] sm:$0xff] }
   0xf   : > { %v395_v10 = vld [vmem:[%s470_s2] ss:$0 sm:$0xff] }
  0x10   : > { %251 = vmatpush.bf16.msra.mxu0 %v380_v1 }
  0x14   : > { %252 = vmatpush.bf16.msra.mxu0 %v379_v2 }
  0x18   : > { %253 = vmatpush.bf16.msra.mxu0 %v378_v3 }
  0x1c   : > { %254 = vmatpush.bf16.msra.mxu0 %v377_v4 }
  0x20   : > { %255 = vmatpush.bf16.msra.mxu0 %v376_v5 }
  0x24   : > { %256 = vmatpush.bf16.msra.mxu0 %v375_v6 }
  0x28   : > { %257 = vmatpush.bf16.msra.mxu0 %v374_v7 }
  0x2b   : > { %258 = vmatmul.bf16.vlgmr.msra.gmra.mxu0 %v373_v8 }
  0xa8   : > { %v259_v9 = vpop.f32.mrf.mxu0 }
  0xa9   : > { %v260_v11 = vadd.f32 %v395_v10, %v259_v9 }
  0xab   : > { %v264_v14 = vmax.f32 %v260_v11, 0.0 }
  0xb0   : > { %v261_v12 = vpop.f32.mrf.mxu0 }
  0xb1   : > { %v262_v13 = vadd.f32 %v395_v10, %v261_v12 }
  0xb3   : > { %v265_v15 = vmax.f32 %v262_v13, 0.0 }
  0xb5   : > { %v385_v16 = vpack.c.bf16 %v265_v15, %v264_v14 }
  0xb7   : > { %386 = vst [vmem:[%s172_s13] sm:$0xff] %v385_v16  }
  0xb8 PF: > { %s13_s12 = sadd.s32 1, %s402_s12  }
  0xb9   : > { %p10_p4 = scmp.ge.s32.totalorder %s13_s12, 4  }
  0xbb   :  { %12 = sbr.rel (!%p10_p4) target bundleno = 1 (0x1), region = 62 }

// kernel: forward.28
= control target key start
LH: loop header
LB: loop body
LE: loop exit
PB: predicated region body
PF: predicated region fallthrough
CT: control target
= control target key end

     0   :  { %s422_s12 = smov 0   ;;  %s466_s0 = inlined_call_operand.vmem [shape: bf16[32,128], index: 0, kind: input, shape index: {}]   ;;  %s467_s1 = inlined_call_operand.vmem [shape: bf16[128,128], index: 1, kind: input, shape index: {}]   ;;  %s468_s2 = inlined_call_operand.vmem [shape: f32[1,128], index: 2, kind: input, shape index: {}]   ;;  %s469_s3 = inlined_call_operand.vmem [shape: bf16[32,128], index: 3, kind: output, shape index: {}]  }
   0x1 LB: > { %s324_s13 = sadd.s32 4294967295, %s400_s12   ;;  %p328_p0 = scmp.ge.s32.totalorder %s400_s12, 1  ;;  %s400_s12 = sphi %s422_s12, %s13_s12  }
   0x2   : > { %p138_p1 = scmp.lt.s32.totalorder %s400_s12, 3 }
   0x4   : > { %p139_p2 = pnand %p328_p0, %p138_p1 }
   0x5   : > { %s329_s22 = sshll.u32 (!%p139_p2), %s324_s13, 1 }
   0x6   : > { %142 = sbr.rel (%p139_p2) target bundleno = 182 (0xb6), region = 32  ;;  %p163_p3 = scmp.lt.s32.totalorder (!%p139_p2), %s329_s22, 3 }
   0xb   : > { %v379_v0 = vld [vmem:[%s467_s1 + $0x38] sm:$0xff]  ;;  %v378_v1 = vld [vmem:[%s467_s1 + $0x30] sm:$0xff]  ;;  %v377_v2 = vld [vmem:[%s467_s1 + $0x28] sm:$0xff]  ;;  %s471_s22 = smov (!%p163_p3, %s329_s22), 3 }
   0xc   : > { %250 = vmatpush.bf16.msra.mxu0 %v379_v0  ;;  %v376_v3 = vld [vmem:[%s467_s1 + $0x20] sm:$0xff]  ;;  %v375_v4 = vld [vmem:[%s467_s1 + $0x18] sm:$0xff]  ;;  %v374_v5 = vld [vmem:[%s467_s1 + $0x10] sm:$0xff]  ;;  %s330_s29 = sshll.u32 %s471_s22, 2 }
   0xd   : > { %v373_v6 = vld [vmem:[%s467_s1 + $0x8] sm:$0xff]  ;;  %v372_v7 = vld [vmem:[%s467_s1] sm:$0xff]  ;;  %s166_s7 = scalar_lea.vmem %s466_s0, %s330_s29  ;;  %s172_s13 = scalar_lea.vmem %s469_s3, %s330_s29 }
   0xe   : > { %v371_v8 = vld [vmem:[%s166_s7] sm:$0xff] }
   0xf   : > { %v393_v10 = vld [vmem:[%s468_s2] ss:$0 sm:$0xff] }
  0x10   : > { %251 = vmatpush.bf16.msra.mxu0 %v378_v1 }
  0x14   : > { %252 = vmatpush.bf16.msra.mxu0 %v377_v2 }
  0x18   : > { %253 = vmatpush.bf16.msra.mxu0 %v376_v3 }
  0x1c   : > { %254 = vmatpush.bf16.msra.mxu0 %v375_v4 }
  0x20   : > { %255 = vmatpush.bf16.msra.mxu0 %v374_v5 }
  0x24   : > { %256 = vmatpush.bf16.msra.mxu0 %v373_v6 }
  0x28   : > { %257 = vmatpush.bf16.msra.mxu0 %v372_v7 }
  0x2b   : > { %258 = vmatmul.bf16.vlgmr.msra.gmra.mxu0 %v371_v8 }
  0xa8   : > { %v259_v9 = vpop.f32.mrf.mxu0 }
  0xa9   : > { %v260_v12 = vadd.f32 %v393_v10, %v259_v9 }
  0xb0   : > { %v261_v11 = vpop.f32.mrf.mxu0 }
  0xb1   : > { %v262_v13 = vadd.f32 %v393_v10, %v261_v11 }
  0xb3   : > { %v383_v14 = vpack.c.bf16 %v262_v13, %v260_v12 }
  0xb5   : > { %384 = vst [vmem:[%s172_s13] sm:$0xff] %v383_v14  }
  0xb6 PF: > { %s13_s12 = sadd.s32 1, %s400_s12  }
  0xb7   : > { %p10_p4 = scmp.ge.s32.totalorder %s13_s12, 4  }
  0xb9   :  { %12 = sbr.rel (!%p10_p4) target bundleno = 1 (0x1), region = 62 }

// kernel: forward.30
= control target key start
LH: loop header
LB: loop body
LE: loop exit
PB: predicated region body
PF: predicated region fallthrough
CT: control target
= control target key end

     0   :  { %s556_s12 = smov 0   ;;  %s628_s0 = inlined_call_operand.vmem [shape: bf16[32,256], index: 0, kind: input, shape index: {}]   ;;  %s629_s1 = inlined_call_operand.vmem [shape: bf16[256,128], index: 1, kind: input, shape index: {}]   ;;  %s630_s2 = inlined_call_operand.vmem [shape: f32[1,128], index: 2, kind: input, shape index: {}]   ;;  %s631_s3 = inlined_call_operand.vmem [shape: bf16[32,128], index: 3, kind: output, shape index: {}]  }
   0x1 LB: > { %s411_s13 = sadd.s32 4294967295, %s534_s12   ;;  %p415_p0 = scmp.ge.s32.totalorder %s534_s12, 1  ;;  %s534_s12 = sphi %s556_s12, %s13_s12  }
   0x2   : > { %p139_p1 = scmp.lt.s32.totalorder %s534_s12, 3 }
   0x4   : > { %p140_p2 = pnand %p415_p0, %p139_p1 }
   0x5   : > { %s416_s26 = sshll.u32 (!%p140_p2), %s411_s13, 1 }
   0x6   : > { %143 = sbr.rel (%p140_p2) target bundleno = 186 (0xba), region = 32  ;;  %p165_p3 = scmp.lt.s32.totalorder (!%p140_p2), %s416_s26, 3 }
   0xb   : > { %v505_v0 = vld [vmem:[%s629_s1 + $0x38] sm:$0xff]  ;;  %v504_v2 = vld [vmem:[%s629_s1 + $0x30] sm:$0xff]  ;;  %v503_v4 = vld [vmem:[%s629_s1 + $0x28] sm:$0xff]  ;;  %s633_s26 = smov (!%p165_p3, %s416_s26), 3 }
   0xc   : > { %v513_v1 = vld [vmem:[%s629_s1 + $0x78] sm:$0xff]  ;;  %321 = vmatpush.bf16.msra.mxu0 %v505_v0  ;;  %v512_v3 = vld [vmem:[%s629_s1 + $0x70] sm:$0xff]  ;;  %v511_v5 = vld [vmem:[%s629_s1 + $0x68] sm:$0xff]  ;;  %s495_s13 = sshll.u32 %s633_s26, 3  ;;  %s420_s28 = sshll.u32 %s633_s26, 2 }
   0xd   : > { %335 = vmatpush.bf16.msra.mxu1 %v513_v1  ;;  %v502_v6 = vld [vmem:[%s629_s1 + $0x20] sm:$0xff]  ;;  %v501_v8 = vld [vmem:[%s629_s1 + $0x18] sm:$0xff]  ;;  %v500_v10 = vld [vmem:[%s629_s1 + $0x10] sm:$0xff]  ;;  %s169_s20 = scalar_lea.vmem %s628_s0, %s495_s13  ;;  %s175_s4 = scalar_lea.vmem %s631_s3, %s420_s28 }
   0xe   : > { %v510_v7 = vld [vmem:[%s629_s1 + $0x60] sm:$0xff]  ;;  %v509_v9 = vld [vmem:[%s629_s1 + $0x58] sm:$0xff]  ;;  %v508_v11 = vld [vmem:[%s629_s1 + $0x50] sm:$0xff] }
   0xf   : > { %v499_v12 = vld [vmem:[%s629_s1 + $0x8] sm:$0xff]  ;;  %v498_v14 = vld [vmem:[%s629_s1] sm:$0xff] }
  0x10   : > { %322 = vmatpush.bf16.msra.mxu0 %v504_v2  ;;  %v507_v13 = vld [vmem:[%s629_s1 + $0x48] sm:$0xff]  ;;  %v506_v15 = vld [vmem:[%s629_s1 + $0x40] sm:$0xff] }
  0x11   : > { %336 = vmatpush.bf16.msra.mxu1 %v512_v3  ;;  %v423_v16 = vld [vmem:[%s169_s20] sm:$0xf]  ;;  %v497_v17 = vld [vmem:[%s169_s20 + $0x4] sm:$0xf0]  ;;  %v496_v18 = vld [vmem:[%s169_s20 + $0x4] sm:$0xf] }
  0x12   : > { %v425_v19 = vld [vmem:[%s169_s20 + $0x8] sm:$0xf0]  ;;  %v424_v20 = vor.u32 %v497_v17, %v423_v16  ;;  %v527_v24 = vld [vmem:[%s630_s2] ss:$0 sm:$0xff] }
  0x13   : > { %v428_v21 = vor.u32 %v496_v18, %v425_v19 }
  0x14   : > { %323 = vmatpush.bf16.msra.mxu0 %v503_v4 }
  0x15   : > { %337 = vmatpush.bf16.msra.mxu1 %v511_v5 }
  0x18   : > { %324 = vmatpush.bf16.msra.mxu0 %v502_v6 }
  0x19   : > { %338 = vmatpush.bf16.msra.mxu1 %v510_v7 }
  0x1c   : > { %325 = vmatpush.bf16.msra.mxu0 %v501_v8 }
  0x1d   : > { %339 = vmatpush.bf16.msra.mxu1 %v509_v9 }
  0x20   : > { %326 = vmatpush.bf16.msra.mxu0 %v500_v10 }
  0x21   : > { %340 = vmatpush.bf16.msra.mxu1 %v508_v11 }
  0x24   : > { %327 = vmatpush.bf16.msra.mxu0 %v499_v12 }
  0x25   : > { %341 = vmatpush.bf16.msra.mxu1 %v507_v13 }
  0x28   : > { %328 = vmatpush.bf16.msra.mxu0 %v498_v14 }
  0x29   : > { %342 = vmatpush.bf16.msra.mxu1 %v506_v15 }
  0x2b   : > { %329 = vmatmul.bf16.vlgmr.msra.gmra.mxu0 %v424_v20 }
  0x2c   : > { %343 = vmatmul.bf16.vlgmr.msra.gmra.mxu1 %v428_v21 }
  0xa8   : > { %v330_v22 = vpop.f32.mrf.mxu0 }
  0xa9   : > { %v344_v23 = vpop.f32.mrf.mxu1  ;;  %v331_v25 = vadd.f32 %v527_v24, %v330_v22 }
  0xab   : > { %v345_v27 = vadd.f32 %v344_v23, %v331_v25 }
  0xad   : > { %v349_v31 = vmax.f32 %v345_v27, 0.0 }
  0xb0   : > { %v332_v26 = vpop.f32.mrf.mxu0 }
  0xb1   : > { %v333_v28 = vadd.f32 %v527_v24, %v332_v26  ;;  %v346_v29 = vpop.f32.mrf.mxu1 }
  0xb3   : > { %v347_v30 = vadd.f32 %v346_v29, %v333_v28 }
  0xb5   : > { %v350_v32 = vmax.f32 %v347_v30, 0.0 }
  0xb7   : > { %v517_v33 = vpack.c.bf16 %v350_v32, %v349_v31 }
  0xb9   : > { %518 = vst [vmem:[%s175_s4] sm:$0xff] %v517_v33  }
  0xba PF: > { %s13_s12 = sadd.s32 1, %s534_s12  }
  0xbb   : > { %p10_p4 = scmp.ge.s32.totalorder %s13_s12, 4  }
  0xbd   :  { %12 = sbr.rel (!%p10_p4) target bundleno = 1 (0x1), region = 62 }

// kernel: forward.29
= control target key start
LH: loop header
LB: loop body
LE: loop exit
PB: predicated region body
PF: predicated region fallthrough
CT: control target
= control target key end

     0   :  { %s634_s15 = smov 0   ;;  %s709_s0 = inlined_call_operand.vmem [shape: bf16[32,256], index: 0, kind: input, shape index: {}]   ;;  %s710_s1 = inlined_call_operand.vmem [shape: bf16[256,128], index: 1, kind: input, shape index: {}]   ;;  %s711_s2 = inlined_call_operand.vmem [shape: f32[1,128], index: 2, kind: input, shape index: {}]   ;;  %s712_s3 = inlined_call_operand.vmem [shape: bf16[32,128], index: 3, kind: input, shape index: {}]   ;;  %s713_s4 = inlined_call_operand.vmem [shape: bf16[32,128], index: 4, kind: output, shape index: {}]  }
   0x1 LB: > { %s478_s16 = sadd.s32 4294967295, %s607_s15   ;;  %p482_p0 = scmp.ge.s32.totalorder %s607_s15, 1  ;;  %s607_s15 = sphi %s634_s15, %s14_s15  }
   0x2   : > { %p175_p1 = scmp.lt.s32.totalorder %s607_s15, 3 }
   0x4   : > { %p176_p2 = pnand %p482_p0, %p175_p1 }
   0x5   : > { %s483_s29 = sshll.u32 (!%p176_p2), %s478_s16, 1 }
   0x6   : > { %179 = sbr.rel (%p176_p2) target bundleno = 188 (0xbc), region = 36  ;;  %p208_p3 = scmp.lt.s32.totalorder (!%p176_p2), %s483_s29, 3 }
   0xb   : > { %v574_v0 = vld [vmem:[%s710_s1 + $0x38] sm:$0xff]  ;;  %v573_v2 = vld [vmem:[%s710_s1 + $0x30] sm:$0xff]  ;;  %v572_v4 = vld [vmem:[%s710_s1 + $0x28] sm:$0xff]  ;;  %s715_s29 = smov (!%p208_p3, %s483_s29), 3 }
   0xc   : > { %v582_v1 = vld [vmem:[%s710_s1 + $0x78] sm:$0xff]  ;;  %370 = vmatpush.bf16.msra.mxu0 %v574_v0  ;;  %v581_v3 = vld [vmem:[%s710_s1 + $0x70] sm:$0xff]  ;;  %v580_v5 = vld [vmem:[%s710_s1 + $0x68] sm:$0xff]  ;;  %s564_s17 = sshll.u32 %s715_s29, 3  ;;  %s487_s30 = sshll.u32 %s715_s29, 2 }
   0xd   : > { %384 = vmatpush.bf16.msra.mxu1 %v582_v1  ;;  %v571_v6 = vld [vmem:[%s710_s1 + $0x20] sm:$0xff]  ;;  %v570_v8 = vld [vmem:[%s710_s1 + $0x18] sm:$0xff]  ;;  %v569_v10 = vld [vmem:[%s710_s1 + $0x10] sm:$0xff]  ;;  %s212_s24 = scalar_lea.vmem %s709_s0, %s564_s17  ;;  %s218_s9 = scalar_lea.vmem %s712_s3, %s487_s30 }
   0xe   : > { %v579_v7 = vld [vmem:[%s710_s1 + $0x60] sm:$0xff]  ;;  %v578_v9 = vld [vmem:[%s710_s1 + $0x58] sm:$0xff]  ;;  %v577_v11 = vld [vmem:[%s710_s1 + $0x50] sm:$0xff]  ;;  %s224_s11 = scalar_lea.vmem %s713_s4, %s487_s30 }
   0xf   : > { %v568_v12 = vld [vmem:[%s710_s1 + $0x8] sm:$0xff]  ;;  %v567_v14 = vld [vmem:[%s710_s1] sm:$0xff] }
  0x10   : > { %371 = vmatpush.bf16.msra.mxu0 %v573_v2  ;;  %v576_v13 = vld [vmem:[%s710_s1 + $0x48] sm:$0xff]  ;;  %v575_v15 = vld [vmem:[%s710_s1 + $0x40] sm:$0xff] }
  0x11   : > { %385 = vmatpush.bf16.msra.mxu1 %v581_v3  ;;  %v492_v16 = vld [vmem:[%s212_s24] sm:$0xf]  ;;  %v566_v17 = vld [vmem:[%s212_s24 + $0x4] sm:$0xf0]  ;;  %v565_v18 = vld [vmem:[%s212_s24 + $0x4] sm:$0xf] }
  0x12   : > { %v494_v19 = vld [vmem:[%s212_s24 + $0x8] sm:$0xf0]  ;;  %v493_v20 = vor.u32 %v566_v17, %v492_v16  ;;  %v600_v22 = vld [vmem:[%s711_s2] ss:$0 sm:$0xff] }
  0x13   : > { %v497_v21 = vor.u32 %v565_v18, %v494_v19  ;;  %v584_v26 = vld [vmem:[%s218_s9] sm:$0xff]  }
  0x14   : > { %372 = vmatpush.bf16.msra.mxu0 %v572_v4  ;;  %v585_v28 = vunpack.c.l.bf16 %v584_v26  ;;  %v586_v31 = vunpack.c.h.bf16 %v584_v26 }
  0x15   : > { %386 = vmatpush.bf16.msra.mxu1 %v580_v5 }
  0x18   : > { %373 = vmatpush.bf16.msra.mxu0 %v571_v6 }
  0x19   : > { %387 = vmatpush.bf16.msra.mxu1 %v579_v7 }
  0x1c   : > { %374 = vmatpush.bf16.msra.mxu0 %v570_v8 }
  0x1d   : > { %388 = vmatpush.bf16.msra.mxu1 %v578_v9 }
  0x20   : > { %375 = vmatpush.bf16.msra.mxu0 %v569_v10 }
  0x21   : > { %389 = vmatpush.bf16.msra.mxu1 %v577_v11 }
  0x24   : > { %376 = vmatpush.bf16.msra.mxu0 %v568_v12 }
  0x25   : > { %390 = vmatpush.bf16.msra.mxu1 %v576_v13 }
  0x28   : > { %377 = vmatpush.bf16.msra.mxu0 %v567_v14 }
  0x29   : > { %391 = vmatpush.bf16.msra.mxu1 %v575_v15 }
  0x2b   : > { %378 = vmatmul.bf16.vlgmr.msra.gmra.mxu0 %v493_v20 }
  0x2c   : > { %392 = vmatmul.bf16.vlgmr.msra.gmra.mxu1 %v497_v21 }
  0xa8   : > { %v379_v23 = vpop.f32.mrf.mxu0 }
  0xa9   : > { %v393_v24 = vpop.f32.mrf.mxu1  ;;  %v380_v25 = vadd.f32 %v600_v22, %v379_v23 }
  0xab   : > { %v394_v27 = vadd.f32 %v393_v24, %v380_v25 }
  0xad   : > { %v402_v33 = vadd.f32 %v585_v28, %v394_v27 }
  0xaf   : > { %v404_v36 = vmax.f32 %v402_v33, 0.0 }
  0xb0   : > { %v381_v29 = vpop.f32.mrf.mxu0 }
  0xb1   : > { %v382_v30 = vadd.f32 %v600_v22, %v381_v29  ;;  %v395_v32 = vpop.f32.mrf.mxu1 }
  0xb3   : > { %v396_v34 = vadd.f32 %v395_v32, %v382_v30 }
  0xb5   : > { %v403_v35 = vadd.f32 %v586_v31, %v396_v34 }
  0xb7   : > { %v405_v37 = vmax.f32 %v403_v35, 0.0 }
  0xb9   : > { %v590_v38 = vpack.c.bf16 %v405_v37, %v404_v36 }
  0xbb   : > { %591 = vst [vmem:[%s224_s11] sm:$0xff] %v590_v38  }
  0xbc PF: > { %s14_s15 = sadd.s32 1, %s607_s15  }
  0xbd   : > { %p11_p4 = scmp.ge.s32.totalorder %s14_s15, 4  }
  0xbf   :  { %13 = sbr.rel (!%p11_p4) target bundleno = 1 (0x1), region = 69 }

// kernel: forward.32
= control target key start
LH: loop header
LB: loop body
LE: loop exit
PB: predicated region body
PF: predicated region fallthrough
CT: control target
= control target key end

     0   :  { %s345_s1 = inlined_call_operand.vmem [shape: bf16[256,128], index: 1, kind: input, shape index: {}]   ;;  %s346_s2 = inlined_call_operand.vmem [shape: f32[1,128], index: 2, kind: input, shape index: {}]   ;;  %s347_s0 = inlined_call_operand.vmem [shape: bf16[8,256], index: 0, kind: input, shape index: {}]   ;;  %s348_s3 = inlined_call_operand.vmem [shape: bf16[8,128], index: 3, kind: output, shape index: {}]  }
   0x1   :  { %v258_v0 = vld [vmem:[%s345_s1 + $0x38] sm:$0xff]  ;;  %v257_v2 = vld [vmem:[%s345_s1 + $0x30] sm:$0xff]  ;;  %v256_v4 = vld [vmem:[%s345_s1 + $0x28] sm:$0xff] }
   0x2   :  { %v266_v1 = vld [vmem:[%s345_s1 + $0x78] sm:$0xff]  ;;  %154 = vmatpush.bf16.msra.mxu0 %v258_v0  ;;  %v265_v3 = vld [vmem:[%s345_s1 + $0x70] sm:$0xff]  ;;  %v264_v5 = vld [vmem:[%s345_s1 + $0x68] sm:$0xff] }
   0x3   :  { %167 = vmatpush.bf16.msra.mxu1 %v266_v1  ;;  %v255_v6 = vld [vmem:[%s345_s1 + $0x20] sm:$0xff]  ;;  %v254_v8 = vld [vmem:[%s345_s1 + $0x18] sm:$0xff]  ;;  %v253_v10 = vld [vmem:[%s345_s1 + $0x10] sm:$0xff] }
   0x4   :  { %v263_v7 = vld [vmem:[%s345_s1 + $0x60] sm:$0xff]  ;;  %v262_v9 = vld [vmem:[%s345_s1 + $0x58] sm:$0xff]  ;;  %v261_v11 = vld [vmem:[%s345_s1 + $0x50] sm:$0xff] }
   0x5   :  { %v252_v12 = vld [vmem:[%s345_s1 + $0x8] sm:$0xff]  ;;  %v14_v14 = vld [vmem:[%s347_s0] sm:$0xff] }
   0x6   :  { %155 = vmatpush.bf16.msra.mxu0 %v257_v2  ;;  %v260_v13 = vld [vmem:[%s345_s1 + $0x48] sm:$0xff]  ;;  %v52_v15 = vunpack.c.l.b16 %v14_v14  ;;  %v53_v16 = vunpack.c.h.b16 %v14_v14  ;;  %v251_v17 = vld [vmem:[%s345_s1] sm:$0xff] }
   0x7   :  { %168 = vmatpush.bf16.msra.mxu1 %v265_v3  ;;  %v259_v18 = vld [vmem:[%s345_s1 + $0x40] sm:$0xff] }
   0x8   :  { %v54_v19 = vpack.c.b16 %v52_v15, %v52_v15  ;;  %v55_v20 = vpack.c.b16 %v53_v16, %v53_v16  ;;  %v267_v21 = vld [vmem:[%s346_s2] ss:$0 sm:$0xff] }
   0xa   :  { %156 = vmatpush.bf16.msra.mxu0 %v256_v4 }
   0xb   :  { %169 = vmatpush.bf16.msra.mxu1 %v264_v5 }
   0xe   :  { %157 = vmatpush.bf16.msra.mxu0 %v255_v6 }
   0xf   :  { %170 = vmatpush.bf16.msra.mxu1 %v263_v7 }
  0x12   :  { %158 = vmatpush.bf16.msra.mxu0 %v254_v8 }
  0x13   :  { %171 = vmatpush.bf16.msra.mxu1 %v262_v9 }
  0x16   :  { %159 = vmatpush.bf16.msra.mxu0 %v253_v10 }
  0x17   :  { %172 = vmatpush.bf16.msra.mxu1 %v261_v11 }
  0x1a   :  { %160 = vmatpush.bf16.msra.mxu0 %v252_v12 }
  0x1b   :  { %173 = vmatpush.bf16.msra.mxu1 %v260_v13 }
  0x1e   :  { %161 = vmatpush.bf16.msra.mxu0 %v251_v17 }
  0x1f   :  { %174 = vmatpush.bf16.msra.mxu1 %v259_v18 }
  0x21   :  { %162 = vmatmul.bf16.vlgmr.msra.gmra.mxu0 %v54_v19 }
  0x22   :  { %175 = vmatmul.bf16.vlgmr.msra.gmra.mxu1 %v55_v20 }
  0x9e   :  { %v163_v22 = vpop.f32.mrf.mxu0 }
  0x9f   :  { %v176_v23 = vpop.f32.mrf.mxu1  ;;  %v164_v24 = vadd.f32 %v267_v21, %v163_v22 }
  0xa1   :  { %v177_v25 = vadd.f32 %v176_v23, %v164_v24 }
  0xa3   :  { %v180_v26 = vmax.f32 %v177_v25, 0.0 }
  0xa5   :  { %v181_v27 = vpack.c.bf16 %v180_v26, %v180_v26 }
  0xa6   :  { %v165_v28 = vpop.f32.mrf.mxu0 }
  0xa7   :  { %v178_v29 = vpop.f32.mrf.mxu1  ;;  %182 = vst [vmem:[%s348_s3] sm:$0xf] %v181_v27 }

// kernel: forward.33
= control target key start
LH: loop header
LB: loop body
LE: loop exit
PB: predicated region body
PF: predicated region fallthrough
CT: control target
= control target key end

     0   :  { %s196_s1 = inlined_call_operand.vmem [shape: bf16[128,128], index: 1, kind: input, shape index: {}]   ;;  %s197_s2 = inlined_call_operand.vmem [shape: f32[1,128], index: 2, kind: input, shape index: {}]   ;;  %s198_s0 = inlined_call_operand.vmem [shape: bf16[8,128], index: 0, kind: input, shape index: {}]   ;;  %s199_s3 = inlined_call_operand.vmem [shape: bf16[8,128], index: 3, kind: output, shape index: {}]  }
   0x1   :  { %v141_v0 = vld [vmem:[%s196_s1 + $0x38] sm:$0xff]  ;;  %v140_v1 = vld [vmem:[%s196_s1 + $0x30] sm:$0xff]  ;;  %v139_v2 = vld [vmem:[%s196_s1 + $0x28] sm:$0xff] }
   0x2   :  { %83 = vmatpush.bf16.msra.mxu0 %v141_v0  ;;  %v138_v3 = vld [vmem:[%s196_s1 + $0x20] sm:$0xff]  ;;  %v137_v4 = vld [vmem:[%s196_s1 + $0x18] sm:$0xff]  ;;  %v136_v5 = vld [vmem:[%s196_s1 + $0x10] sm:$0xff] }
   0x3   :  { %v135_v6 = vld [vmem:[%s196_s1 + $0x8] sm:$0xff]  ;;  %v134_v7 = vld [vmem:[%s196_s1] sm:$0xff] }
   0x4   :  { %v14_v8 = vld [vmem:[%s198_s0] sm:$0xf] }
   0x5   :  { %v142_v9 = vld [vmem:[%s197_s2] ss:$0 sm:$0xff] }
   0x6   :  { %84 = vmatpush.bf16.msra.mxu0 %v140_v1 }
   0xa   :  { %85 = vmatpush.bf16.msra.mxu0 %v139_v2 }
   0xe   :  { %86 = vmatpush.bf16.msra.mxu0 %v138_v3 }
  0x12   :  { %87 = vmatpush.bf16.msra.mxu0 %v137_v4 }
  0x16   :  { %88 = vmatpush.bf16.msra.mxu0 %v136_v5 }
  0x1a   :  { %89 = vmatpush.bf16.msra.mxu0 %v135_v6 }
  0x1e   :  { %90 = vmatpush.bf16.msra.mxu0 %v134_v7 }
  0x21   :  { %91 = vmatmul.bf16.vlgmr.msra.gmra.mxu0 %v14_v8 }
  0x9e   :  { %v92_v10 = vpop.f32.mrf.mxu0 }
  0x9f   :  { %v93_v11 = vadd.f32 %v142_v9, %v92_v10 }
  0xa1   :  { %v96_v12 = vpack.c.bf16 %v93_v11, %v93_v11 }
  0xa3   :  { %97 = vst [vmem:[%s199_s3] sm:$0xf] %v96_v12 }
  0xa6   :  { %v94_v13 = vpop.f32.mrf.mxu0 }

// kernel: forward.34
= control target key start
LH: loop header
LB: loop body
LE: loop exit
PB: predicated region body
PF: predicated region fallthrough
CT: control target
= control target key end

     0   :  { %s508_s1 = inlined_call_operand.vmem [shape: bf16[384,128], index: 1, kind: input, shape index: {}]   ;;  %s509_s2 = inlined_call_operand.vmem [shape: f32[1,128], index: 2, kind: input, shape index: {}]   ;;  %s510_s0 = inlined_call_operand.vmem [shape: bf16[8,384], index: 0, kind: input, shape index: {}]   ;;  %s511_s3 = inlined_call_operand.vmem [shape: bf16[8,128], index: 3, kind: input, shape index: {}]   ;;  %s512_s4 = inlined_call_operand.vmem [shape: bf16[8,128], index: 4, kind: output, shape index: {}]  }
   0x1   :  { %v378_v0 = vld [vmem:[%s508_s1 + $0x38] sm:$0xff]  ;;  %v377_v3 = vld [vmem:[%s508_s1 + $0x30] sm:$0xff]  ;;  %v376_v6 = vld [vmem:[%s508_s1 + $0x28] sm:$0xff] }
   0x2   :  { %v386_v1 = vld [vmem:[%s508_s1 + $0x78] sm:$0xff]  ;;  %226 = vmatpush.bf16.msra.mxu0 %v378_v0  ;;  %v385_v4 = vld [vmem:[%s508_s1 + $0x70] sm:$0xff]  ;;  %v384_v7 = vld [vmem:[%s508_s1 + $0x68] sm:$0xff] }
   0x3   :  { %v394_v2 = vld [vmem:[%s508_s1 + $0xb8] sm:$0xff]  ;;  %239 = vmatpush.bf16.msra.mxu1 %v386_v1  ;;  %v393_v5 = vld [vmem:[%s508_s1 + $0xb0] sm:$0xff]  ;;  %v392_v8 = vld [vmem:[%s508_s1 + $0xa8] sm:$0xff] }
   0x4   :  { %252 = vmatpush.bf16.msra.mxu2 %v394_v2  ;;  %v375_v9 = vld [vmem:[%s508_s1 + $0x20] sm:$0xff]  ;;  %v374_v12 = vld [vmem:[%s508_s1 + $0x18] sm:$0xff]  ;;  %v373_v15 = vld [vmem:[%s508_s1 + $0x10] sm:$0xff] }
   0x5   :  { %v383_v10 = vld [vmem:[%s508_s1 + $0x60] sm:$0xff]  ;;  %v382_v13 = vld [vmem:[%s508_s1 + $0x58] sm:$0xff]  ;;  %v381_v16 = vld [vmem:[%s508_s1 + $0x50] sm:$0xff] }
   0x6   :  { %227 = vmatpush.bf16.msra.mxu0 %v377_v3  ;;  %v391_v11 = vld [vmem:[%s508_s1 + $0xa0] sm:$0xff]  ;;  %v390_v14 = vld [vmem:[%s508_s1 + $0x98] sm:$0xff]  ;;  %v389_v17 = vld [vmem:[%s508_s1 + $0x90] sm:$0xff] }
   0x7   :  { %240 = vmatpush.bf16.msra.mxu1 %v385_v4  ;;  %v372_v18 = vld [vmem:[%s508_s1 + $0x8] sm:$0xff]  ;;  %v17_v20 = vld [vmem:[%s510_s0] sm:$0xff] }
   0x8   :  { %253 = vmatpush.bf16.msra.mxu2 %v393_v5  ;;  %v380_v19 = vld [vmem:[%s508_s1 + $0x48] sm:$0xff]  ;;  %v73_v23 = vunpack.c.l.b16 %v17_v20  ;;  %v74_v24 = vunpack.c.h.b16 %v17_v20  ;;  %v371_v25 = vld [vmem:[%s508_s1] sm:$0xff] }
   0x9   :  { %v388_v21 = vld [vmem:[%s508_s1 + $0x88] sm:$0xff]  ;;  %v379_v26 = vld [vmem:[%s508_s1 + $0x40] sm:$0xff] }
   0xa   :  { %228 = vmatpush.bf16.msra.mxu0 %v376_v6  ;;  %v18_v22 = vld [vmem:[%s510_s0 + $0x8] sm:$0xf]  ;;  %v387_v28 = vld [vmem:[%s508_s1 + $0x80] sm:$0xff]  ;;  %v76_v29 = vpack.c.b16 %v73_v23, %v73_v23  ;;  %v77_v30 = vpack.c.b16 %v74_v24, %v74_v24 }
   0xb   :  { %241 = vmatpush.bf16.msra.mxu1 %v384_v7  ;;  %v75_v27 = vunpack.c.l.b16 %v18_v22  ;;  %v395_v32 = vld [vmem:[%s509_s2] ss:$0 sm:$0xff] }
   0xc   :  { %254 = vmatpush.bf16.msra.mxu2 %v392_v8  ;;  %v265_v36 = vld [vmem:[%s511_s3] sm:$0xf] }
   0xd   :  { %v78_v31 = vpack.c.b16 %v75_v27, %v75_v27  ;;  %v266_v38 = vunpack.c.l.bf16 %v265_v36 }
   0xe   :  { %229 = vmatpush.bf16.msra.mxu0 %v375_v9 }
   0xf   :  { %242 = vmatpush.bf16.msra.mxu1 %v383_v10 }
  0x10   :  { %255 = vmatpush.bf16.msra.mxu2 %v391_v11 }
  0x12   :  { %230 = vmatpush.bf16.msra.mxu0 %v374_v12 }
  0x13   :  { %243 = vmatpush.bf16.msra.mxu1 %v382_v13 }
  0x14   :  { %256 = vmatpush.bf16.msra.mxu2 %v390_v14 }
  0x16   :  { %231 = vmatpush.bf16.msra.mxu0 %v373_v15 }
  0x17   :  { %244 = vmatpush.bf16.msra.mxu1 %v381_v16 }
  0x18   :  { %257 = vmatpush.bf16.msra.mxu2 %v389_v17 }
  0x1a   :  { %232 = vmatpush.bf16.msra.mxu0 %v372_v18 }
  0x1b   :  { %245 = vmatpush.bf16.msra.mxu1 %v380_v19 }
  0x1c   :  { %258 = vmatpush.bf16.msra.mxu2 %v388_v21 }
  0x1e   :  { %233 = vmatpush.bf16.msra.mxu0 %v371_v25 }
  0x1f   :  { %246 = vmatpush.bf16.msra.mxu1 %v379_v26 }
  0x20   :  { %259 = vmatpush.bf16.msra.mxu2 %v387_v28 }
  0x21   :  { %234 = vmatmul.bf16.vlgmr.msra.gmra.mxu0 %v76_v29 }
  0x22   :  { %247 = vmatmul.bf16.vlgmr.msra.gmra.mxu1 %v77_v30 }
  0x23   :  { %260 = vmatmul.bf16.vlgmr.msra.gmra.mxu2 %v78_v31 }
  0x9e   :  { %v235_v33 = vpop.f32.mrf.mxu0 }
  0x9f   :  { %v248_v34 = vpop.f32.mrf.mxu1  ;;  %v236_v35 = vadd.f32 %v395_v32, %v235_v33 }
  0xa1   :  { %v249_v37 = vadd.f32 %v248_v34, %v236_v35 }
  0xa6   :  { %v261_v39 = vpop.f32.mrf.mxu2  ;;  %v237_v41 = vpop.f32.mrf.mxu0 }
  0xa7   :  { %v262_v40 = vadd.f32 %v261_v39, %v249_v37  ;;  %v250_v42 = vpop.f32.mrf.mxu1 }
  0xa9   :  { %v267_v43 = vadd.f32 %v266_v38, %v262_v40 }
  0xab   :  { %v268_v44 = vmax.f32 %v267_v43, 0.0 }
  0xad   :  { %v269_v45 = vpack.c.bf16 %v268_v44, %v268_v44 }
  0xae   :  { %v263_v46 = vpop.f32.mrf.mxu2 }
  0xaf   :  { %270 = vst [vmem:[%s512_s4] sm:$0xf] %v269_v45 }

// kernel: forward.35
= control target key start
LH: loop header
LB: loop body
LE: loop exit
PB: predicated region body
PF: predicated region fallthrough
CT: control target
= control target key end

     0   :  { %s494_s1 = inlined_call_operand.vmem [shape: bf16[384,128], index: 1, kind: input, shape index: {}]   ;;  %s495_s2 = inlined_call_operand.vmem [shape: f32[1,128], index: 2, kind: input, shape index: {}]   ;;  %s496_s0 = inlined_call_operand.vmem [shape: bf16[8,384], index: 0, kind: input, shape index: {}]   ;;  %s497_s3 = inlined_call_operand.vmem [shape: bf16[8,128], index: 3, kind: output, shape index: {}]  }
   0x1   :  { %v372_v0 = vld [vmem:[%s494_s1 + $0x38] sm:$0xff]  ;;  %v371_v3 = vld [vmem:[%s494_s1 + $0x30] sm:$0xff]  ;;  %v370_v6 = vld [vmem:[%s494_s1 + $0x28] sm:$0xff] }
   0x2   :  { %v380_v1 = vld [vmem:[%s494_s1 + $0x78] sm:$0xff]  ;;  %223 = vmatpush.bf16.msra.mxu0 %v372_v0  ;;  %v379_v4 = vld [vmem:[%s494_s1 + $0x70] sm:$0xff]  ;;  %v378_v7 = vld [vmem:[%s494_s1 + $0x68] sm:$0xff] }
   0x3   :  { %v388_v2 = vld [vmem:[%s494_s1 + $0xb8] sm:$0xff]  ;;  %236 = vmatpush.bf16.msra.mxu1 %v380_v1  ;;  %v387_v5 = vld [vmem:[%s494_s1 + $0xb0] sm:$0xff]  ;;  %v386_v8 = vld [vmem:[%s494_s1 + $0xa8] sm:$0xff] }
   0x4   :  { %249 = vmatpush.bf16.msra.mxu2 %v388_v2  ;;  %v369_v9 = vld [vmem:[%s494_s1 + $0x20] sm:$0xff]  ;;  %v368_v12 = vld [vmem:[%s494_s1 + $0x18] sm:$0xff]  ;;  %v367_v15 = vld [vmem:[%s494_s1 + $0x10] sm:$0xff] }
   0x5   :  { %v377_v10 = vld [vmem:[%s494_s1 + $0x60] sm:$0xff]  ;;  %v376_v13 = vld [vmem:[%s494_s1 + $0x58] sm:$0xff]  ;;  %v375_v16 = vld [vmem:[%s494_s1 + $0x50] sm:$0xff] }
   0x6   :  { %224 = vmatpush.bf16.msra.mxu0 %v371_v3  ;;  %v385_v11 = vld [vmem:[%s494_s1 + $0xa0] sm:$0xff]  ;;  %v384_v14 = vld [vmem:[%s494_s1 + $0x98] sm:$0xff]  ;;  %v383_v17 = vld [vmem:[%s494_s1 + $0x90] sm:$0xff] }
   0x7   :  { %237 = vmatpush.bf16.msra.mxu1 %v379_v4  ;;  %v366_v18 = vld [vmem:[%s494_s1 + $0x8] sm:$0xff]  ;;  %v14_v20 = vld [vmem:[%s496_s0] sm:$0xff] }
   0x8   :  { %250 = vmatpush.bf16.msra.mxu2 %v387_v5  ;;  %v374_v19 = vld [vmem:[%s494_s1 + $0x48] sm:$0xff]  ;;  %v70_v23 = vunpack.c.l.b16 %v14_v20  ;;  %v71_v24 = vunpack.c.h.b16 %v14_v20  ;;  %v365_v25 = vld [vmem:[%s494_s1] sm:$0xff] }
   0x9   :  { %v382_v21 = vld [vmem:[%s494_s1 + $0x88] sm:$0xff]  ;;  %v373_v26 = vld [vmem:[%s494_s1 + $0x40] sm:$0xff] }
   0xa   :  { %225 = vmatpush.bf16.msra.mxu0 %v370_v6  ;;  %v15_v22 = vld [vmem:[%s496_s0 + $0x8] sm:$0xf]  ;;  %v381_v28 = vld [vmem:[%s494_s1 + $0x80] sm:$0xff]  ;;  %v73_v29 = vpack.c.b16 %v70_v23, %v70_v23  ;;  %v74_v30 = vpack.c.b16 %v71_v24, %v71_v24 }
   0xb   :  { %238 = vmatpush.bf16.msra.mxu1 %v378_v7  ;;  %v72_v27 = vunpack.c.l.b16 %v15_v22  ;;  %v389_v32 = vld [vmem:[%s495_s2] ss:$0 sm:$0xff] }
   0xc   :  { %251 = vmatpush.bf16.msra.mxu2 %v386_v8 }
   0xd   :  { %v75_v31 = vpack.c.b16 %v72_v27, %v72_v27 }
   0xe   :  { %226 = vmatpush.bf16.msra.mxu0 %v369_v9 }
   0xf   :  { %239 = vmatpush.bf16.msra.mxu1 %v377_v10 }
  0x10   :  { %252 = vmatpush.bf16.msra.mxu2 %v385_v11 }
  0x12   :  { %227 = vmatpush.bf16.msra.mxu0 %v368_v12 }
  0x13   :  { %240 = vmatpush.bf16.msra.mxu1 %v376_v13 }
  0x14   :  { %253 = vmatpush.bf16.msra.mxu2 %v384_v14 }
  0x16   :  { %228 = vmatpush.bf16.msra.mxu0 %v367_v15 }
  0x17   :  { %241 = vmatpush.bf16.msra.mxu1 %v375_v16 }
  0x18   :  { %254 = vmatpush.bf16.msra.mxu2 %v383_v17 }
  0x1a   :  { %229 = vmatpush.bf16.msra.mxu0 %v366_v18 }
  0x1b   :  { %242 = vmatpush.bf16.msra.mxu1 %v374_v19 }
  0x1c   :  { %255 = vmatpush.bf16.msra.mxu2 %v382_v21 }
  0x1e   :  { %230 = vmatpush.bf16.msra.mxu0 %v365_v25 }
  0x1f   :  { %243 = vmatpush.bf16.msra.mxu1 %v373_v26 }
  0x20   :  { %256 = vmatpush.bf16.msra.mxu2 %v381_v28 }
  0x21   :  { %231 = vmatmul.bf16.vlgmr.msra.gmra.mxu0 %v73_v29 }
  0x22   :  { %244 = vmatmul.bf16.vlgmr.msra.gmra.mxu1 %v74_v30 }
  0x23   :  { %257 = vmatmul.bf16.vlgmr.msra.gmra.mxu2 %v75_v31 }
  0x9e   :  { %v232_v33 = vpop.f32.mrf.mxu0 }
  0x9f   :  { %v245_v34 = vpop.f32.mrf.mxu1  ;;  %v233_v35 = vadd.f32 %v389_v32, %v232_v33 }
  0xa1   :  { %v246_v36 = vadd.f32 %v245_v34, %v233_v35 }
  0xa6   :  { %v258_v37 = vpop.f32.mrf.mxu2  ;;  %v234_v39 = vpop.f32.mrf.mxu0 }
  0xa7   :  { %v259_v38 = vadd.f32 %v258_v37, %v246_v36  ;;  %v247_v40 = vpop.f32.mrf.mxu1 }
  0xa9   :  { %v262_v41 = vmax.f32 %v259_v38, 0.0 }
  0xab   :  { %v263_v42 = vpack.c.bf16 %v262_v41, %v262_v41 }
  0xad   :  { %264 = vst [vmem:[%s497_s3] sm:$0xf] %v263_v42 }
  0xae   :  { %v260_v43 = vpop.f32.mrf.mxu2 }

// kernel: forward.40
= control target key start
LH: loop header
LB: loop body
LE: loop exit
PB: predicated region body
PF: predicated region fallthrough
CT: control target
= control target key end

     0   :  { %s787_s1 = inlined_call_operand.vmem [shape: bf16[640,128], index: 1, kind: input, shape index: {}]   ;;  %s788_s2 = inlined_call_operand.vmem [shape: f32[1,128], index: 2, kind: input, shape index: {}]   ;;  %s789_s0 = inlined_call_operand.vmem [shape: bf16[8,640], index: 0, kind: input, shape index: {}]   ;;  %s790_s3 = inlined_call_operand.vmem [shape: bf16[8,128], index: 3, kind: output, shape index: {}]  }
   0x1   :  { %v598_v0 = vld [vmem:[%s787_s1 + $0x38] sm:$0xff]  ;;  %v597_v3 = vld [vmem:[%s787_s1 + $0x30] sm:$0xff]  ;;  %v596_v8 = vld [vmem:[%s787_s1 + $0x28] sm:$0xff] }
   0x2   :  { %v614_v1 = vld [vmem:[%s787_s1 + $0xb8] sm:$0xff]  ;;  %359 = vmatpush.bf16.msra.mxu0 %v598_v0  ;;  %v613_v5 = vld [vmem:[%s787_s1 + $0xb0] sm:$0xff]  ;;  %v612_v9 = vld [vmem:[%s787_s1 + $0xa8] sm:$0xff] }
   0x3   :  { %v622_v2 = vld [vmem:[%s787_s1 + $0xf8] sm:$0xff]  ;;  %385 = vmatpush.bf16.msra.mxu2 %v614_v1  ;;  %v621_v6 = vld [vmem:[%s787_s1 + $0xf0] sm:$0xff]  ;;  %v620_v10 = vld [vmem:[%s787_s1 + $0xe8] sm:$0xff] }
   0x4   :  { %v606_v4 = vld [vmem:[%s787_s1 + $0x78] sm:$0xff]  ;;  %398 = vmatpush.bf16.msra.mxu3 %v622_v2  ;;  %v605_v7 = vld [vmem:[%s787_s1 + $0x70] sm:$0xff]  ;;  %v604_v11 = vld [vmem:[%s787_s1 + $0x68] sm:$0xff] }
   0x5   :  { %372 = vmatpush.bf16.msra.mxu1 %v606_v4  ;;  %v595_v12 = vld [vmem:[%s787_s1 + $0x20] sm:$0xff]  ;;  %v594_v16 = vld [vmem:[%s787_s1 + $0x18] sm:$0xff]  ;;  %v593_v20 = vld [vmem:[%s787_s1 + $0x10] sm:$0xff] }
   0x6   :  { %360 = vmatpush.bf16.msra.mxu0 %v597_v3  ;;  %v611_v13 = vld [vmem:[%s787_s1 + $0xa0] sm:$0xff]  ;;  %v610_v17 = vld [vmem:[%s787_s1 + $0x98] sm:$0xff]  ;;  %v609_v21 = vld [vmem:[%s787_s1 + $0x90] sm:$0xff] }
   0x7   :  { %386 = vmatpush.bf16.msra.mxu2 %v613_v5  ;;  %v619_v14 = vld [vmem:[%s787_s1 + $0xe0] sm:$0xff]  ;;  %v618_v18 = vld [vmem:[%s787_s1 + $0xd8] sm:$0xff]  ;;  %v617_v22 = vld [vmem:[%s787_s1 + $0xd0] sm:$0xff] }
   0x8   :  { %399 = vmatpush.bf16.msra.mxu3 %v621_v6  ;;  %v603_v15 = vld [vmem:[%s787_s1 + $0x60] sm:$0xff]  ;;  %v602_v19 = vld [vmem:[%s787_s1 + $0x58] sm:$0xff]  ;;  %v601_v23 = vld [vmem:[%s787_s1 + $0x50] sm:$0xff] }
   0x9   :  { %373 = vmatpush.bf16.msra.mxu1 %v605_v7  ;;  %v592_v24 = vld [vmem:[%s787_s1 + $0x8] sm:$0xff]  ;;  %v14_v25 = vld [vmem:[%s789_s0] sm:$0xff]  ;;  %v630_v33 = vld [vmem:[%s787_s1 + $0x138] sm:$0xff] }
   0xa   :  { %361 = vmatpush.bf16.msra.mxu0 %v596_v8  ;;  %v608_v26 = vld [vmem:[%s787_s1 + $0x88] sm:$0xff]  ;;  %v104_v30 = vunpack.c.l.b16 %v14_v25  ;;  %v591_v31 = vld [vmem:[%s787_s1] sm:$0xff]  ;;  %v105_v38 = vunpack.c.h.b16 %v14_v25  ;;  %v629_v41 = vld [vmem:[%s787_s1 + $0x130] sm:$0xff] }
   0xb   :  { %387 = vmatpush.bf16.msra.mxu2 %v612_v9  ;;  %v616_v27 = vld [vmem:[%s787_s1 + $0xc8] sm:$0xff]  ;;  %v607_v34 = vld [vmem:[%s787_s1 + $0x80] sm:$0xff]  ;;  %v626_v46 = vld [vmem:[%s787_s1 + $0x118] sm:$0xff] }
   0xc   :  { %400 = vmatpush.bf16.msra.mxu3 %v620_v10  ;;  %v15_v28 = vld [vmem:[%s789_s0 + $0x8] sm:$0xff]  ;;  %v615_v36 = vld [vmem:[%s787_s1 + $0xc0] sm:$0xff]  ;;  %v109_v39 = vpack.c.b16 %v104_v30, %v104_v30  ;;  %v110_v43 = vpack.c.b16 %v105_v38, %v105_v38  ;;  %v625_v47 = vld [vmem:[%s787_s1 + $0x110] sm:$0xff] }
   0xd   :  { %374 = vmatpush.bf16.msra.mxu1 %v604_v11  ;;  %v600_v29 = vld [vmem:[%s787_s1 + $0x48] sm:$0xff]  ;;  %v106_v32 = vunpack.c.l.b16 %v15_v28  ;;  %v107_v35 = vunpack.c.h.b16 %v15_v28  ;;  %v599_v37 = vld [vmem:[%s787_s1 + $0x40] sm:$0xff]  ;;  %v16_v49 = vld [vmem:[%s789_s0 + $0x10] sm:$0xf] }
   0xe   :  { %362 = vmatpush.bf16.msra.mxu0 %v595_v12  ;;  %v628_v44 = vld [vmem:[%s787_s1 + $0x128] sm:$0xff]  ;;  %v627_v45 = vld [vmem:[%s787_s1 + $0x120] sm:$0xff]  ;;  %v108_v50 = vunpack.c.l.b16 %v16_v49 }
   0xf   :  { %388 = vmatpush.bf16.msra.mxu2 %v611_v13  ;;  %v111_v40 = vpack.c.b16 %v106_v32, %v106_v32  ;;  %v112_v42 = vpack.c.b16 %v107_v35, %v107_v35  ;;  %v624_v48 = vld [vmem:[%s787_s1 + $0x108] sm:$0xff]  ;;  %v623_v51 = vld [vmem:[%s787_s1 + $0x100] sm:$0xff] }
  0x10   :  { %401 = vmatpush.bf16.msra.mxu3 %v619_v14  ;;  %v113_v52 = vpack.c.b16 %v108_v50, %v108_v50  ;;  %v631_v59 = vld [vmem:[%s788_s2] ss:$0 sm:$0xff] }
  0x11   :  { %375 = vmatpush.bf16.msra.mxu1 %v603_v15 }
  0x12   :  { %363 = vmatpush.bf16.msra.mxu0 %v594_v16 }
  0x13   :  { %389 = vmatpush.bf16.msra.mxu2 %v610_v17 }
  0x14   :  { %402 = vmatpush.bf16.msra.mxu3 %v618_v18 }
  0x15   :  { %376 = vmatpush.bf16.msra.mxu1 %v602_v19 }
  0x16   :  { %364 = vmatpush.bf16.msra.mxu0 %v593_v20 }
  0x17   :  { %390 = vmatpush.bf16.msra.mxu2 %v609_v21 }
  0x18   :  { %403 = vmatpush.bf16.msra.mxu3 %v617_v22 }
  0x19   :  { %377 = vmatpush.bf16.msra.mxu1 %v601_v23 }
  0x1a   :  { %365 = vmatpush.bf16.msra.mxu0 %v592_v24 }
  0x1b   :  { %391 = vmatpush.bf16.msra.mxu2 %v608_v26 }
  0x1c   :  { %404 = vmatpush.bf16.msra.mxu3 %v616_v27 }
  0x1d   :  { %378 = vmatpush.bf16.msra.mxu1 %v600_v29 }
  0x1e   :  { %366 = vmatpush.bf16.msra.mxu0 %v591_v31 }
  0x1f   :  { %392 = vmatpush.bf16.msra.mxu2 %v607_v34 }
  0x20   :  { %405 = vmatpush.bf16.msra.mxu3 %v615_v36 }
  0x21   :  { %379 = vmatpush.bf16.msra.mxu1 %v599_v37  ;;  %367 = vmatmul.bf16.vlgmr.msra.gmra.mxu0 %v109_v39 }
  0x22   :  { %411 = vmatpush.bf16.msrb.mxu0 %v630_v33  ;;  %393 = vmatmul.bf16.vlgmr.msra.gmra.mxu2 %v111_v40 }
  0x23   :  { %406 = vmatmul.bf16.vlgmr.msra.gmra.mxu3 %v112_v42 }
  0x24   :  { %380 = vmatmul.bf16.vlgmr.msra.gmra.mxu1 %v110_v43 }
  0x26   :  { %412 = vmatpush.bf16.msrb.mxu0 %v629_v41 }
  0x2a   :  { %413 = vmatpush.bf16.msrb.mxu0 %v628_v44 }
  0x2e   :  { %414 = vmatpush.bf16.msrb.mxu0 %v627_v45 }
  0x32   :  { %415 = vmatpush.bf16.msrb.mxu0 %v626_v46 }
  0x36   :  { %416 = vmatpush.bf16.msrb.mxu0 %v625_v47 }
  0x3a   :  { %417 = vmatpush.bf16.msrb.mxu0 %v624_v48 }
  0x3e   :  { %418 = vmatpush.bf16.msrb.mxu0 %v623_v51 }
  0x41   :  { %419 = vmatmul.bf16.vlgmr.msrb.gmra.mxu0 %v113_v52 }
  0x9e   :  { %v368_v53 = vpop.f32.mrf.mxu0 }
  0x9f   :  { %v369_v61 = vadd.f32 %v631_v59, %v368_v53 }
  0xa1   :  { %v381_v54 = vpop.f32.mrf.mxu1 }
  0xa2   :  { %v382_v63 = vadd.f32 %v381_v54, %v369_v61 }
  0xa5   :  { %v394_v55 = vpop.f32.mrf.mxu2 }
  0xa6   :  { %v370_v56 = vpop.f32.mrf.mxu0  ;;  %v407_v57 = vpop.f32.mrf.mxu3  ;;  %v395_v0 = vadd.f32 %v394_v55, %v382_v63 }
  0xa8   :  { %v408_v1 = vadd.f32 %v407_v57, %v395_v0 }
  0xa9   :  { %v383_v58 = vpop.f32.mrf.mxu1 }
  0xad   :  { %v396_v60 = vpop.f32.mrf.mxu2 }
  0xae   :  { %v409_v62 = vpop.f32.mrf.mxu3 }
  0xbe   :  { %v420_v2 = vpop.f32.mrf.mxu0 }
  0xbf   :  { %v421_v3 = vadd.f32 %v420_v2, %v408_v1 }
  0xc1   :  { %v424_v4 = vmax.f32 %v421_v3, 0.0 }
  0xc3   :  { %v425_v5 = vpack.c.bf16 %v424_v4, %v424_v4 }
  0xc5   :  { %426 = vst [vmem:[%s790_s3] sm:$0xf] %v425_v5 }
  0xc6   :  { %v422_v6 = vpop.f32.mrf.mxu0 }

// kernel: forward.39
= control target key start
LH: loop header
LB: loop body
LE: loop exit
PB: predicated region body
PF: predicated region fallthrough
CT: control target
= control target key end

     0   :  { %s801_s1 = inlined_call_operand.vmem [shape: bf16[640,128], index: 1, kind: input, shape index: {}]   ;;  %s802_s2 = inlined_call_operand.vmem [shape: f32[1,128], index: 2, kind: input, shape index: {}]   ;;  %s803_s0 = inlined_call_operand.vmem [shape: bf16[8,640], index: 0, kind: input, shape index: {}]   ;;  %s804_s3 = inlined_call_operand.vmem [shape: bf16[8,128], index: 3, kind: input, shape index: {}]   ;;  %s805_s4 = inlined_call_operand.vmem [shape: bf16[8,128], index: 4, kind: output, shape index: {}]  }
   0x1   :  { %v604_v0 = vld [vmem:[%s801_s1 + $0x38] sm:$0xff]  ;;  %v603_v3 = vld [vmem:[%s801_s1 + $0x30] sm:$0xff]  ;;  %v602_v8 = vld [vmem:[%s801_s1 + $0x28] sm:$0xff] }
   0x2   :  { %v620_v1 = vld [vmem:[%s801_s1 + $0xb8] sm:$0xff]  ;;  %362 = vmatpush.bf16.msra.mxu0 %v604_v0  ;;  %v619_v5 = vld [vmem:[%s801_s1 + $0xb0] sm:$0xff]  ;;  %v618_v9 = vld [vmem:[%s801_s1 + $0xa8] sm:$0xff] }
   0x3   :  { %v628_v2 = vld [vmem:[%s801_s1 + $0xf8] sm:$0xff]  ;;  %388 = vmatpush.bf16.msra.mxu2 %v620_v1  ;;  %v627_v6 = vld [vmem:[%s801_s1 + $0xf0] sm:$0xff]  ;;  %v626_v10 = vld [vmem:[%s801_s1 + $0xe8] sm:$0xff] }
   0x4   :  { %v612_v4 = vld [vmem:[%s801_s1 + $0x78] sm:$0xff]  ;;  %401 = vmatpush.bf16.msra.mxu3 %v628_v2  ;;  %v611_v7 = vld [vmem:[%s801_s1 + $0x70] sm:$0xff]  ;;  %v610_v11 = vld [vmem:[%s801_s1 + $0x68] sm:$0xff] }
   0x5   :  { %375 = vmatpush.bf16.msra.mxu1 %v612_v4  ;;  %v601_v12 = vld [vmem:[%s801_s1 + $0x20] sm:$0xff]  ;;  %v600_v16 = vld [vmem:[%s801_s1 + $0x18] sm:$0xff]  ;;  %v599_v20 = vld [vmem:[%s801_s1 + $0x10] sm:$0xff] }
   0x6   :  { %363 = vmatpush.bf16.msra.mxu0 %v603_v3  ;;  %v617_v13 = vld [vmem:[%s801_s1 + $0xa0] sm:$0xff]  ;;  %v616_v17 = vld [vmem:[%s801_s1 + $0x98] sm:$0xff]  ;;  %v615_v21 = vld [vmem:[%s801_s1 + $0x90] sm:$0xff] }
   0x7   :  { %389 = vmatpush.bf16.msra.mxu2 %v619_v5  ;;  %v625_v14 = vld [vmem:[%s801_s1 + $0xe0] sm:$0xff]  ;;  %v624_v18 = vld [vmem:[%s801_s1 + $0xd8] sm:$0xff]  ;;  %v623_v22 = vld [vmem:[%s801_s1 + $0xd0] sm:$0xff] }
   0x8   :  { %402 = vmatpush.bf16.msra.mxu3 %v627_v6  ;;  %v609_v15 = vld [vmem:[%s801_s1 + $0x60] sm:$0xff]  ;;  %v608_v19 = vld [vmem:[%s801_s1 + $0x58] sm:$0xff]  ;;  %v607_v23 = vld [vmem:[%s801_s1 + $0x50] sm:$0xff] }
   0x9   :  { %376 = vmatpush.bf16.msra.mxu1 %v611_v7  ;;  %v598_v24 = vld [vmem:[%s801_s1 + $0x8] sm:$0xff]  ;;  %v17_v25 = vld [vmem:[%s803_s0] sm:$0xff]  ;;  %v636_v33 = vld [vmem:[%s801_s1 + $0x138] sm:$0xff] }
   0xa   :  { %364 = vmatpush.bf16.msra.mxu0 %v602_v8  ;;  %v614_v26 = vld [vmem:[%s801_s1 + $0x88] sm:$0xff]  ;;  %v107_v30 = vunpack.c.l.b16 %v17_v25  ;;  %v597_v31 = vld [vmem:[%s801_s1] sm:$0xff]  ;;  %v108_v38 = vunpack.c.h.b16 %v17_v25  ;;  %v635_v41 = vld [vmem:[%s801_s1 + $0x130] sm:$0xff] }
   0xb   :  { %390 = vmatpush.bf16.msra.mxu2 %v618_v9  ;;  %v622_v27 = vld [vmem:[%s801_s1 + $0xc8] sm:$0xff]  ;;  %v613_v34 = vld [vmem:[%s801_s1 + $0x80] sm:$0xff]  ;;  %v632_v46 = vld [vmem:[%s801_s1 + $0x118] sm:$0xff] }
   0xc   :  { %403 = vmatpush.bf16.msra.mxu3 %v626_v10  ;;  %v18_v28 = vld [vmem:[%s803_s0 + $0x8] sm:$0xff]  ;;  %v621_v36 = vld [vmem:[%s801_s1 + $0xc0] sm:$0xff]  ;;  %v112_v39 = vpack.c.b16 %v107_v30, %v107_v30  ;;  %v113_v43 = vpack.c.b16 %v108_v38, %v108_v38  ;;  %v631_v47 = vld [vmem:[%s801_s1 + $0x110] sm:$0xff] }
   0xd   :  { %377 = vmatpush.bf16.msra.mxu1 %v610_v11  ;;  %v606_v29 = vld [vmem:[%s801_s1 + $0x48] sm:$0xff]  ;;  %v109_v32 = vunpack.c.l.b16 %v18_v28  ;;  %v110_v35 = vunpack.c.h.b16 %v18_v28  ;;  %v605_v37 = vld [vmem:[%s801_s1 + $0x40] sm:$0xff]  ;;  %v19_v49 = vld [vmem:[%s803_s0 + $0x10] sm:$0xf] }
   0xe   :  { %365 = vmatpush.bf16.msra.mxu0 %v601_v12  ;;  %v634_v44 = vld [vmem:[%s801_s1 + $0x128] sm:$0xff]  ;;  %v633_v45 = vld [vmem:[%s801_s1 + $0x120] sm:$0xff]  ;;  %v111_v50 = vunpack.c.l.b16 %v19_v49 }
   0xf   :  { %391 = vmatpush.bf16.msra.mxu2 %v617_v13  ;;  %v114_v40 = vpack.c.b16 %v109_v32, %v109_v32  ;;  %v115_v42 = vpack.c.b16 %v110_v35, %v110_v35  ;;  %v630_v48 = vld [vmem:[%s801_s1 + $0x108] sm:$0xff]  ;;  %v629_v51 = vld [vmem:[%s801_s1 + $0x100] sm:$0xff] }
  0x10   :  { %404 = vmatpush.bf16.msra.mxu3 %v625_v14  ;;  %v116_v52 = vpack.c.b16 %v111_v50, %v111_v50  ;;  %v637_v59 = vld [vmem:[%s802_s2] ss:$0 sm:$0xff] }
  0x11   :  { %378 = vmatpush.bf16.msra.mxu1 %v609_v15  ;;  %v427_v1 = vld [vmem:[%s804_s3] sm:$0xf] }
  0x12   :  { %366 = vmatpush.bf16.msra.mxu0 %v600_v16  ;;  %v428_v3 = vunpack.c.l.bf16 %v427_v1 }
  0x13   :  { %392 = vmatpush.bf16.msra.mxu2 %v616_v17 }
  0x14   :  { %405 = vmatpush.bf16.msra.mxu3 %v624_v18 }
  0x15   :  { %379 = vmatpush.bf16.msra.mxu1 %v608_v19 }
  0x16   :  { %367 = vmatpush.bf16.msra.mxu0 %v599_v20 }
  0x17   :  { %393 = vmatpush.bf16.msra.mxu2 %v615_v21 }
  0x18   :  { %406 = vmatpush.bf16.msra.mxu3 %v623_v22 }
  0x19   :  { %380 = vmatpush.bf16.msra.mxu1 %v607_v23 }
  0x1a   :  { %368 = vmatpush.bf16.msra.mxu0 %v598_v24 }
  0x1b   :  { %394 = vmatpush.bf16.msra.mxu2 %v614_v26 }
  0x1c   :  { %407 = vmatpush.bf16.msra.mxu3 %v622_v27 }
  0x1d   :  { %381 = vmatpush.bf16.msra.mxu1 %v606_v29 }
  0x1e   :  { %369 = vmatpush.bf16.msra.mxu0 %v597_v31 }
  0x1f   :  { %395 = vmatpush.bf16.msra.mxu2 %v613_v34 }
  0x20   :  { %408 = vmatpush.bf16.msra.mxu3 %v621_v36 }
  0x21   :  { %382 = vmatpush.bf16.msra.mxu1 %v605_v37  ;;  %370 = vmatmul.bf16.vlgmr.msra.gmra.mxu0 %v112_v39 }
  0x22   :  { %414 = vmatpush.bf16.msrb.mxu0 %v636_v33  ;;  %396 = vmatmul.bf16.vlgmr.msra.gmra.mxu2 %v114_v40 }
  0x23   :  { %409 = vmatmul.bf16.vlgmr.msra.gmra.mxu3 %v115_v42 }
  0x24   :  { %383 = vmatmul.bf16.vlgmr.msra.gmra.mxu1 %v113_v43 }
  0x26   :  { %415 = vmatpush.bf16.msrb.mxu0 %v635_v41 }
  0x2a   :  { %416 = vmatpush.bf16.msrb.mxu0 %v634_v44 }
  0x2e   :  { %417 = vmatpush.bf16.msrb.mxu0 %v633_v45 }
  0x32   :  { %418 = vmatpush.bf16.msrb.mxu0 %v632_v46 }
  0x36   :  { %419 = vmatpush.bf16.msrb.mxu0 %v631_v47 }
  0x3a   :  { %420 = vmatpush.bf16.msrb.mxu0 %v630_v48 }
  0x3e   :  { %421 = vmatpush.bf16.msrb.mxu0 %v629_v51 }
  0x41   :  { %422 = vmatmul.bf16.vlgmr.msrb.gmra.mxu0 %v116_v52 }
  0x9e   :  { %v371_v53 = vpop.f32.mrf.mxu0 }
  0x9f   :  { %v372_v61 = vadd.f32 %v637_v59, %v371_v53 }
  0xa1   :  { %v384_v54 = vpop.f32.mrf.mxu1 }
  0xa2   :  { %v385_v63 = vadd.f32 %v384_v54, %v372_v61 }
  0xa5   :  { %v397_v55 = vpop.f32.mrf.mxu2 }
  0xa6   :  { %v373_v56 = vpop.f32.mrf.mxu0  ;;  %v410_v57 = vpop.f32.mrf.mxu3  ;;  %v398_v0 = vadd.f32 %v397_v55, %v385_v63 }
  0xa8   :  { %v411_v2 = vadd.f32 %v410_v57, %v398_v0 }
  0xa9   :  { %v386_v58 = vpop.f32.mrf.mxu1 }
  0xad   :  { %v399_v60 = vpop.f32.mrf.mxu2 }
  0xae   :  { %v412_v62 = vpop.f32.mrf.mxu3 }
  0xbe   :  { %v423_v4 = vpop.f32.mrf.mxu0 }
  0xbf   :  { %v424_v5 = vadd.f32 %v423_v4, %v411_v2 }
  0xc1   :  { %v429_v6 = vadd.f32 %v428_v3, %v424_v5 }
  0xc3   :  { %v430_v7 = vmax.f32 %v429_v6, 0.0 }
  0xc5   :  { %v431_v8 = vpack.c.bf16 %v430_v7, %v430_v7 }
  0xc6   :  { %v425_v9 = vpop.f32.mrf.mxu0 }
  0xc7   :  { %432 = vst [vmem:[%s805_s4] sm:$0xf] %v431_v8 }

</bundles_post_ra>
